<compile_context>
chip_gen: v6e
topology: v6e:2x2x1
jax: 0.10.0
libtpu: 0.0.40
codegen_flags: <defaults>
</compile_context>

<pallas_src>
import functools

import jax
import jax.numpy as jnp
from jax.experimental import pallas as pl

jax.config.update("jax_default_matmul_precision", "highest")

_HIGHEST = jax.lax.Precision.HIGHEST


# --------------------------------------------------------------------------- kernel
def _lstnet_kernel(
    data_ref, obs_ref,
    conv_w_ref, conv_b_ref,
    rnn_wih_ref, rnn_whh_ref, rnn_bih_ref, rnn_bhh_ref,
    skip_wih_ref, skip_whh_ref, skip_bih_ref, skip_bhh_ref,
    fc_wr_ref, fc_ws_ref, fc_b_ref,
    ar_w_ref, ar_b_ref,
    out_ref, scale_ref,
    *, kernel_size, rnn_num_cells, skip_rnn_num_cells, skip_size, conv_skip,
    ar_window, minimum_scale, output_activation):
    n_batch, _, t_ctx = data_ref.shape
    t_conv = t_ctx - kernel_size + 1
    hr = rnn_num_cells
    hs = skip_rnn_num_cells

    data = data_ref[...]                                   # (N, S, Tctx)
    obs = obs_ref[...]

    # 1. MeanScaler (keepdim=True, time_first=False) -- lane-axis reductions only.
    num_obs = jnp.sum(obs, axis=2, keepdims=True)          # (N, S, 1)
    sum_obs = jnp.sum(jnp.abs(data) * obs, axis=2, keepdims=True)
    total_obs = jnp.sum(num_obs, axis=0, keepdims=True)    # (1, S, 1)
    default_scale = jnp.sum(sum_obs, axis=0, keepdims=True) / jnp.maximum(total_obs, 1.0)
    scale = jnp.where(sum_obs > 0.0,
                      sum_obs / jnp.maximum(num_obs, 1.0),
                      default_scale * jnp.ones_like(sum_obs))
    scale = jnp.maximum(scale, minimum_scale)
    scale_ref[...] = scale
    scaled = data / scale                                   # (N, S, Tctx)

    # 2. Conv2d(1->CH, (S, K)) + ReLU via im2col; one matmul per batch element.
    #    Output rows are (n, t)-major so GRU per-step inputs are cheap row slices.
    conv_w = conv_w_ref[...]                                # (K*S, CH)
    conv_b = conv_b_ref[...]                                # (1, CH)
    c_rows = []
    for n in range(n_batch):                                # static unroll, N tiny
        x_tn = scaled[n].T                                  # (Tctx, S)
        patches = jnp.concatenate(
            [x_tn[k:k + t_conv, :] for k in range(kernel_size)], axis=1)   # (Tconv, K*S)
        c_rows.append(jnp.maximum(
            jnp.dot(patches, conv_w, precision=_HIGHEST) + conv_b, 0.0))   # (Tconv, CH)
    x_bm = jnp.concatenate(c_rows, axis=0)                  # (N*Tconv, CH), row = n*Tconv + t

    # 3. Hoist the input-path gate pre-activations of BOTH GRUs out of the loops.
    gi_r = jnp.dot(x_bm, rnn_wih_ref[...], precision=_HIGHEST) + rnn_bih_ref[...]    # (N*T, 3HR)
    gi_s = jnp.dot(x_bm, skip_wih_ref[...], precision=_HIGHEST) + skip_bih_ref[...]  # (N*T, 3HS)

    whh_r = rnn_whh_ref[...]
    bhh_r = rnn_bhh_ref[...]
    whh_s = skip_whh_ref[...]
    bhh_s = skip_bhh_ref[...]

    def gru_step(h, gi, whh, bhh, hdim):
        # PyTorch GRU gate order [r | z | n]; b_hh stays inside the r*() term.
        gh = jnp.dot(h, whh, precision=_HIGHEST) + bhh
        r_g = jax.nn.sigmoid(gi[:, :hdim] + gh[:, :hdim])
        z_g = jax.nn.sigmoid(gi[:, hdim:2 * hdim] + gh[:, hdim:2 * hdim])
        n_g = jnp.tanh(gi[:, 2 * hdim:] + r_g * gh[:, 2 * hdim:])
        return (1.0 - z_g) * n_g + z_g * h

    # 4. Main GRU over the full conv sequence (only h @ Whh left on the serial path).
    h = jnp.zeros((n_batch, hr), jnp.float32)
    for t in range(t_conv):                                 # static unroll
        gi_t = jnp.concatenate(
            [gi_r[n * t_conv + t:n * t_conv + t + 1, :] for n in range(n_batch)], axis=0)
        h = gru_step(h, gi_t, whh_r, bhh_r, hr)

    # 5. Skip GRU over the strided view; batch row order is sidx*N + n (order is
    #    irrelevant to the recurrence, only the fc_w_s pairing below must match).
    t0 = t_conv - conv_skip * skip_size
    h_sk = jnp.zeros((skip_size * n_batch, hs), jnp.float32)
    for j in range(conv_skip):                              # static unroll
        rows = []
        for sidx in range(skip_size):
            tt = t0 + j * skip_size + sidx
            for n in range(n_batch):
                rows.append(gi_s[n * t_conv + tt:n * t_conv + tt + 1, :])
        h_sk = gru_step(h_sk, jnp.concatenate(rows, axis=0), whh_s, bhh_s, hs)

    # 6. Head: fc(cat(r, skip)) for the whole batch in (num_series, N) column layout,
    #    plus ar_fc(scaled[..., -ar_window:]).
    res_sn = jnp.dot(fc_wr_ref[...], h.T, precision=_HIGHEST)           # (S, N)
    fc_ws = fc_ws_ref[...]                                              # (S, skip*HS)
    for sidx in range(skip_size):
        res_sn = res_sn + jnp.dot(
            fc_ws[:, sidx * hs:(sidx + 1) * hs],
            h_sk[sidx * n_batch:(sidx + 1) * n_batch, :].T,
            precision=_HIGHEST)
    res_sn = res_sn + fc_b_ref[...]                                      # (S, 1) broadcast

    ar_w = ar_w_ref[...]                                                 # (AR, P)
    ar_b = ar_b_ref[...]                                                 # (1, P)
    for n in range(n_batch):
        ar_n = jnp.dot(scaled[n, :, t_ctx - ar_window:], ar_w,
                       precision=_HIGHEST) + ar_b                        # (S, P)
        o_n = res_sn[:, n:n + 1] + ar_n
        if output_activation == "sigmoid":
            o_n = jax.nn.sigmoid(o_n)
        elif output_activation == "tanh":
            o_n = jnp.tanh(o_n)
        out_ref[n] = o_n


# --------------------------------------------------------------------------- wrapper
def lstnet_forward(params, past_target, past_observed, cfg):
    ctx = cfg["context_length"]
    data = past_target[..., -ctx:].astype(jnp.float32)
    obs = past_observed[..., -ctx:].astype(jnp.float32)
    n, s, _ = data.shape
    p = params["ar_w"].shape[1]

    kernel = functools.partial(
        _lstnet_kernel,
        kernel_size=cfg["kernel_size"],
        rnn_num_cells=cfg["rnn_num_cells"],
        skip_rnn_num_cells=cfg["skip_rnn_num_cells"],
        skip_size=cfg["skip_size"],
        conv_skip=cfg["conv_skip"],
        ar_window=cfg["ar_window"],
        minimum_scale=cfg["minimum_scale"],
        output_activation=cfg["output_activation"])

    # Single gridless call: every operand/result is one whole-array VMEM block
    # (total working set is a few KB, so no tiling is needed on any generation).
    out, scale = pl.pallas_call(
        kernel,
        out_shape=(jax.ShapeDtypeStruct((n, s, p), jnp.float32),
                   jax.ShapeDtypeStruct((n, s, 1), jnp.float32)),
    )(data, obs,
      params["conv_w"], params["conv_b"],
      params["rnn_wih"], params["rnn_whh"], params["rnn_bih"], params["rnn_bhh"],
      params["skip_wih"], params["skip_whh"], params["skip_bih"], params["skip_bhh"],
      params["fc_w_r"], params["fc_w_s"], params["fc_b"],
      params["ar_w"], params["ar_b"])
    return out, scale


# --------------------------------------------------------------------------- pure-JAX reference
def lstnet_reference(params, past_target, past_observed, cfg):
    ctx = cfg["context_length"]
    data = past_target[..., -ctx:].astype(jnp.float32)
    obs = past_observed[..., -ctx:].astype(jnp.float32)
    n, s, _ = data.shape
    ksz, ch = cfg["kernel_size"], cfg["channels"]
    skip, conv_skip, hs = cfg["skip_size"], cfg["conv_skip"], cfg["skip_rnn_num_cells"]
    ar = cfg["ar_window"]

    num_obs = obs.sum(axis=2)
    sum_obs = (jnp.abs(data) * obs).sum(axis=2)
    default_scale = sum_obs.sum(axis=0) / jnp.maximum(num_obs.sum(axis=0), 1.0)
    scale = jnp.where(sum_obs > 0.0, sum_obs / jnp.maximum(num_obs, 1.0),
                      default_scale[None, :] * jnp.ones_like(sum_obs))
    scale = jnp.maximum(scale, cfg["minimum_scale"])[:, :, None]        # (N, S, 1)
    scaled = data / scale

    t_conv = ctx - ksz + 1
    c = jnp.zeros((n, t_conv, ch), jnp.float32)
    for k in range(ksz):
        wk = params["conv_w"][k * s:(k + 1) * s, :]                     # (S, CH)
        c = c + jnp.einsum("nst,sc->ntc", scaled[:, :, k:k + t_conv], wk)
    c = jnp.maximum(c + params["conv_b"][None, :, :], 0.0)              # (N, Tconv, CH)

    def gru_ref(x_seq, wih, whh, bih, bhh):
        b, hdim = x_seq.shape[1], whh.shape[0]
        h = jnp.zeros((b, hdim), jnp.float32)
        for t in range(x_seq.shape[0]):
            gi = x_seq[t] @ wih + bih
            gh = h @ whh + bhh
            rg = jax.nn.sigmoid(gi[:, :hdim] + gh[:, :hdim])
            zg = jax.nn.sigmoid(gi[:, hdim:2 * hdim] + gh[:, hdim:2 * hdim])
            ng = jnp.tanh(gi[:, 2 * hdim:] + rg * gh[:, 2 * hdim:])
            h = (1.0 - zg) * ng + zg * h
        return h

    r = gru_ref(jnp.transpose(c, (1, 0, 2)), params["rnn_wih"], params["rnn_whh"],
                params["rnn_bih"], params["rnn_bhh"])                    # (N, HR)

    t0 = t_conv - conv_skip * skip
    sk = c[:, t0:, :].reshape(n, conv_skip, skip, ch)
    sk = jnp.transpose(sk, (1, 0, 2, 3)).reshape(conv_skip, n * skip, ch)
    h_skip = gru_ref(sk, params["skip_wih"], params["skip_whh"],
                     params["skip_bih"], params["skip_bhh"])             # (N*skip, HS)
    h_skip = h_skip.reshape(n, skip * hs)

    res = (r @ params["fc_w_r"].T + h_skip @ params["fc_w_s"].T
           + params["fc_b"][:, 0][None, :])                              # (N, S)
    ar_x = scaled[:, :, -ar:].reshape(n * s, ar)
    ar_out = (ar_x @ params["ar_w"] + params["ar_b"]).reshape(n, s, -1)
    out = res[:, :, None] + ar_out
    act = cfg["output_activation"]
    if act == "sigmoid":
        out = jax.nn.sigmoid(out)
    elif act == "tanh":
        out = jnp.tanh(out)
    return out, scale


# --------------------------------------------------------------------------- main
if __name__ == "__main__":
    key = jax.random.PRNGKey(0)

    cfg = dict(
        num_series=4, channels=8, kernel_size=3,
        rnn_num_cells=32, skip_rnn_num_cells=16, skip_size=2,
        ar_window=4, context_length=16, prediction_length=4,
        output_activation=None, minimum_scale=1e-10,
    )
    cfg["conv_skip"] = (cfg["context_length"] - cfg["kernel_size"]) // cfg["skip_size"]
    assert cfg["channels"] % cfg["skip_size"] == 0 and cfg["conv_skip"] > 0

    S, CH, K = cfg["num_series"], cfg["channels"], cfg["kernel_size"]
    HR, HS, SK = cfg["rnn_num_cells"], cfg["skip_rnn_num_cells"], cfg["skip_size"]
    AR, P = cfg["ar_window"], cfg["prediction_length"]

    keys = jax.random.split(key, 20)

    def nrm(k, shape, s=0.3):
        return jax.random.normal(k, shape, dtype=jnp.float32) * s

    params = dict(
        conv_w=nrm(keys[0], (K * S, CH)),          # row k*S+s  <->  Conv2d weight[:, 0, s, k]
        conv_b=nrm(keys[1], (1, CH), 0.1),
        rnn_wih=nrm(keys[2], (CH, 3 * HR)),        # gate order [r | z | n] column blocks
        rnn_whh=nrm(keys[3], (HR, 3 * HR)),
        rnn_bih=nrm(keys[4], (1, 3 * HR), 0.1),
        rnn_bhh=nrm(keys[5], (1, 3 * HR), 0.1),
        skip_wih=nrm(keys[6], (CH, 3 * HS)),
        skip_whh=nrm(keys[7], (HS, 3 * HS)),
        skip_bih=nrm(keys[8], (1, 3 * HS), 0.1),
        skip_bhh=nrm(keys[9], (1, 3 * HS), 0.1),
        fc_w_r=nrm(keys[10], (S, HR)),
        fc_w_s=nrm(keys[11], (S, SK * HS)),
        fc_b=nrm(keys[12], (S, 1), 0.1),
        ar_w=nrm(keys[13], (AR, P)),
        ar_b=nrm(keys[14], (1, P), 0.1),
    )

    batch, t_total = 2, 24
    past_target = jax.random.normal(keys[15], (batch, S, t_total), dtype=jnp.float32)
    past_observed = (jax.random.uniform(keys[16], (batch, S, t_total)) > 0.1).astype(jnp.float32)

    out, scale = lstnet_forward(params, past_target, past_observed, cfg)
    out = jax.block_until_ready(out)
    scale = jax.block_until_ready(scale)

    ref_out, ref_scale = lstnet_reference(params, past_target, past_observed, cfg)

    assert out.shape == (batch, S, P)
    assert scale.shape == (batch, S, 1)
    assert jnp.allclose(scale, ref_scale, atol=1e-6, rtol=1e-6), \
        float(jnp.max(jnp.abs(scale - ref_scale)))
    assert jnp.allclose(out, ref_out, atol=1e-4, rtol=1e-4), \
        float(jnp.max(jnp.abs(out - ref_out)))

    print("KERNEL_OK")
</pallas_src>

<mosaic_0001>
module attributes {stable_mosaic.version = 11 : i64} {
  func.func @_lstnet_kernel(%arg0: memref<2x4x16xf32, #tpu.memory_space<vmem>>, %arg1: memref<2x4x16xf32, #tpu.memory_space<vmem>>, %arg2: memref<12x8xf32, #tpu.memory_space<vmem>>, %arg3: memref<1x8xf32, #tpu.memory_space<vmem>>, %arg4: memref<8x96xf32, #tpu.memory_space<vmem>>, %arg5: memref<32x96xf32, #tpu.memory_space<vmem>>, %arg6: memref<1x96xf32, #tpu.memory_space<vmem>>, %arg7: memref<1x96xf32, #tpu.memory_space<vmem>>, %arg8: memref<8x48xf32, #tpu.memory_space<vmem>>, %arg9: memref<16x48xf32, #tpu.memory_space<vmem>>, %arg10: memref<1x48xf32, #tpu.memory_space<vmem>>, %arg11: memref<1x48xf32, #tpu.memory_space<vmem>>, %arg12: memref<4x32xf32, #tpu.memory_space<vmem>>, %arg13: memref<4x32xf32, #tpu.memory_space<vmem>>, %arg14: memref<4x1xf32, #tpu.memory_space<vmem>>, %arg15: memref<4x4xf32, #tpu.memory_space<vmem>>, %arg16: memref<1x4xf32, #tpu.memory_space<vmem>>, %arg17: memref<2x4x4xf32, #tpu.memory_space<vmem>>, %arg18: memref<2x4x1xf32, #tpu.memory_space<vmem>>) attributes {dimension_semantics = [], scalar_prefetch = 0 : i64, scratch_operands = 0 : i64, tpu.core_type = #tpu.core_type<tc>} {
    %c0 = arith.constant 0 : index
    %c0_0 = arith.constant 0 : index
    %c0_1 = arith.constant 0 : index
    %0 = vector.load %arg0[%c0, %c0_0, %c0_1] : memref<2x4x16xf32, #tpu.memory_space<vmem>>, vector<2x4x16xf32>
    %c0_2 = arith.constant 0 : index
    %c0_3 = arith.constant 0 : index
    %c0_4 = arith.constant 0 : index
    %1 = vector.load %arg1[%c0_2, %c0_3, %c0_4] : memref<2x4x16xf32, #tpu.memory_space<vmem>>, vector<2x4x16xf32>
    %cst = arith.constant dense<0.000000e+00> : vector<2x4xf32>
    %2 = vector.multi_reduction <add>, %1, %cst [2] : vector<2x4x16xf32> to vector<2x4xf32>
    %3 = vector.shape_cast %2 : vector<2x4xf32> to vector<2x4x1xf32>
    %4 = math.absf %0 : vector<2x4x16xf32>
    %5 = arith.mulf %4, %1 : vector<2x4x16xf32>
    %cst_5 = arith.constant dense<0.000000e+00> : vector<2x4xf32>
    %6 = vector.multi_reduction <add>, %5, %cst_5 [2] : vector<2x4x16xf32> to vector<2x4xf32>
    %7 = vector.shape_cast %6 : vector<2x4xf32> to vector<2x4x1xf32>
    %cst_6 = arith.constant dense<0.000000e+00> : vector<4x1xf32>
    %8 = vector.multi_reduction <add>, %3, %cst_6 [0] : vector<2x4x1xf32> to vector<4x1xf32>
    %9 = vector.shape_cast %8 : vector<4x1xf32> to vector<1x4x1xf32>
    %cst_7 = arith.constant dense<0.000000e+00> : vector<4x1xf32>
    %10 = vector.multi_reduction <add>, %7, %cst_7 [0] : vector<2x4x1xf32> to vector<4x1xf32>
    %11 = vector.shape_cast %10 : vector<4x1xf32> to vector<1x4x1xf32>
    %cst_8 = arith.constant 1.000000e+00 : f32
    %12 = vector.broadcast %cst_8 : f32 to vector<1x4x1xf32>
    %13 = arith.maximumf %9, %12 : vector<1x4x1xf32>
    %14 = arith.divf %11, %13 : vector<1x4x1xf32>
    %cst_9 = arith.constant 0.000000e+00 : f32
    %15 = vector.broadcast %cst_9 : f32 to vector<2x4x1xf32>
    %16 = arith.cmpf ogt, %7, %15 : vector<2x4x1xf32>
    %cst_10 = arith.constant 1.000000e+00 : f32
    %17 = vector.broadcast %cst_10 : f32 to vector<2x4x1xf32>
    %18 = arith.maximumf %3, %17 : vector<2x4x1xf32>
    %19 = arith.divf %7, %18 : vector<2x4x1xf32>
    %cst_11 = arith.constant 1.000000e+00 : f32
    %20 = vector.broadcast %cst_11 : f32 to vector<2x4x1xf32>
    %21 = vector.broadcast %14 : vector<1x4x1xf32> to vector<2x4x1xf32>
    %22 = arith.mulf %21, %20 : vector<2x4x1xf32>
    %23 = arith.select %16, %19, %22 : vector<2x4x1xi1>, vector<2x4x1xf32>
    %cst_12 = arith.constant 1.000000e-10 : f32
    %24 = vector.broadcast %cst_12 : f32 to vector<2x4x1xf32>
    %25 = arith.maximumf %23, %24 : vector<2x4x1xf32>
    %c0_13 = arith.constant 0 : index
    %c0_14 = arith.constant 0 : index
    %c0_15 = arith.constant 0 : index
    %26 = vector.load %arg18[%c0_13, %c0_14, %c0_15] : memref<2x4x1xf32, #tpu.memory_space<vmem>>, vector<2x4x1xf32>
    tpu.vector_store %arg18[%c0_13, %c0_14, %c0_15], %25 {strides = array<i32>} : memref<2x4x1xf32, #tpu.memory_space<vmem>>, vector<2x4x1xf32>,
    %27 = vector.broadcast %25 : vector<2x4x1xf32> to vector<2x4x16xf32>
    %28 = arith.divf %0, %27 : vector<2x4x16xf32>
    %c0_16 = arith.constant 0 : index
    %c0_17 = arith.constant 0 : index
    %29 = vector.load %arg2[%c0_16, %c0_17] : memref<12x8xf32, #tpu.memory_space<vmem>>, vector<12x8xf32>
    %c0_18 = arith.constant 0 : index
    %c0_19 = arith.constant 0 : index
    %30 = vector.load %arg3[%c0_18, %c0_19] : memref<1x8xf32, #tpu.memory_space<vmem>>, vector<1x8xf32>
    %31 = vector.extract_strided_slice %28 {offsets = [0, 0, 0], sizes = [1, 4, 16], strides = [1, 1, 1]} : vector<2x4x16xf32> to vector<1x4x16xf32>
    %32 = vector.shape_cast %31 : vector<1x4x16xf32> to vector<4x16xf32>
    %33 = tpu.transpose %32, [1, 0] : vector<4x16xf32> -> vector<16x4xf32>
    %34 = vector.extract_strided_slice %33 {offsets = [0, 0], sizes = [14, 4], strides = [1, 1]} : vector<16x4xf32> to vector<14x4xf32>
    %35 = vector.extract_strided_slice %33 {offsets = [1, 0], sizes = [14, 4], strides = [1, 1]} : vector<16x4xf32> to vector<14x4xf32>
    %36 = vector.extract_strided_slice %33 {offsets = [2, 0], sizes = [14, 4], strides = [1, 1]} : vector<16x4xf32> to vector<14x4xf32>
    %37 = tpu.concatenate %34, %35, %36 in 1 : vector<14x4xf32>, vector<14x4xf32>, vector<14x4xf32> -> vector<14x12xf32>
    %cst_20 = arith.constant dense<0.000000e+00> : vector<14x8xf32>
    %38 = tpu.matmul %37, %29, %cst_20 {dimension_numbers = #tpu.dot_dimension_numbers<[1], [0], [0], [1], [0, 0, 1, 1], [], []>, precision = #tpu.contract_precision<fp32>} : vector<14x12xf32>, vector<12x8xf32>, vector<14x8xf32> -> vector<14x8xf32>
    %39 = vector.broadcast %30 : vector<1x8xf32> to vector<14x8xf32>
    %40 = arith.addf %38, %39 : vector<14x8xf32>
    %cst_21 = arith.constant 0.000000e+00 : f32
    %41 = vector.broadcast %cst_21 : f32 to vector<14x8xf32>
    %42 = arith.maximumf %40, %41 : vector<14x8xf32>
    %43 = vector.extract_strided_slice %28 {offsets = [1, 0, 0], sizes = [1, 4, 16], strides = [1, 1, 1]} : vector<2x4x16xf32> to vector<1x4x16xf32>
    %44 = vector.shape_cast %43 : vector<1x4x16xf32> to vector<4x16xf32>
    %45 = tpu.transpose %44, [1, 0] : vector<4x16xf32> -> vector<16x4xf32>
    %46 = vector.extract_strided_slice %45 {offsets = [0, 0], sizes = [14, 4], strides = [1, 1]} : vector<16x4xf32> to vector<14x4xf32>
    %47 = vector.extract_strided_slice %45 {offsets = [1, 0], sizes = [14, 4], strides = [1, 1]} : vector<16x4xf32> to vector<14x4xf32>
    %48 = vector.extract_strided_slice %45 {offsets = [2, 0], sizes = [14, 4], strides = [1, 1]} : vector<16x4xf32> to vector<14x4xf32>
    %49 = tpu.concatenate %46, %47, %48 in 1 : vector<14x4xf32>, vector<14x4xf32>, vector<14x4xf32> -> vector<14x12xf32>
    %cst_22 = arith.constant dense<0.000000e+00> : vector<14x8xf32>
    %50 = tpu.matmul %49, %29, %cst_22 {dimension_numbers = #tpu.dot_dimension_numbers<[1], [0], [0], [1], [0, 0, 1, 1], [], []>, precision = #tpu.contract_precision<fp32>} : vector<14x12xf32>, vector<12x8xf32>, vector<14x8xf32> -> vector<14x8xf32>
    %51 = vector.broadcast %30 : vector<1x8xf32> to vector<14x8xf32>
    %52 = arith.addf %50, %51 : vector<14x8xf32>
    %cst_23 = arith.constant 0.000000e+00 : f32
    %53 = vector.broadcast %cst_23 : f32 to vector<14x8xf32>
    %54 = arith.maximumf %52, %53 : vector<14x8xf32>
    %55 = tpu.concatenate %42, %54 in 0 : vector<14x8xf32>, vector<14x8xf32> -> vector<28x8xf32>
    %c0_24 = arith.constant 0 : index
    %c0_25 = arith.constant 0 : index
    %56 = vector.load %arg4[%c0_24, %c0_25] : memref<8x96xf32, #tpu.memory_space<vmem>>, vector<8x96xf32>
    %cst_26 = arith.constant dense<0.000000e+00> : vector<28x96xf32>
    %57 = tpu.matmul %55, %56, %cst_26 {dimension_numbers = #tpu.dot_dimension_numbers<[1], [0], [0], [1], [0, 0, 1, 1], [], []>, precision = #tpu.contract_precision<fp32>} : vector<28x8xf32>, vector<8x96xf32>, vector<28x96xf32> -> vector<28x96xf32>
    %c0_27 = arith.constant 0 : index
    %c0_28 = arith.constant 0 : index
    %58 = vector.load %arg6[%c0_27, %c0_28] : memref<1x96xf32, #tpu.memory_space<vmem>>, vector<1x96xf32>
    %59 = vector.broadcast %58 : vector<1x96xf32> to vector<28x96xf32>
    %60 = arith.addf %57, %59 : vector<28x96xf32>
    %c0_29 = arith.constant 0 : index
    %c0_30 = arith.constant 0 : index
    %61 = vector.load %arg8[%c0_29, %c0_30] : memref<8x48xf32, #tpu.memory_space<vmem>>, vector<8x48xf32>
    %cst_31 = arith.constant dense<0.000000e+00> : vector<28x48xf32>
    %62 = tpu.matmul %55, %61, %cst_31 {dimension_numbers = #tpu.dot_dimension_numbers<[1], [0], [0], [1], [0, 0, 1, 1], [], []>, precision = #tpu.contract_precision<fp32>} : vector<28x8xf32>, vector<8x48xf32>, vector<28x48xf32> -> vector<28x48xf32>
    %c0_32 = arith.constant 0 : index
    %c0_33 = arith.constant 0 : index
    %63 = vector.load %arg10[%c0_32, %c0_33] : memref<1x48xf32, #tpu.memory_space<vmem>>, vector<1x48xf32>
    %64 = vector.broadcast %63 : vector<1x48xf32> to vector<28x48xf32>
    %65 = arith.addf %62, %64 : vector<28x48xf32>
    %c0_34 = arith.constant 0 : index
    %c0_35 = arith.constant 0 : index
    %66 = vector.load %arg5[%c0_34, %c0_35] : memref<32x96xf32, #tpu.memory_space<vmem>>, vector<32x96xf32>
    %c0_36 = arith.constant 0 : index
    %c0_37 = arith.constant 0 : index
    %67 = vector.load %arg7[%c0_36, %c0_37] : memref<1x96xf32, #tpu.memory_space<vmem>>, vector<1x96xf32>
    %c0_38 = arith.constant 0 : index
    %c0_39 = arith.constant 0 : index
    %68 = vector.load %arg9[%c0_38, %c0_39] : memref<16x48xf32, #tpu.memory_space<vmem>>, vector<16x48xf32>
    %c0_40 = arith.constant 0 : index
    %c0_41 = arith.constant 0 : index
    %69 = vector.load %arg11[%c0_40, %c0_41] : memref<1x48xf32, #tpu.memory_space<vmem>>, vector<1x48xf32>
    %cst_42 = arith.constant 0.000000e+00 : f32
    %70 = vector.broadcast %cst_42 : f32 to vector<2x32xf32>
    %71 = vector.extract_strided_slice %60 {offsets = [0, 0], sizes = [1, 96], strides = [1, 1]} : vector<28x96xf32> to vector<1x96xf32>
    %72 = vector.extract_strided_slice %60 {offsets = [14, 0], sizes = [1, 96], strides = [1, 1]} : vector<28x96xf32> to vector<1x96xf32>
    %73 = tpu.concatenate %71, %72 in 0 : vector<1x96xf32>, vector<1x96xf32> -> vector<2x96xf32>
    %cst_43 = arith.constant dense<0.000000e+00> : vector<2x96xf32>
    %74 = tpu.matmul %70, %66, %cst_43 {dimension_numbers = #tpu.dot_dimension_numbers<[1], [0], [0], [1], [0, 0, 1, 1], [], []>, precision = #tpu.contract_precision<fp32>} : vector<2x32xf32>, vector<32x96xf32>, vector<2x96xf32> -> vector<2x96xf32>
    %75 = vector.broadcast %67 : vector<1x96xf32> to vector<2x96xf32>
    %76 = arith.addf %74, %75 : vector<2x96xf32>
    %77 = vector.extract_strided_slice %73 {offsets = [0, 0], sizes = [2, 32], strides = [1, 1]} : vector<2x96xf32> to vector<2x32xf32>
    %78 = vector.extract_strided_slice %76 {offsets = [0, 0], sizes = [2, 32], strides = [1, 1]} : vector<2x96xf32> to vector<2x32xf32>
    %79 = arith.addf %77, %78 : vector<2x32xf32>
    %80 = arith.negf %79 : vector<2x32xf32>
    %81 = math.exp %80 : vector<2x32xf32>
    %cst_44 = arith.constant 1.000000e+00 : f32
    %82 = vector.broadcast %cst_44 : f32 to vector<2x32xf32>
    %83 = arith.addf %82, %81 : vector<2x32xf32>
    %84 = arith.divf %82, %83 : vector<2x32xf32>
    %85 = vector.extract_strided_slice %73 {offsets = [0, 32], sizes = [2, 32], strides = [1, 1]} : vector<2x96xf32> to vector<2x32xf32>
    %86 = vector.extract_strided_slice %76 {offsets = [0, 32], sizes = [2, 32], strides = [1, 1]} : vector<2x96xf32> to vector<2x32xf32>
    %87 = arith.addf %85, %86 : vector<2x32xf32>
    %88 = arith.negf %87 : vector<2x32xf32>
    %89 = math.exp %88 : vector<2x32xf32>
    %cst_45 = arith.constant 1.000000e+00 : f32
    %90 = vector.broadcast %cst_45 : f32 to vector<2x32xf32>
    %91 = arith.addf %90, %89 : vector<2x32xf32>
    %92 = arith.divf %90, %91 : vector<2x32xf32>
    %93 = vector.extract_strided_slice %73 {offsets = [0, 64], sizes = [2, 32], strides = [1, 1]} : vector<2x96xf32> to vector<2x32xf32>
    %94 = vector.extract_strided_slice %76 {offsets = [0, 64], sizes = [2, 32], strides = [1, 1]} : vector<2x96xf32> to vector<2x32xf32>
    %95 = arith.mulf %84, %94 : vector<2x32xf32>
    %96 = arith.addf %93, %95 : vector<2x32xf32>
    %97 = math.tanh %96 : vector<2x32xf32>
    %cst_46 = arith.constant 1.000000e+00 : f32
    %98 = vector.broadcast %cst_46 : f32 to vector<2x32xf32>
    %99 = arith.subf %98, %92 : vector<2x32xf32>
    %100 = arith.mulf %99, %97 : vector<2x32xf32>
    %101 = arith.mulf %92, %70 : vector<2x32xf32>
    %102 = arith.addf %100, %101 : vector<2x32xf32>
    %103 = vector.extract_strided_slice %60 {offsets = [1, 0], sizes = [1, 96], strides = [1, 1]} : vector<28x96xf32> to vector<1x96xf32>
    %104 = vector.extract_strided_slice %60 {offsets = [15, 0], sizes = [1, 96], strides = [1, 1]} : vector<28x96xf32> to vector<1x96xf32>
    %105 = tpu.concatenate %103, %104 in 0 : vector<1x96xf32>, vector<1x96xf32> -> vector<2x96xf32>
    %cst_47 = arith.constant dense<0.000000e+00> : vector<2x96xf32>
    %106 = tpu.matmul %102, %66, %cst_47 {dimension_numbers = #tpu.dot_dimension_numbers<[1], [0], [0], [1], [0, 0, 1, 1], [], []>, precision = #tpu.contract_precision<fp32>} : vector<2x32xf32>, vector<32x96xf32>, vector<2x96xf32> -> vector<2x96xf32>
    %107 = vector.broadcast %67 : vector<1x96xf32> to vector<2x96xf32>
    %108 = arith.addf %106, %107 : vector<2x96xf32>
    %109 = vector.extract_strided_slice %105 {offsets = [0, 0], sizes = [2, 32], strides = [1, 1]} : vector<2x96xf32> to vector<2x32xf32>
    %110 = vector.extract_strided_slice %108 {offsets = [0, 0], sizes = [2, 32], strides = [1, 1]} : vector<2x96xf32> to vector<2x32xf32>
    %111 = arith.addf %109, %110 : vector<2x32xf32>
    %112 = arith.negf %111 : vector<2x32xf32>
    %113 = math.exp %112 : vector<2x32xf32>
    %cst_48 = arith.constant 1.000000e+00 : f32
    %114 = vector.broadcast %cst_48 : f32 to vector<2x32xf32>
    %115 = arith.addf %114, %113 : vector<2x32xf32>
    %116 = arith.divf %114, %115 : vector<2x32xf32>
    %117 = vector.extract_strided_slice %105 {offsets = [0, 32], sizes = [2, 32], strides = [1, 1]} : vector<2x96xf32> to vector<2x32xf32>
    %118 = vector.extract_strided_slice %108 {offsets = [0, 32], sizes = [2, 32], strides = [1, 1]} : vector<2x96xf32> to vector<2x32xf32>
    %119 = arith.addf %117, %118 : vector<2x32xf32>
    %120 = arith.negf %119 : vector<2x32xf32>
    %121 = math.exp %120 : vector<2x32xf32>
    %cst_49 = arith.constant 1.000000e+00 : f32
    %122 = vector.broadcast %cst_49 : f32 to vector<2x32xf32>
    %123 = arith.addf %122, %121 : vector<2x32xf32>
    %124 = arith.divf %122, %123 : vector<2x32xf32>
    %125 = vector.extract_strided_slice %105 {offsets = [0, 64], sizes = [2, 32], strides = [1, 1]} : vector<2x96xf32> to vector<2x32xf32>
    %126 = vector.extract_strided_slice %108 {offsets = [0, 64], sizes = [2, 32], strides = [1, 1]} : vector<2x96xf32> to vector<2x32xf32>
    %127 = arith.mulf %116, %126 : vector<2x32xf32>
    %128 = arith.addf %125, %127 : vector<2x32xf32>
    %129 = math.tanh %128 : vector<2x32xf32>
    %cst_50 = arith.constant 1.000000e+00 : f32
    %130 = vector.broadcast %cst_50 : f32 to vector<2x32xf32>
    %131 = arith.subf %130, %124 : vector<2x32xf32>
    %132 = arith.mulf %131, %129 : vector<2x32xf32>
    %133 = arith.mulf %124, %102 : vector<2x32xf32>
    %134 = arith.addf %132, %133 : vector<2x32xf32>
    %135 = vector.extract_strided_slice %60 {offsets = [2, 0], sizes = [1, 96], strides = [1, 1]} : vector<28x96xf32> to vector<1x96xf32>
    %136 = vector.extract_strided_slice %60 {offsets = [16, 0], sizes = [1, 96], strides = [1, 1]} : vector<28x96xf32> to vector<1x96xf32>
    %137 = tpu.concatenate %135, %136 in 0 : vector<1x96xf32>, vector<1x96xf32> -> vector<2x96xf32>
    %cst_51 = arith.constant dense<0.000000e+00> : vector<2x96xf32>
    %138 = tpu.matmul %134, %66, %cst_51 {dimension_numbers = #tpu.dot_dimension_numbers<[1], [0], [0], [1], [0, 0, 1, 1], [], []>, precision = #tpu.contract_precision<fp32>} : vector<2x32xf32>, vector<32x96xf32>, vector<2x96xf32> -> vector<2x96xf32>
    %139 = vector.broadcast %67 : vector<1x96xf32> to vector<2x96xf32>
    %140 = arith.addf %138, %139 : vector<2x96xf32>
    %141 = vector.extract_strided_slice %137 {offsets = [0, 0], sizes = [2, 32], strides = [1, 1]} : vector<2x96xf32> to vector<2x32xf32>
    %142 = vector.extract_strided_slice %140 {offsets = [0, 0], sizes = [2, 32], strides = [1, 1]} : vector<2x96xf32> to vector<2x32xf32>
    %143 = arith.addf %141, %142 : vector<2x32xf32>
    %144 = arith.negf %143 : vector<2x32xf32>
    %145 = math.exp %144 : vector<2x32xf32>
    %cst_52 = arith.constant 1.000000e+00 : f32
    %146 = vector.broadcast %cst_52 : f32 to vector<2x32xf32>
    %147 = arith.addf %146, %145 : vector<2x32xf32>
    %148 = arith.divf %146, %147 : vector<2x32xf32>
    %149 = vector.extract_strided_slice %137 {offsets = [0, 32], sizes = [2, 32], strides = [1, 1]} : vector<2x96xf32> to vector<2x32xf32>
    %150 = vector.extract_strided_slice %140 {offsets = [0, 32], sizes = [2, 32], strides = [1, 1]} : vector<2x96xf32> to vector<2x32xf32>
    %151 = arith.addf %149, %150 : vector<2x32xf32>
    %152 = arith.negf %151 : vector<2x32xf32>
    %153 = math.exp %152 : vector<2x32xf32>
    %cst_53 = arith.constant 1.000000e+00 : f32
    %154 = vector.broadcast %cst_53 : f32 to vector<2x32xf32>
    %155 = arith.addf %154, %153 : vector<2x32xf32>
    %156 = arith.divf %154, %155 : vector<2x32xf32>
    %157 = vector.extract_strided_slice %137 {offsets = [0, 64], sizes = [2, 32], strides = [1, 1]} : vector<2x96xf32> to vector<2x32xf32>
    %158 = vector.extract_strided_slice %140 {offsets = [0, 64], sizes = [2, 32], strides = [1, 1]} : vector<2x96xf32> to vector<2x32xf32>
    %159 = arith.mulf %148, %158 : vector<2x32xf32>
    %160 = arith.addf %157, %159 : vector<2x32xf32>
    %161 = math.tanh %160 : vector<2x32xf32>
    %cst_54 = arith.constant 1.000000e+00 : f32
    %162 = vector.broadcast %cst_54 : f32 to vector<2x32xf32>
    %163 = arith.subf %162, %156 : vector<2x32xf32>
    %164 = arith.mulf %163, %161 : vector<2x32xf32>
    %165 = arith.mulf %156, %134 : vector<2x32xf32>
    %166 = arith.addf %164, %165 : vector<2x32xf32>
    %167 = vector.extract_strided_slice %60 {offsets = [3, 0], sizes = [1, 96], strides = [1, 1]} : vector<28x96xf32> to vector<1x96xf32>
    %168 = vector.extract_strided_slice %60 {offsets = [17, 0], sizes = [1, 96], strides = [1, 1]} : vector<28x96xf32> to vector<1x96xf32>
    %169 = tpu.concatenate %167, %168 in 0 : vector<1x96xf32>, vector<1x96xf32> -> vector<2x96xf32>
    %cst_55 = arith.constant dense<0.000000e+00> : vector<2x96xf32>
    %170 = tpu.matmul %166, %66, %cst_55 {dimension_numbers = #tpu.dot_dimension_numbers<[1], [0], [0], [1], [0, 0, 1, 1], [], []>, precision = #tpu.contract_precision<fp32>} : vector<2x32xf32>, vector<32x96xf32>, vector<2x96xf32> -> vector<2x96xf32>
    %171 = vector.broadcast %67 : vector<1x96xf32> to vector<2x96xf32>
    %172 = arith.addf %170, %171 : vector<2x96xf32>
    %173 = vector.extract_strided_slice %169 {offsets = [0, 0], sizes = [2, 32], strides = [1, 1]} : vector<2x96xf32> to vector<2x32xf32>
    %174 = vector.extract_strided_slice %172 {offsets = [0, 0], sizes = [2, 32], strides = [1, 1]} : vector<2x96xf32> to vector<2x32xf32>
    %175 = arith.addf %173, %174 : vector<2x32xf32>
    %176 = arith.negf %175 : vector<2x32xf32>
    %177 = math.exp %176 : vector<2x32xf32>
    %cst_56 = arith.constant 1.000000e+00 : f32
    %178 = vector.broadcast %cst_56 : f32 to vector<2x32xf32>
    %179 = arith.addf %178, %177 : vector<2x32xf32>
    %180 = arith.divf %178, %179 : vector<2x32xf32>
    %181 = vector.extract_strided_slice %169 {offsets = [0, 32], sizes = [2, 32], strides = [1, 1]} : vector<2x96xf32> to vector<2x32xf32>
    %182 = vector.extract_strided_slice %172 {offsets = [0, 32], sizes = [2, 32], strides = [1, 1]} : vector<2x96xf32> to vector<2x32xf32>
    %183 = arith.addf %181, %182 : vector<2x32xf32>
    %184 = arith.negf %183 : vector<2x32xf32>
    %185 = math.exp %184 : vector<2x32xf32>
    %cst_57 = arith.constant 1.000000e+00 : f32
    %186 = vector.broadcast %cst_57 : f32 to vector<2x32xf32>
    %187 = arith.addf %186, %185 : vector<2x32xf32>
    %188 = arith.divf %186, %187 : vector<2x32xf32>
    %189 = vector.extract_strided_slice %169 {offsets = [0, 64], sizes = [2, 32], strides = [1, 1]} : vector<2x96xf32> to vector<2x32xf32>
    %190 = vector.extract_strided_slice %172 {offsets = [0, 64], sizes = [2, 32], strides = [1, 1]} : vector<2x96xf32> to vector<2x32xf32>
    %191 = arith.mulf %180, %190 : vector<2x32xf32>
    %192 = arith.addf %189, %191 : vector<2x32xf32>
    %193 = math.tanh %192 : vector<2x32xf32>
    %cst_58 = arith.constant 1.000000e+00 : f32
    %194 = vector.broadcast %cst_58 : f32 to vector<2x32xf32>
    %195 = arith.subf %194, %188 : vector<2x32xf32>
    %196 = arith.mulf %195, %193 : vector<2x32xf32>
    %197 = arith.mulf %188, %166 : vector<2x32xf32>
    %198 = arith.addf %196, %197 : vector<2x32xf32>
    %199 = vector.extract_strided_slice %60 {offsets = [4, 0], sizes = [1, 96], strides = [1, 1]} : vector<28x96xf32> to vector<1x96xf32>
    %200 = vector.extract_strided_slice %60 {offsets = [18, 0], sizes = [1, 96], strides = [1, 1]} : vector<28x96xf32> to vector<1x96xf32>
    %201 = tpu.concatenate %199, %200 in 0 : vector<1x96xf32>, vector<1x96xf32> -> vector<2x96xf32>
    %cst_59 = arith.constant dense<0.000000e+00> : vector<2x96xf32>
    %202 = tpu.matmul %198, %66, %cst_59 {dimension_numbers = #tpu.dot_dimension_numbers<[1], [0], [0], [1], [0, 0, 1, 1], [], []>, precision = #tpu.contract_precision<fp32>} : vector<2x32xf32>, vector<32x96xf32>, vector<2x96xf32> -> vector<2x96xf32>
    %203 = vector.broadcast %67 : vector<1x96xf32> to vector<2x96xf32>
    %204 = arith.addf %202, %203 : vector<2x96xf32>
    %205 = vector.extract_strided_slice %201 {offsets = [0, 0], sizes = [2, 32], strides = [1, 1]} : vector<2x96xf32> to vector<2x32xf32>
    %206 = vector.extract_strided_slice %204 {offsets = [0, 0], sizes = [2, 32], strides = [1, 1]} : vector<2x96xf32> to vector<2x32xf32>
    %207 = arith.addf %205, %206 : vector<2x32xf32>
    %208 = arith.negf %207 : vector<2x32xf32>
    %209 = math.exp %208 : vector<2x32xf32>
    %cst_60 = arith.constant 1.000000e+00 : f32
    %210 = vector.broadcast %cst_60 : f32 to vector<2x32xf32>
    %211 = arith.addf %210, %209 : vector<2x32xf32>
    %212 = arith.divf %210, %211 : vector<2x32xf32>
    %213 = vector.extract_strided_slice %201 {offsets = [0, 32], sizes = [2, 32], strides = [1, 1]} : vector<2x96xf32> to vector<2x32xf32>
    %214 = vector.extract_strided_slice %204 {offsets = [0, 32], sizes = [2, 32], strides = [1, 1]} : vector<2x96xf32> to vector<2x32xf32>
    %215 = arith.addf %213, %214 : vector<2x32xf32>
    %216 = arith.negf %215 : vector<2x32xf32>
    %217 = math.exp %216 : vector<2x32xf32>
    %cst_61 = arith.constant 1.000000e+00 : f32
    %218 = vector.broadcast %cst_61 : f32 to vector<2x32xf32>
    %219 = arith.addf %218, %217 : vector<2x32xf32>
    %220 = arith.divf %218, %219 : vector<2x32xf32>
    %221 = vector.extract_strided_slice %201 {offsets = [0, 64], sizes = [2, 32], strides = [1, 1]} : vector<2x96xf32> to vector<2x32xf32>
    %222 = vector.extract_strided_slice %204 {offsets = [0, 64], sizes = [2, 32], strides = [1, 1]} : vector<2x96xf32> to vector<2x32xf32>
    %223 = arith.mulf %212, %222 : vector<2x32xf32>
    %224 = arith.addf %221, %223 : vector<2x32xf32>
    %225 = math.tanh %224 : vector<2x32xf32>
    %cst_62 = arith.constant 1.000000e+00 : f32
    %226 = vector.broadcast %cst_62 : f32 to vector<2x32xf32>
    %227 = arith.subf %226, %220 : vector<2x32xf32>
    %228 = arith.mulf %227, %225 : vector<2x32xf32>
    %229 = arith.mulf %220, %198 : vector<2x32xf32>
    %230 = arith.addf %228, %229 : vector<2x32xf32>
    %231 = vector.extract_strided_slice %60 {offsets = [5, 0], sizes = [1, 96], strides = [1, 1]} : vector<28x96xf32> to vector<1x96xf32>
    %232 = vector.extract_strided_slice %60 {offsets = [19, 0], sizes = [1, 96], strides = [1, 1]} : vector<28x96xf32> to vector<1x96xf32>
    %233 = tpu.concatenate %231, %232 in 0 : vector<1x96xf32>, vector<1x96xf32> -> vector<2x96xf32>
    %cst_63 = arith.constant dense<0.000000e+00> : vector<2x96xf32>
    %234 = tpu.matmul %230, %66, %cst_63 {dimension_numbers = #tpu.dot_dimension_numbers<[1], [0], [0], [1], [0, 0, 1, 1], [], []>, precision = #tpu.contract_precision<fp32>} : vector<2x32xf32>, vector<32x96xf32>, vector<2x96xf32> -> vector<2x96xf32>
    %235 = vector.broadcast %67 : vector<1x96xf32> to vector<2x96xf32>
    %236 = arith.addf %234, %235 : vector<2x96xf32>
    %237 = vector.extract_strided_slice %233 {offsets = [0, 0], sizes = [2, 32], strides = [1, 1]} : vector<2x96xf32> to vector<2x32xf32>
    %238 = vector.extract_strided_slice %236 {offsets = [0, 0], sizes = [2, 32], strides = [1, 1]} : vector<2x96xf32> to vector<2x32xf32>
    %239 = arith.addf %237, %238 : vector<2x32xf32>
    %240 = arith.negf %239 : vector<2x32xf32>
    %241 = math.exp %240 : vector<2x32xf32>
    %cst_64 = arith.constant 1.000000e+00 : f32
    %242 = vector.broadcast %cst_64 : f32 to vector<2x32xf32>
    %243 = arith.addf %242, %241 : vector<2x32xf32>
    %244 = arith.divf %242, %243 : vector<2x32xf32>
    %245 = vector.extract_strided_slice %233 {offsets = [0, 32], sizes = [2, 32], strides = [1, 1]} : vector<2x96xf32> to vector<2x32xf32>
    %246 = vector.extract_strided_slice %236 {offsets = [0, 32], sizes = [2, 32], strides = [1, 1]} : vector<2x96xf32> to vector<2x32xf32>
    %247 = arith.addf %245, %246 : vector<2x32xf32>
    %248 = arith.negf %247 : vector<2x32xf32>
    %249 = math.exp %248 : vector<2x32xf32>
    %cst_65 = arith.constant 1.000000e+00 : f32
    %250 = vector.broadcast %cst_65 : f32 to vector<2x32xf32>
    %251 = arith.addf %250, %249 : vector<2x32xf32>
    %252 = arith.divf %250, %251 : vector<2x32xf32>
    %253 = vector.extract_strided_slice %233 {offsets = [0, 64], sizes = [2, 32], strides = [1, 1]} : vector<2x96xf32> to vector<2x32xf32>
    %254 = vector.extract_strided_slice %236 {offsets = [0, 64], sizes = [2, 32], strides = [1, 1]} : vector<2x96xf32> to vector<2x32xf32>
    %255 = arith.mulf %244, %254 : vector<2x32xf32>
    %256 = arith.addf %253, %255 : vector<2x32xf32>
    %257 = math.tanh %256 : vector<2x32xf32>
    %cst_66 = arith.constant 1.000000e+00 : f32
    %258 = vector.broadcast %cst_66 : f32 to vector<2x32xf32>
    %259 = arith.subf %258, %252 : vector<2x32xf32>
    %260 = arith.mulf %259, %257 : vector<2x32xf32>
    %261 = arith.mulf %252, %230 : vector<2x32xf32>
    %262 = arith.addf %260, %261 : vector<2x32xf32>
    %263 = vector.extract_strided_slice %60 {offsets = [6, 0], sizes = [1, 96], strides = [1, 1]} : vector<28x96xf32> to vector<1x96xf32>
    %264 = vector.extract_strided_slice %60 {offsets = [20, 0], sizes = [1, 96], strides = [1, 1]} : vector<28x96xf32> to vector<1x96xf32>
    %265 = tpu.concatenate %263, %264 in 0 : vector<1x96xf32>, vector<1x96xf32> -> vector<2x96xf32>
    %cst_67 = arith.constant dense<0.000000e+00> : vector<2x96xf32>
    %266 = tpu.matmul %262, %66, %cst_67 {dimension_numbers = #tpu.dot_dimension_numbers<[1], [0], [0], [1], [0, 0, 1, 1], [], []>, precision = #tpu.contract_precision<fp32>} : vector<2x32xf32>, vector<32x96xf32>, vector<2x96xf32> -> vector<2x96xf32>
    %267 = vector.broadcast %67 : vector<1x96xf32> to vector<2x96xf32>
    %268 = arith.addf %266, %267 : vector<2x96xf32>
    %269 = vector.extract_strided_slice %265 {offsets = [0, 0], sizes = [2, 32], strides = [1, 1]} : vector<2x96xf32> to vector<2x32xf32>
    %270 = vector.extract_strided_slice %268 {offsets = [0, 0], sizes = [2, 32], strides = [1, 1]} : vector<2x96xf32> to vector<2x32xf32>
    %271 = arith.addf %269, %270 : vector<2x32xf32>
    %272 = arith.negf %271 : vector<2x32xf32>
    %273 = math.exp %272 : vector<2x32xf32>
    %cst_68 = arith.constant 1.000000e+00 : f32
    %274 = vector.broadcast %cst_68 : f32 to vector<2x32xf32>
    %275 = arith.addf %274, %273 : vector<2x32xf32>
    %276 = arith.divf %274, %275 : vector<2x32xf32>
    %277 = vector.extract_strided_slice %265 {offsets = [0, 32], sizes = [2, 32], strides = [1, 1]} : vector<2x96xf32> to vector<2x32xf32>
    %278 = vector.extract_strided_slice %268 {offsets = [0, 32], sizes = [2, 32], strides = [1, 1]} : vector<2x96xf32> to vector<2x32xf32>
    %279 = arith.addf %277, %278 : vector<2x32xf32>
    %280 = arith.negf %279 : vector<2x32xf32>
    %281 = math.exp %280 : vector<2x32xf32>
    %cst_69 = arith.constant 1.000000e+00 : f32
    %282 = vector.broadcast %cst_69 : f32 to vector<2x32xf32>
    %283 = arith.addf %282, %281 : vector<2x32xf32>
    %284 = arith.divf %282, %283 : vector<2x32xf32>
    %285 = vector.extract_strided_slice %265 {offsets = [0, 64], sizes = [2, 32], strides = [1, 1]} : vector<2x96xf32> to vector<2x32xf32>
    %286 = vector.extract_strided_slice %268 {offsets = [0, 64], sizes = [2, 32], strides = [1, 1]} : vector<2x96xf32> to vector<2x32xf32>
    %287 = arith.mulf %276, %286 : vector<2x32xf32>
    %288 = arith.addf %285, %287 : vector<2x32xf32>
    %289 = math.tanh %288 : vector<2x32xf32>
    %cst_70 = arith.constant 1.000000e+00 : f32
    %290 = vector.broadcast %cst_70 : f32 to vector<2x32xf32>
    %291 = arith.subf %290, %284 : vector<2x32xf32>
    %292 = arith.mulf %291, %289 : vector<2x32xf32>
    %293 = arith.mulf %284, %262 : vector<2x32xf32>
    %294 = arith.addf %292, %293 : vector<2x32xf32>
    %295 = vector.extract_strided_slice %60 {offsets = [7, 0], sizes = [1, 96], strides = [1, 1]} : vector<28x96xf32> to vector<1x96xf32>
    %296 = vector.extract_strided_slice %60 {offsets = [21, 0], sizes = [1, 96], strides = [1, 1]} : vector<28x96xf32> to vector<1x96xf32>
    %297 = tpu.concatenate %295, %296 in 0 : vector<1x96xf32>, vector<1x96xf32> -> vector<2x96xf32>
    %cst_71 = arith.constant dense<0.000000e+00> : vector<2x96xf32>
    %298 = tpu.matmul %294, %66, %cst_71 {dimension_numbers = #tpu.dot_dimension_numbers<[1], [0], [0], [1], [0, 0, 1, 1], [], []>, precision = #tpu.contract_precision<fp32>} : vector<2x32xf32>, vector<32x96xf32>, vector<2x96xf32> -> vector<2x96xf32>
    %299 = vector.broadcast %67 : vector<1x96xf32> to vector<2x96xf32>
    %300 = arith.addf %298, %299 : vector<2x96xf32>
    %301 = vector.extract_strided_slice %297 {offsets = [0, 0], sizes = [2, 32], strides = [1, 1]} : vector<2x96xf32> to vector<2x32xf32>
    %302 = vector.extract_strided_slice %300 {offsets = [0, 0], sizes = [2, 32], strides = [1, 1]} : vector<2x96xf32> to vector<2x32xf32>
    %303 = arith.addf %301, %302 : vector<2x32xf32>
    %304 = arith.negf %303 : vector<2x32xf32>
    %305 = math.exp %304 : vector<2x32xf32>
    %cst_72 = arith.constant 1.000000e+00 : f32
    %306 = vector.broadcast %cst_72 : f32 to vector<2x32xf32>
    %307 = arith.addf %306, %305 : vector<2x32xf32>
    %308 = arith.divf %306, %307 : vector<2x32xf32>
    %309 = vector.extract_strided_slice %297 {offsets = [0, 32], sizes = [2, 32], strides = [1, 1]} : vector<2x96xf32> to vector<2x32xf32>
    %310 = vector.extract_strided_slice %300 {offsets = [0, 32], sizes = [2, 32], strides = [1, 1]} : vector<2x96xf32> to vector<2x32xf32>
    %311 = arith.addf %309, %310 : vector<2x32xf32>
    %312 = arith.negf %311 : vector<2x32xf32>
    %313 = math.exp %312 : vector<2x32xf32>
    %cst_73 = arith.constant 1.000000e+00 : f32
    %314 = vector.broadcast %cst_73 : f32 to vector<2x32xf32>
    %315 = arith.addf %314, %313 : vector<2x32xf32>
    %316 = arith.divf %314, %315 : vector<2x32xf32>
    %317 = vector.extract_strided_slice %297 {offsets = [0, 64], sizes = [2, 32], strides = [1, 1]} : vector<2x96xf32> to vector<2x32xf32>
    %318 = vector.extract_strided_slice %300 {offsets = [0, 64], sizes = [2, 32], strides = [1, 1]} : vector<2x96xf32> to vector<2x32xf32>
    %319 = arith.mulf %308, %318 : vector<2x32xf32>
    %320 = arith.addf %317, %319 : vector<2x32xf32>
    %321 = math.tanh %320 : vector<2x32xf32>
    %cst_74 = arith.constant 1.000000e+00 : f32
    %322 = vector.broadcast %cst_74 : f32 to vector<2x32xf32>
    %323 = arith.subf %322, %316 : vector<2x32xf32>
    %324 = arith.mulf %323, %321 : vector<2x32xf32>
    %325 = arith.mulf %316, %294 : vector<2x32xf32>
    %326 = arith.addf %324, %325 : vector<2x32xf32>
    %327 = vector.extract_strided_slice %60 {offsets = [8, 0], sizes = [1, 96], strides = [1, 1]} : vector<28x96xf32> to vector<1x96xf32>
    %328 = vector.extract_strided_slice %60 {offsets = [22, 0], sizes = [1, 96], strides = [1, 1]} : vector<28x96xf32> to vector<1x96xf32>
    %329 = tpu.concatenate %327, %328 in 0 : vector<1x96xf32>, vector<1x96xf32> -> vector<2x96xf32>
    %cst_75 = arith.constant dense<0.000000e+00> : vector<2x96xf32>
    %330 = tpu.matmul %326, %66, %cst_75 {dimension_numbers = #tpu.dot_dimension_numbers<[1], [0], [0], [1], [0, 0, 1, 1], [], []>, precision = #tpu.contract_precision<fp32>} : vector<2x32xf32>, vector<32x96xf32>, vector<2x96xf32> -> vector<2x96xf32>
    %331 = vector.broadcast %67 : vector<1x96xf32> to vector<2x96xf32>
    %332 = arith.addf %330, %331 : vector<2x96xf32>
    %333 = vector.extract_strided_slice %329 {offsets = [0, 0], sizes = [2, 32], strides = [1, 1]} : vector<2x96xf32> to vector<2x32xf32>
    %334 = vector.extract_strided_slice %332 {offsets = [0, 0], sizes = [2, 32], strides = [1, 1]} : vector<2x96xf32> to vector<2x32xf32>
    %335 = arith.addf %333, %334 : vector<2x32xf32>
    %336 = arith.negf %335 : vector<2x32xf32>
    %337 = math.exp %336 : vector<2x32xf32>
    %cst_76 = arith.constant 1.000000e+00 : f32
    %338 = vector.broadcast %cst_76 : f32 to vector<2x32xf32>
    %339 = arith.addf %338, %337 : vector<2x32xf32>
    %340 = arith.divf %338, %339 : vector<2x32xf32>
    %341 = vector.extract_strided_slice %329 {offsets = [0, 32], sizes = [2, 32], strides = [1, 1]} : vector<2x96xf32> to vector<2x32xf32>
    %342 = vector.extract_strided_slice %332 {offsets = [0, 32], sizes = [2, 32], strides = [1, 1]} : vector<2x96xf32> to vector<2x32xf32>
    %343 = arith.addf %341, %342 : vector<2x32xf32>
    %344 = arith.negf %343 : vector<2x32xf32>
    %345 = math.exp %344 : vector<2x32xf32>
    %cst_77 = arith.constant 1.000000e+00 : f32
    %346 = vector.broadcast %cst_77 : f32 to vector<2x32xf32>
    %347 = arith.addf %346, %345 : vector<2x32xf32>
    %348 = arith.divf %346, %347 : vector<2x32xf32>
    %349 = vector.extract_strided_slice %329 {offsets = [0, 64], sizes = [2, 32], strides = [1, 1]} : vector<2x96xf32> to vector<2x32xf32>
    %350 = vector.extract_strided_slice %332 {offsets = [0, 64], sizes = [2, 32], strides = [1, 1]} : vector<2x96xf32> to vector<2x32xf32>
    %351 = arith.mulf %340, %350 : vector<2x32xf32>
    %352 = arith.addf %349, %351 : vector<2x32xf32>
    %353 = math.tanh %352 : vector<2x32xf32>
    %cst_78 = arith.constant 1.000000e+00 : f32
    %354 = vector.broadcast %cst_78 : f32 to vector<2x32xf32>
    %355 = arith.subf %354, %348 : vector<2x32xf32>
    %356 = arith.mulf %355, %353 : vector<2x32xf32>
    %357 = arith.mulf %348, %326 : vector<2x32xf32>
    %358 = arith.addf %356, %357 : vector<2x32xf32>
    %359 = vector.extract_strided_slice %60 {offsets = [9, 0], sizes = [1, 96], strides = [1, 1]} : vector<28x96xf32> to vector<1x96xf32>
    %360 = vector.extract_strided_slice %60 {offsets = [23, 0], sizes = [1, 96], strides = [1, 1]} : vector<28x96xf32> to vector<1x96xf32>
    %361 = tpu.concatenate %359, %360 in 0 : vector<1x96xf32>, vector<1x96xf32> -> vector<2x96xf32>
    %cst_79 = arith.constant dense<0.000000e+00> : vector<2x96xf32>
    %362 = tpu.matmul %358, %66, %cst_79 {dimension_numbers = #tpu.dot_dimension_numbers<[1], [0], [0], [1], [0, 0, 1, 1], [], []>, precision = #tpu.contract_precision<fp32>} : vector<2x32xf32>, vector<32x96xf32>, vector<2x96xf32> -> vector<2x96xf32>
    %363 = vector.broadcast %67 : vector<1x96xf32> to vector<2x96xf32>
    %364 = arith.addf %362, %363 : vector<2x96xf32>
    %365 = vector.extract_strided_slice %361 {offsets = [0, 0], sizes = [2, 32], strides = [1, 1]} : vector<2x96xf32> to vector<2x32xf32>
    %366 = vector.extract_strided_slice %364 {offsets = [0, 0], sizes = [2, 32], strides = [1, 1]} : vector<2x96xf32> to vector<2x32xf32>
    %367 = arith.addf %365, %366 : vector<2x32xf32>
    %368 = arith.negf %367 : vector<2x32xf32>
    %369 = math.exp %368 : vector<2x32xf32>
    %cst_80 = arith.constant 1.000000e+00 : f32
    %370 = vector.broadcast %cst_80 : f32 to vector<2x32xf32>
    %371 = arith.addf %370, %369 : vector<2x32xf32>
    %372 = arith.divf %370, %371 : vector<2x32xf32>
    %373 = vector.extract_strided_slice %361 {offsets = [0, 32], sizes = [2, 32], strides = [1, 1]} : vector<2x96xf32> to vector<2x32xf32>
    %374 = vector.extract_strided_slice %364 {offsets = [0, 32], sizes = [2, 32], strides = [1, 1]} : vector<2x96xf32> to vector<2x32xf32>
    %375 = arith.addf %373, %374 : vector<2x32xf32>
    %376 = arith.negf %375 : vector<2x32xf32>
    %377 = math.exp %376 : vector<2x32xf32>
    %cst_81 = arith.constant 1.000000e+00 : f32
    %378 = vector.broadcast %cst_81 : f32 to vector<2x32xf32>
    %379 = arith.addf %378, %377 : vector<2x32xf32>
    %380 = arith.divf %378, %379 : vector<2x32xf32>
    %381 = vector.extract_strided_slice %361 {offsets = [0, 64], sizes = [2, 32], strides = [1, 1]} : vector<2x96xf32> to vector<2x32xf32>
    %382 = vector.extract_strided_slice %364 {offsets = [0, 64], sizes = [2, 32], strides = [1, 1]} : vector<2x96xf32> to vector<2x32xf32>
    %383 = arith.mulf %372, %382 : vector<2x32xf32>
    %384 = arith.addf %381, %383 : vector<2x32xf32>
    %385 = math.tanh %384 : vector<2x32xf32>
    %cst_82 = arith.constant 1.000000e+00 : f32
    %386 = vector.broadcast %cst_82 : f32 to vector<2x32xf32>
    %387 = arith.subf %386, %380 : vector<2x32xf32>
    %388 = arith.mulf %387, %385 : vector<2x32xf32>
    %389 = arith.mulf %380, %358 : vector<2x32xf32>
    %390 = arith.addf %388, %389 : vector<2x32xf32>
    %391 = vector.extract_strided_slice %60 {offsets = [10, 0], sizes = [1, 96], strides = [1, 1]} : vector<28x96xf32> to vector<1x96xf32>
    %392 = vector.extract_strided_slice %60 {offsets = [24, 0], sizes = [1, 96], strides = [1, 1]} : vector<28x96xf32> to vector<1x96xf32>
    %393 = tpu.concatenate %391, %392 in 0 : vector<1x96xf32>, vector<1x96xf32> -> vector<2x96xf32>
    %cst_83 = arith.constant dense<0.000000e+00> : vector<2x96xf32>
    %394 = tpu.matmul %390, %66, %cst_83 {dimension_numbers = #tpu.dot_dimension_numbers<[1], [0], [0], [1], [0, 0, 1, 1], [], []>, precision = #tpu.contract_precision<fp32>} : vector<2x32xf32>, vector<32x96xf32>, vector<2x96xf32> -> vector<2x96xf32>
    %395 = vector.broadcast %67 : vector<1x96xf32> to vector<2x96xf32>
    %396 = arith.addf %394, %395 : vector<2x96xf32>
    %397 = vector.extract_strided_slice %393 {offsets = [0, 0], sizes = [2, 32], strides = [1, 1]} : vector<2x96xf32> to vector<2x32xf32>
    %398 = vector.extract_strided_slice %396 {offsets = [0, 0], sizes = [2, 32], strides = [1, 1]} : vector<2x96xf32> to vector<2x32xf32>
    %399 = arith.addf %397, %398 : vector<2x32xf32>
    %400 = arith.negf %399 : vector<2x32xf32>
    %401 = math.exp %400 : vector<2x32xf32>
    %cst_84 = arith.constant 1.000000e+00 : f32
    %402 = vector.broadcast %cst_84 : f32 to vector<2x32xf32>
    %403 = arith.addf %402, %401 : vector<2x32xf32>
    %404 = arith.divf %402, %403 : vector<2x32xf32>
    %405 = vector.extract_strided_slice %393 {offsets = [0, 32], sizes = [2, 32], strides = [1, 1]} : vector<2x96xf32> to vector<2x32xf32>
    %406 = vector.extract_strided_slice %396 {offsets = [0, 32], sizes = [2, 32], strides = [1, 1]} : vector<2x96xf32> to vector<2x32xf32>
    %407 = arith.addf %405, %406 : vector<2x32xf32>
    %408 = arith.negf %407 : vector<2x32xf32>
    %409 = math.exp %408 : vector<2x32xf32>
    %cst_85 = arith.constant 1.000000e+00 : f32
    %410 = vector.broadcast %cst_85 : f32 to vector<2x32xf32>
    %411 = arith.addf %410, %409 : vector<2x32xf32>
    %412 = arith.divf %410, %411 : vector<2x32xf32>
    %413 = vector.extract_strided_slice %393 {offsets = [0, 64], sizes = [2, 32], strides = [1, 1]} : vector<2x96xf32> to vector<2x32xf32>
    %414 = vector.extract_strided_slice %396 {offsets = [0, 64], sizes = [2, 32], strides = [1, 1]} : vector<2x96xf32> to vector<2x32xf32>
    %415 = arith.mulf %404, %414 : vector<2x32xf32>
    %416 = arith.addf %413, %415 : vector<2x32xf32>
    %417 = math.tanh %416 : vector<2x32xf32>
    %cst_86 = arith.constant 1.000000e+00 : f32
    %418 = vector.broadcast %cst_86 : f32 to vector<2x32xf32>
    %419 = arith.subf %418, %412 : vector<2x32xf32>
    %420 = arith.mulf %419, %417 : vector<2x32xf32>
    %421 = arith.mulf %412, %390 : vector<2x32xf32>
    %422 = arith.addf %420, %421 : vector<2x32xf32>
    %423 = vector.extract_strided_slice %60 {offsets = [11, 0], sizes = [1, 96], strides = [1, 1]} : vector<28x96xf32> to vector<1x96xf32>
    %424 = vector.extract_strided_slice %60 {offsets = [25, 0], sizes = [1, 96], strides = [1, 1]} : vector<28x96xf32> to vector<1x96xf32>
    %425 = tpu.concatenate %423, %424 in 0 : vector<1x96xf32>, vector<1x96xf32> -> vector<2x96xf32>
    %cst_87 = arith.constant dense<0.000000e+00> : vector<2x96xf32>
    %426 = tpu.matmul %422, %66, %cst_87 {dimension_numbers = #tpu.dot_dimension_numbers<[1], [0], [0], [1], [0, 0, 1, 1], [], []>, precision = #tpu.contract_precision<fp32>} : vector<2x32xf32>, vector<32x96xf32>, vector<2x96xf32> -> vector<2x96xf32>
    %427 = vector.broadcast %67 : vector<1x96xf32> to vector<2x96xf32>
    %428 = arith.addf %426, %427 : vector<2x96xf32>
    %429 = vector.extract_strided_slice %425 {offsets = [0, 0], sizes = [2, 32], strides = [1, 1]} : vector<2x96xf32> to vector<2x32xf32>
    %430 = vector.extract_strided_slice %428 {offsets = [0, 0], sizes = [2, 32], strides = [1, 1]} : vector<2x96xf32> to vector<2x32xf32>
    %431 = arith.addf %429, %430 : vector<2x32xf32>
    %432 = arith.negf %431 : vector<2x32xf32>
    %433 = math.exp %432 : vector<2x32xf32>
    %cst_88 = arith.constant 1.000000e+00 : f32
    %434 = vector.broadcast %cst_88 : f32 to vector<2x32xf32>
    %435 = arith.addf %434, %433 : vector<2x32xf32>
    %436 = arith.divf %434, %435 : vector<2x32xf32>
    %437 = vector.extract_strided_slice %425 {offsets = [0, 32], sizes = [2, 32], strides = [1, 1]} : vector<2x96xf32> to vector<2x32xf32>
    %438 = vector.extract_strided_slice %428 {offsets = [0, 32], sizes = [2, 32], strides = [1, 1]} : vector<2x96xf32> to vector<2x32xf32>
    %439 = arith.addf %437, %438 : vector<2x32xf32>
    %440 = arith.negf %439 : vector<2x32xf32>
    %441 = math.exp %440 : vector<2x32xf32>
    %cst_89 = arith.constant 1.000000e+00 : f32
    %442 = vector.broadcast %cst_89 : f32 to vector<2x32xf32>
    %443 = arith.addf %442, %441 : vector<2x32xf32>
    %444 = arith.divf %442, %443 : vector<2x32xf32>
    %445 = vector.extract_strided_slice %425 {offsets = [0, 64], sizes = [2, 32], strides = [1, 1]} : vector<2x96xf32> to vector<2x32xf32>
    %446 = vector.extract_strided_slice %428 {offsets = [0, 64], sizes = [2, 32], strides = [1, 1]} : vector<2x96xf32> to vector<2x32xf32>
    %447 = arith.mulf %436, %446 : vector<2x32xf32>
    %448 = arith.addf %445, %447 : vector<2x32xf32>
    %449 = math.tanh %448 : vector<2x32xf32>
    %cst_90 = arith.constant 1.000000e+00 : f32
    %450 = vector.broadcast %cst_90 : f32 to vector<2x32xf32>
    %451 = arith.subf %450, %444 : vector<2x32xf32>
    %452 = arith.mulf %451, %449 : vector<2x32xf32>
    %453 = arith.mulf %444, %422 : vector<2x32xf32>
    %454 = arith.addf %452, %453 : vector<2x32xf32>
    %455 = vector.extract_strided_slice %60 {offsets = [12, 0], sizes = [1, 96], strides = [1, 1]} : vector<28x96xf32> to vector<1x96xf32>
    %456 = vector.extract_strided_slice %60 {offsets = [26, 0], sizes = [1, 96], strides = [1, 1]} : vector<28x96xf32> to vector<1x96xf32>
    %457 = tpu.concatenate %455, %456 in 0 : vector<1x96xf32>, vector<1x96xf32> -> vector<2x96xf32>
    %cst_91 = arith.constant dense<0.000000e+00> : vector<2x96xf32>
    %458 = tpu.matmul %454, %66, %cst_91 {dimension_numbers = #tpu.dot_dimension_numbers<[1], [0], [0], [1], [0, 0, 1, 1], [], []>, precision = #tpu.contract_precision<fp32>} : vector<2x32xf32>, vector<32x96xf32>, vector<2x96xf32> -> vector<2x96xf32>
    %459 = vector.broadcast %67 : vector<1x96xf32> to vector<2x96xf32>
    %460 = arith.addf %458, %459 : vector<2x96xf32>
    %461 = vector.extract_strided_slice %457 {offsets = [0, 0], sizes = [2, 32], strides = [1, 1]} : vector<2x96xf32> to vector<2x32xf32>
    %462 = vector.extract_strided_slice %460 {offsets = [0, 0], sizes = [2, 32], strides = [1, 1]} : vector<2x96xf32> to vector<2x32xf32>
    %463 = arith.addf %461, %462 : vector<2x32xf32>
    %464 = arith.negf %463 : vector<2x32xf32>
    %465 = math.exp %464 : vector<2x32xf32>
    %cst_92 = arith.constant 1.000000e+00 : f32
    %466 = vector.broadcast %cst_92 : f32 to vector<2x32xf32>
    %467 = arith.addf %466, %465 : vector<2x32xf32>
    %468 = arith.divf %466, %467 : vector<2x32xf32>
    %469 = vector.extract_strided_slice %457 {offsets = [0, 32], sizes = [2, 32], strides = [1, 1]} : vector<2x96xf32> to vector<2x32xf32>
    %470 = vector.extract_strided_slice %460 {offsets = [0, 32], sizes = [2, 32], strides = [1, 1]} : vector<2x96xf32> to vector<2x32xf32>
    %471 = arith.addf %469, %470 : vector<2x32xf32>
    %472 = arith.negf %471 : vector<2x32xf32>
    %473 = math.exp %472 : vector<2x32xf32>
    %cst_93 = arith.constant 1.000000e+00 : f32
    %474 = vector.broadcast %cst_93 : f32 to vector<2x32xf32>
    %475 = arith.addf %474, %473 : vector<2x32xf32>
    %476 = arith.divf %474, %475 : vector<2x32xf32>
    %477 = vector.extract_strided_slice %457 {offsets = [0, 64], sizes = [2, 32], strides = [1, 1]} : vector<2x96xf32> to vector<2x32xf32>
    %478 = vector.extract_strided_slice %460 {offsets = [0, 64], sizes = [2, 32], strides = [1, 1]} : vector<2x96xf32> to vector<2x32xf32>
    %479 = arith.mulf %468, %478 : vector<2x32xf32>
    %480 = arith.addf %477, %479 : vector<2x32xf32>
    %481 = math.tanh %480 : vector<2x32xf32>
    %cst_94 = arith.constant 1.000000e+00 : f32
    %482 = vector.broadcast %cst_94 : f32 to vector<2x32xf32>
    %483 = arith.subf %482, %476 : vector<2x32xf32>
    %484 = arith.mulf %483, %481 : vector<2x32xf32>
    %485 = arith.mulf %476, %454 : vector<2x32xf32>
    %486 = arith.addf %484, %485 : vector<2x32xf32>
    %487 = vector.extract_strided_slice %60 {offsets = [13, 0], sizes = [1, 96], strides = [1, 1]} : vector<28x96xf32> to vector<1x96xf32>
    %488 = vector.extract_strided_slice %60 {offsets = [27, 0], sizes = [1, 96], strides = [1, 1]} : vector<28x96xf32> to vector<1x96xf32>
    %489 = tpu.concatenate %487, %488 in 0 : vector<1x96xf32>, vector<1x96xf32> -> vector<2x96xf32>
    %cst_95 = arith.constant dense<0.000000e+00> : vector<2x96xf32>
    %490 = tpu.matmul %486, %66, %cst_95 {dimension_numbers = #tpu.dot_dimension_numbers<[1], [0], [0], [1], [0, 0, 1, 1], [], []>, precision = #tpu.contract_precision<fp32>} : vector<2x32xf32>, vector<32x96xf32>, vector<2x96xf32> -> vector<2x96xf32>
    %491 = vector.broadcast %67 : vector<1x96xf32> to vector<2x96xf32>
    %492 = arith.addf %490, %491 : vector<2x96xf32>
    %493 = vector.extract_strided_slice %489 {offsets = [0, 0], sizes = [2, 32], strides = [1, 1]} : vector<2x96xf32> to vector<2x32xf32>
    %494 = vector.extract_strided_slice %492 {offsets = [0, 0], sizes = [2, 32], strides = [1, 1]} : vector<2x96xf32> to vector<2x32xf32>
    %495 = arith.addf %493, %494 : vector<2x32xf32>
    %496 = arith.negf %495 : vector<2x32xf32>
    %497 = math.exp %496 : vector<2x32xf32>
    %cst_96 = arith.constant 1.000000e+00 : f32
    %498 = vector.broadcast %cst_96 : f32 to vector<2x32xf32>
    %499 = arith.addf %498, %497 : vector<2x32xf32>
    %500 = arith.divf %498, %499 : vector<2x32xf32>
    %501 = vector.extract_strided_slice %489 {offsets = [0, 32], sizes = [2, 32], strides = [1, 1]} : vector<2x96xf32> to vector<2x32xf32>
    %502 = vector.extract_strided_slice %492 {offsets = [0, 32], sizes = [2, 32], strides = [1, 1]} : vector<2x96xf32> to vector<2x32xf32>
    %503 = arith.addf %501, %502 : vector<2x32xf32>
    %504 = arith.negf %503 : vector<2x32xf32>
    %505 = math.exp %504 : vector<2x32xf32>
    %cst_97 = arith.constant 1.000000e+00 : f32
    %506 = vector.broadcast %cst_97 : f32 to vector<2x32xf32>
    %507 = arith.addf %506, %505 : vector<2x32xf32>
    %508 = arith.divf %506, %507 : vector<2x32xf32>
    %509 = vector.extract_strided_slice %489 {offsets = [0, 64], sizes = [2, 32], strides = [1, 1]} : vector<2x96xf32> to vector<2x32xf32>
    %510 = vector.extract_strided_slice %492 {offsets = [0, 64], sizes = [2, 32], strides = [1, 1]} : vector<2x96xf32> to vector<2x32xf32>
    %511 = arith.mulf %500, %510 : vector<2x32xf32>
    %512 = arith.addf %509, %511 : vector<2x32xf32>
    %513 = math.tanh %512 : vector<2x32xf32>
    %cst_98 = arith.constant 1.000000e+00 : f32
    %514 = vector.broadcast %cst_98 : f32 to vector<2x32xf32>
    %515 = arith.subf %514, %508 : vector<2x32xf32>
    %516 = arith.mulf %515, %513 : vector<2x32xf32>
    %517 = arith.mulf %508, %486 : vector<2x32xf32>
    %518 = arith.addf %516, %517 : vector<2x32xf32>
    %cst_99 = arith.constant 0.000000e+00 : f32
    %519 = vector.broadcast %cst_99 : f32 to vector<4x16xf32>
    %520 = vector.extract_strided_slice %65 {offsets = [2, 0], sizes = [1, 48], strides = [1, 1]} : vector<28x48xf32> to vector<1x48xf32>
    %521 = vector.extract_strided_slice %65 {offsets = [16, 0], sizes = [1, 48], strides = [1, 1]} : vector<28x48xf32> to vector<1x48xf32>
    %522 = vector.extract_strided_slice %65 {offsets = [3, 0], sizes = [1, 48], strides = [1, 1]} : vector<28x48xf32> to vector<1x48xf32>
    %523 = vector.extract_strided_slice %65 {offsets = [17, 0], sizes = [1, 48], strides = [1, 1]} : vector<28x48xf32> to vector<1x48xf32>
    %524 = tpu.concatenate %520, %521, %522, %523 in 0 : vector<1x48xf32>, vector<1x48xf32>, vector<1x48xf32>, vector<1x48xf32> -> vector<4x48xf32>
    %cst_100 = arith.constant dense<0.000000e+00> : vector<4x48xf32>
    %525 = tpu.matmul %519, %68, %cst_100 {dimension_numbers = #tpu.dot_dimension_numbers<[1], [0], [0], [1], [0, 0, 1, 1], [], []>, precision = #tpu.contract_precision<fp32>} : vector<4x16xf32>, vector<16x48xf32>, vector<4x48xf32> -> vector<4x48xf32>
    %526 = vector.broadcast %69 : vector<1x48xf32> to vector<4x48xf32>
    %527 = arith.addf %525, %526 : vector<4x48xf32>
    %528 = vector.extract_strided_slice %524 {offsets = [0, 0], sizes = [4, 16], strides = [1, 1]} : vector<4x48xf32> to vector<4x16xf32>
    %529 = vector.extract_strided_slice %527 {offsets = [0, 0], sizes = [4, 16], strides = [1, 1]} : vector<4x48xf32> to vector<4x16xf32>
    %530 = arith.addf %528, %529 : vector<4x16xf32>
    %531 = arith.negf %530 : vector<4x16xf32>
    %532 = math.exp %531 : vector<4x16xf32>
    %cst_101 = arith.constant 1.000000e+00 : f32
    %533 = vector.broadcast %cst_101 : f32 to vector<4x16xf32>
    %534 = arith.addf %533, %532 : vector<4x16xf32>
    %535 = arith.divf %533, %534 : vector<4x16xf32>
    %536 = vector.extract_strided_slice %524 {offsets = [0, 16], sizes = [4, 16], strides = [1, 1]} : vector<4x48xf32> to vector<4x16xf32>
    %537 = vector.extract_strided_slice %527 {offsets = [0, 16], sizes = [4, 16], strides = [1, 1]} : vector<4x48xf32> to vector<4x16xf32>
    %538 = arith.addf %536, %537 : vector<4x16xf32>
    %539 = arith.negf %538 : vector<4x16xf32>
    %540 = math.exp %539 : vector<4x16xf32>
    %cst_102 = arith.constant 1.000000e+00 : f32
    %541 = vector.broadcast %cst_102 : f32 to vector<4x16xf32>
    %542 = arith.addf %541, %540 : vector<4x16xf32>
    %543 = arith.divf %541, %542 : vector<4x16xf32>
    %544 = vector.extract_strided_slice %524 {offsets = [0, 32], sizes = [4, 16], strides = [1, 1]} : vector<4x48xf32> to vector<4x16xf32>
    %545 = vector.extract_strided_slice %527 {offsets = [0, 32], sizes = [4, 16], strides = [1, 1]} : vector<4x48xf32> to vector<4x16xf32>
    %546 = arith.mulf %535, %545 : vector<4x16xf32>
    %547 = arith.addf %544, %546 : vector<4x16xf32>
    %548 = math.tanh %547 : vector<4x16xf32>
    %cst_103 = arith.constant 1.000000e+00 : f32
    %549 = vector.broadcast %cst_103 : f32 to vector<4x16xf32>
    %550 = arith.subf %549, %543 : vector<4x16xf32>
    %551 = arith.mulf %550, %548 : vector<4x16xf32>
    %552 = arith.mulf %543, %519 : vector<4x16xf32>
    %553 = arith.addf %551, %552 : vector<4x16xf32>
    %554 = vector.extract_strided_slice %65 {offsets = [4, 0], sizes = [1, 48], strides = [1, 1]} : vector<28x48xf32> to vector<1x48xf32>
    %555 = vector.extract_strided_slice %65 {offsets = [18, 0], sizes = [1, 48], strides = [1, 1]} : vector<28x48xf32> to vector<1x48xf32>
    %556 = vector.extract_strided_slice %65 {offsets = [5, 0], sizes = [1, 48], strides = [1, 1]} : vector<28x48xf32> to vector<1x48xf32>
    %557 = vector.extract_strided_slice %65 {offsets = [19, 0], sizes = [1, 48], strides = [1, 1]} : vector<28x48xf32> to vector<1x48xf32>
    %558 = tpu.concatenate %554, %555, %556, %557 in 0 : vector<1x48xf32>, vector<1x48xf32>, vector<1x48xf32>, vector<1x48xf32> -> vector<4x48xf32>
    %cst_104 = arith.constant dense<0.000000e+00> : vector<4x48xf32>
    %559 = tpu.matmul %553, %68, %cst_104 {dimension_numbers = #tpu.dot_dimension_numbers<[1], [0], [0], [1], [0, 0, 1, 1], [], []>, precision = #tpu.contract_precision<fp32>} : vector<4x16xf32>, vector<16x48xf32>, vector<4x48xf32> -> vector<4x48xf32>
    %560 = vector.broadcast %69 : vector<1x48xf32> to vector<4x48xf32>
    %561 = arith.addf %559, %560 : vector<4x48xf32>
    %562 = vector.extract_strided_slice %558 {offsets = [0, 0], sizes = [4, 16], strides = [1, 1]} : vector<4x48xf32> to vector<4x16xf32>
    %563 = vector.extract_strided_slice %561 {offsets = [0, 0], sizes = [4, 16], strides = [1, 1]} : vector<4x48xf32> to vector<4x16xf32>
    %564 = arith.addf %562, %563 : vector<4x16xf32>
    %565 = arith.negf %564 : vector<4x16xf32>
    %566 = math.exp %565 : vector<4x16xf32>
    %cst_105 = arith.constant 1.000000e+00 : f32
    %567 = vector.broadcast %cst_105 : f32 to vector<4x16xf32>
    %568 = arith.addf %567, %566 : vector<4x16xf32>
    %569 = arith.divf %567, %568 : vector<4x16xf32>
    %570 = vector.extract_strided_slice %558 {offsets = [0, 16], sizes = [4, 16], strides = [1, 1]} : vector<4x48xf32> to vector<4x16xf32>
    %571 = vector.extract_strided_slice %561 {offsets = [0, 16], sizes = [4, 16], strides = [1, 1]} : vector<4x48xf32> to vector<4x16xf32>
    %572 = arith.addf %570, %571 : vector<4x16xf32>
    %573 = arith.negf %572 : vector<4x16xf32>
    %574 = math.exp %573 : vector<4x16xf32>
    %cst_106 = arith.constant 1.000000e+00 : f32
    %575 = vector.broadcast %cst_106 : f32 to vector<4x16xf32>
    %576 = arith.addf %575, %574 : vector<4x16xf32>
    %577 = arith.divf %575, %576 : vector<4x16xf32>
    %578 = vector.extract_strided_slice %558 {offsets = [0, 32], sizes = [4, 16], strides = [1, 1]} : vector<4x48xf32> to vector<4x16xf32>
    %579 = vector.extract_strided_slice %561 {offsets = [0, 32], sizes = [4, 16], strides = [1, 1]} : vector<4x48xf32> to vector<4x16xf32>
    %580 = arith.mulf %569, %579 : vector<4x16xf32>
    %581 = arith.addf %578, %580 : vector<4x16xf32>
    %582 = math.tanh %581 : vector<4x16xf32>
    %cst_107 = arith.constant 1.000000e+00 : f32
    %583 = vector.broadcast %cst_107 : f32 to vector<4x16xf32>
    %584 = arith.subf %583, %577 : vector<4x16xf32>
    %585 = arith.mulf %584, %582 : vector<4x16xf32>
    %586 = arith.mulf %577, %553 : vector<4x16xf32>
    %587 = arith.addf %585, %586 : vector<4x16xf32>
    %588 = vector.extract_strided_slice %65 {offsets = [6, 0], sizes = [1, 48], strides = [1, 1]} : vector<28x48xf32> to vector<1x48xf32>
    %589 = vector.extract_strided_slice %65 {offsets = [20, 0], sizes = [1, 48], strides = [1, 1]} : vector<28x48xf32> to vector<1x48xf32>
    %590 = vector.extract_strided_slice %65 {offsets = [7, 0], sizes = [1, 48], strides = [1, 1]} : vector<28x48xf32> to vector<1x48xf32>
    %591 = vector.extract_strided_slice %65 {offsets = [21, 0], sizes = [1, 48], strides = [1, 1]} : vector<28x48xf32> to vector<1x48xf32>
    %592 = tpu.concatenate %588, %589, %590, %591 in 0 : vector<1x48xf32>, vector<1x48xf32>, vector<1x48xf32>, vector<1x48xf32> -> vector<4x48xf32>
    %cst_108 = arith.constant dense<0.000000e+00> : vector<4x48xf32>
    %593 = tpu.matmul %587, %68, %cst_108 {dimension_numbers = #tpu.dot_dimension_numbers<[1], [0], [0], [1], [0, 0, 1, 1], [], []>, precision = #tpu.contract_precision<fp32>} : vector<4x16xf32>, vector<16x48xf32>, vector<4x48xf32> -> vector<4x48xf32>
    %594 = vector.broadcast %69 : vector<1x48xf32> to vector<4x48xf32>
    %595 = arith.addf %593, %594 : vector<4x48xf32>
    %596 = vector.extract_strided_slice %592 {offsets = [0, 0], sizes = [4, 16], strides = [1, 1]} : vector<4x48xf32> to vector<4x16xf32>
    %597 = vector.extract_strided_slice %595 {offsets = [0, 0], sizes = [4, 16], strides = [1, 1]} : vector<4x48xf32> to vector<4x16xf32>
    %598 = arith.addf %596, %597 : vector<4x16xf32>
    %599 = arith.negf %598 : vector<4x16xf32>
    %600 = math.exp %599 : vector<4x16xf32>
    %cst_109 = arith.constant 1.000000e+00 : f32
    %601 = vector.broadcast %cst_109 : f32 to vector<4x16xf32>
    %602 = arith.addf %601, %600 : vector<4x16xf32>
    %603 = arith.divf %601, %602 : vector<4x16xf32>
    %604 = vector.extract_strided_slice %592 {offsets = [0, 16], sizes = [4, 16], strides = [1, 1]} : vector<4x48xf32> to vector<4x16xf32>
    %605 = vector.extract_strided_slice %595 {offsets = [0, 16], sizes = [4, 16], strides = [1, 1]} : vector<4x48xf32> to vector<4x16xf32>
    %606 = arith.addf %604, %605 : vector<4x16xf32>
    %607 = arith.negf %606 : vector<4x16xf32>
    %608 = math.exp %607 : vector<4x16xf32>
    %cst_110 = arith.constant 1.000000e+00 : f32
    %609 = vector.broadcast %cst_110 : f32 to vector<4x16xf32>
    %610 = arith.addf %609, %608 : vector<4x16xf32>
    %611 = arith.divf %609, %610 : vector<4x16xf32>
    %612 = vector.extract_strided_slice %592 {offsets = [0, 32], sizes = [4, 16], strides = [1, 1]} : vector<4x48xf32> to vector<4x16xf32>
    %613 = vector.extract_strided_slice %595 {offsets = [0, 32], sizes = [4, 16], strides = [1, 1]} : vector<4x48xf32> to vector<4x16xf32>
    %614 = arith.mulf %603, %613 : vector<4x16xf32>
    %615 = arith.addf %612, %614 : vector<4x16xf32>
    %616 = math.tanh %615 : vector<4x16xf32>
    %cst_111 = arith.constant 1.000000e+00 : f32
    %617 = vector.broadcast %cst_111 : f32 to vector<4x16xf32>
    %618 = arith.subf %617, %611 : vector<4x16xf32>
    %619 = arith.mulf %618, %616 : vector<4x16xf32>
    %620 = arith.mulf %611, %587 : vector<4x16xf32>
    %621 = arith.addf %619, %620 : vector<4x16xf32>
    %622 = vector.extract_strided_slice %65 {offsets = [8, 0], sizes = [1, 48], strides = [1, 1]} : vector<28x48xf32> to vector<1x48xf32>
    %623 = vector.extract_strided_slice %65 {offsets = [22, 0], sizes = [1, 48], strides = [1, 1]} : vector<28x48xf32> to vector<1x48xf32>
    %624 = vector.extract_strided_slice %65 {offsets = [9, 0], sizes = [1, 48], strides = [1, 1]} : vector<28x48xf32> to vector<1x48xf32>
    %625 = vector.extract_strided_slice %65 {offsets = [23, 0], sizes = [1, 48], strides = [1, 1]} : vector<28x48xf32> to vector<1x48xf32>
    %626 = tpu.concatenate %622, %623, %624, %625 in 0 : vector<1x48xf32>, vector<1x48xf32>, vector<1x48xf32>, vector<1x48xf32> -> vector<4x48xf32>
    %cst_112 = arith.constant dense<0.000000e+00> : vector<4x48xf32>
    %627 = tpu.matmul %621, %68, %cst_112 {dimension_numbers = #tpu.dot_dimension_numbers<[1], [0], [0], [1], [0, 0, 1, 1], [], []>, precision = #tpu.contract_precision<fp32>} : vector<4x16xf32>, vector<16x48xf32>, vector<4x48xf32> -> vector<4x48xf32>
    %628 = vector.broadcast %69 : vector<1x48xf32> to vector<4x48xf32>
    %629 = arith.addf %627, %628 : vector<4x48xf32>
    %630 = vector.extract_strided_slice %626 {offsets = [0, 0], sizes = [4, 16], strides = [1, 1]} : vector<4x48xf32> to vector<4x16xf32>
    %631 = vector.extract_strided_slice %629 {offsets = [0, 0], sizes = [4, 16], strides = [1, 1]} : vector<4x48xf32> to vector<4x16xf32>
    %632 = arith.addf %630, %631 : vector<4x16xf32>
    %633 = arith.negf %632 : vector<4x16xf32>
    %634 = math.exp %633 : vector<4x16xf32>
    %cst_113 = arith.constant 1.000000e+00 : f32
    %635 = vector.broadcast %cst_113 : f32 to vector<4x16xf32>
    %636 = arith.addf %635, %634 : vector<4x16xf32>
    %637 = arith.divf %635, %636 : vector<4x16xf32>
    %638 = vector.extract_strided_slice %626 {offsets = [0, 16], sizes = [4, 16], strides = [1, 1]} : vector<4x48xf32> to vector<4x16xf32>
    %639 = vector.extract_strided_slice %629 {offsets = [0, 16], sizes = [4, 16], strides = [1, 1]} : vector<4x48xf32> to vector<4x16xf32>
    %640 = arith.addf %638, %639 : vector<4x16xf32>
    %641 = arith.negf %640 : vector<4x16xf32>
    %642 = math.exp %641 : vector<4x16xf32>
    %cst_114 = arith.constant 1.000000e+00 : f32
    %643 = vector.broadcast %cst_114 : f32 to vector<4x16xf32>
    %644 = arith.addf %643, %642 : vector<4x16xf32>
    %645 = arith.divf %643, %644 : vector<4x16xf32>
    %646 = vector.extract_strided_slice %626 {offsets = [0, 32], sizes = [4, 16], strides = [1, 1]} : vector<4x48xf32> to vector<4x16xf32>
    %647 = vector.extract_strided_slice %629 {offsets = [0, 32], sizes = [4, 16], strides = [1, 1]} : vector<4x48xf32> to vector<4x16xf32>
    %648 = arith.mulf %637, %647 : vector<4x16xf32>
    %649 = arith.addf %646, %648 : vector<4x16xf32>
    %650 = math.tanh %649 : vector<4x16xf32>
    %cst_115 = arith.constant 1.000000e+00 : f32
    %651 = vector.broadcast %cst_115 : f32 to vector<4x16xf32>
    %652 = arith.subf %651, %645 : vector<4x16xf32>
    %653 = arith.mulf %652, %650 : vector<4x16xf32>
    %654 = arith.mulf %645, %621 : vector<4x16xf32>
    %655 = arith.addf %653, %654 : vector<4x16xf32>
    %656 = vector.extract_strided_slice %65 {offsets = [10, 0], sizes = [1, 48], strides = [1, 1]} : vector<28x48xf32> to vector<1x48xf32>
    %657 = vector.extract_strided_slice %65 {offsets = [24, 0], sizes = [1, 48], strides = [1, 1]} : vector<28x48xf32> to vector<1x48xf32>
    %658 = vector.extract_strided_slice %65 {offsets = [11, 0], sizes = [1, 48], strides = [1, 1]} : vector<28x48xf32> to vector<1x48xf32>
    %659 = vector.extract_strided_slice %65 {offsets = [25, 0], sizes = [1, 48], strides = [1, 1]} : vector<28x48xf32> to vector<1x48xf32>
    %660 = tpu.concatenate %656, %657, %658, %659 in 0 : vector<1x48xf32>, vector<1x48xf32>, vector<1x48xf32>, vector<1x48xf32> -> vector<4x48xf32>
    %cst_116 = arith.constant dense<0.000000e+00> : vector<4x48xf32>
    %661 = tpu.matmul %655, %68, %cst_116 {dimension_numbers = #tpu.dot_dimension_numbers<[1], [0], [0], [1], [0, 0, 1, 1], [], []>, precision = #tpu.contract_precision<fp32>} : vector<4x16xf32>, vector<16x48xf32>, vector<4x48xf32> -> vector<4x48xf32>
    %662 = vector.broadcast %69 : vector<1x48xf32> to vector<4x48xf32>
    %663 = arith.addf %661, %662 : vector<4x48xf32>
    %664 = vector.extract_strided_slice %660 {offsets = [0, 0], sizes = [4, 16], strides = [1, 1]} : vector<4x48xf32> to vector<4x16xf32>
    %665 = vector.extract_strided_slice %663 {offsets = [0, 0], sizes = [4, 16], strides = [1, 1]} : vector<4x48xf32> to vector<4x16xf32>
    %666 = arith.addf %664, %665 : vector<4x16xf32>
    %667 = arith.negf %666 : vector<4x16xf32>
    %668 = math.exp %667 : vector<4x16xf32>
    %cst_117 = arith.constant 1.000000e+00 : f32
    %669 = vector.broadcast %cst_117 : f32 to vector<4x16xf32>
    %670 = arith.addf %669, %668 : vector<4x16xf32>
    %671 = arith.divf %669, %670 : vector<4x16xf32>
    %672 = vector.extract_strided_slice %660 {offsets = [0, 16], sizes = [4, 16], strides = [1, 1]} : vector<4x48xf32> to vector<4x16xf32>
    %673 = vector.extract_strided_slice %663 {offsets = [0, 16], sizes = [4, 16], strides = [1, 1]} : vector<4x48xf32> to vector<4x16xf32>
    %674 = arith.addf %672, %673 : vector<4x16xf32>
    %675 = arith.negf %674 : vector<4x16xf32>
    %676 = math.exp %675 : vector<4x16xf32>
    %cst_118 = arith.constant 1.000000e+00 : f32
    %677 = vector.broadcast %cst_118 : f32 to vector<4x16xf32>
    %678 = arith.addf %677, %676 : vector<4x16xf32>
    %679 = arith.divf %677, %678 : vector<4x16xf32>
    %680 = vector.extract_strided_slice %660 {offsets = [0, 32], sizes = [4, 16], strides = [1, 1]} : vector<4x48xf32> to vector<4x16xf32>
    %681 = vector.extract_strided_slice %663 {offsets = [0, 32], sizes = [4, 16], strides = [1, 1]} : vector<4x48xf32> to vector<4x16xf32>
    %682 = arith.mulf %671, %681 : vector<4x16xf32>
    %683 = arith.addf %680, %682 : vector<4x16xf32>
    %684 = math.tanh %683 : vector<4x16xf32>
    %cst_119 = arith.constant 1.000000e+00 : f32
    %685 = vector.broadcast %cst_119 : f32 to vector<4x16xf32>
    %686 = arith.subf %685, %679 : vector<4x16xf32>
    %687 = arith.mulf %686, %684 : vector<4x16xf32>
    %688 = arith.mulf %679, %655 : vector<4x16xf32>
    %689 = arith.addf %687, %688 : vector<4x16xf32>
    %690 = vector.extract_strided_slice %65 {offsets = [12, 0], sizes = [1, 48], strides = [1, 1]} : vector<28x48xf32> to vector<1x48xf32>
    %691 = vector.extract_strided_slice %65 {offsets = [26, 0], sizes = [1, 48], strides = [1, 1]} : vector<28x48xf32> to vector<1x48xf32>
    %692 = vector.extract_strided_slice %65 {offsets = [13, 0], sizes = [1, 48], strides = [1, 1]} : vector<28x48xf32> to vector<1x48xf32>
    %693 = vector.extract_strided_slice %65 {offsets = [27, 0], sizes = [1, 48], strides = [1, 1]} : vector<28x48xf32> to vector<1x48xf32>
    %694 = tpu.concatenate %690, %691, %692, %693 in 0 : vector<1x48xf32>, vector<1x48xf32>, vector<1x48xf32>, vector<1x48xf32> -> vector<4x48xf32>
    %cst_120 = arith.constant dense<0.000000e+00> : vector<4x48xf32>
    %695 = tpu.matmul %689, %68, %cst_120 {dimension_numbers = #tpu.dot_dimension_numbers<[1], [0], [0], [1], [0, 0, 1, 1], [], []>, precision = #tpu.contract_precision<fp32>} : vector<4x16xf32>, vector<16x48xf32>, vector<4x48xf32> -> vector<4x48xf32>
    %696 = vector.broadcast %69 : vector<1x48xf32> to vector<4x48xf32>
    %697 = arith.addf %695, %696 : vector<4x48xf32>
    %698 = vector.extract_strided_slice %694 {offsets = [0, 0], sizes = [4, 16], strides = [1, 1]} : vector<4x48xf32> to vector<4x16xf32>
    %699 = vector.extract_strided_slice %697 {offsets = [0, 0], sizes = [4, 16], strides = [1, 1]} : vector<4x48xf32> to vector<4x16xf32>
    %700 = arith.addf %698, %699 : vector<4x16xf32>
    %701 = arith.negf %700 : vector<4x16xf32>
    %702 = math.exp %701 : vector<4x16xf32>
    %cst_121 = arith.constant 1.000000e+00 : f32
    %703 = vector.broadcast %cst_121 : f32 to vector<4x16xf32>
    %704 = arith.addf %703, %702 : vector<4x16xf32>
    %705 = arith.divf %703, %704 : vector<4x16xf32>
    %706 = vector.extract_strided_slice %694 {offsets = [0, 16], sizes = [4, 16], strides = [1, 1]} : vector<4x48xf32> to vector<4x16xf32>
    %707 = vector.extract_strided_slice %697 {offsets = [0, 16], sizes = [4, 16], strides = [1, 1]} : vector<4x48xf32> to vector<4x16xf32>
    %708 = arith.addf %706, %707 : vector<4x16xf32>
    %709 = arith.negf %708 : vector<4x16xf32>
    %710 = math.exp %709 : vector<4x16xf32>
    %cst_122 = arith.constant 1.000000e+00 : f32
    %711 = vector.broadcast %cst_122 : f32 to vector<4x16xf32>
    %712 = arith.addf %711, %710 : vector<4x16xf32>
    %713 = arith.divf %711, %712 : vector<4x16xf32>
    %714 = vector.extract_strided_slice %694 {offsets = [0, 32], sizes = [4, 16], strides = [1, 1]} : vector<4x48xf32> to vector<4x16xf32>
    %715 = vector.extract_strided_slice %697 {offsets = [0, 32], sizes = [4, 16], strides = [1, 1]} : vector<4x48xf32> to vector<4x16xf32>
    %716 = arith.mulf %705, %715 : vector<4x16xf32>
    %717 = arith.addf %714, %716 : vector<4x16xf32>
    %718 = math.tanh %717 : vector<4x16xf32>
    %cst_123 = arith.constant 1.000000e+00 : f32
    %719 = vector.broadcast %cst_123 : f32 to vector<4x16xf32>
    %720 = arith.subf %719, %713 : vector<4x16xf32>
    %721 = arith.mulf %720, %718 : vector<4x16xf32>
    %722 = arith.mulf %713, %689 : vector<4x16xf32>
    %723 = arith.addf %721, %722 : vector<4x16xf32>
    %c0_124 = arith.constant 0 : index
    %c0_125 = arith.constant 0 : index
    %724 = vector.load %arg12[%c0_124, %c0_125] : memref<4x32xf32, #tpu.memory_space<vmem>>, vector<4x32xf32>
    %725 = tpu.transpose %518, [1, 0] : vector<2x32xf32> -> vector<32x2xf32>
    %cst_126 = arith.constant dense<0.000000e+00> : vector<4x2xf32>
    %726 = tpu.matmul %724, %725, %cst_126 {dimension_numbers = #tpu.dot_dimension_numbers<[1], [0], [0], [1], [0, 0, 1, 1], [], []>, precision = #tpu.contract_precision<fp32>} : vector<4x32xf32>, vector<32x2xf32>, vector<4x2xf32> -> vector<4x2xf32>
    %c0_127 = arith.constant 0 : index
    %c0_128 = arith.constant 0 : index
    %727 = vector.load %arg13[%c0_127, %c0_128] : memref<4x32xf32, #tpu.memory_space<vmem>>, vector<4x32xf32>
    %728 = vector.extract_strided_slice %727 {offsets = [0, 0], sizes = [4, 16], strides = [1, 1]} : vector<4x32xf32> to vector<4x16xf32>
    %729 = vector.extract_strided_slice %723 {offsets = [0, 0], sizes = [2, 16], strides = [1, 1]} : vector<4x16xf32> to vector<2x16xf32>
    %730 = tpu.transpose %729, [1, 0] : vector<2x16xf32> -> vector<16x2xf32>
    %cst_129 = arith.constant dense<0.000000e+00> : vector<4x2xf32>
    %731 = tpu.matmul %728, %730, %cst_129 {dimension_numbers = #tpu.dot_dimension_numbers<[1], [0], [0], [1], [0, 0, 1, 1], [], []>, precision = #tpu.contract_precision<fp32>} : vector<4x16xf32>, vector<16x2xf32>, vector<4x2xf32> -> vector<4x2xf32>
    %732 = arith.addf %726, %731 : vector<4x2xf32>
    %733 = vector.extract_strided_slice %727 {offsets = [0, 16], sizes = [4, 16], strides = [1, 1]} : vector<4x32xf32> to vector<4x16xf32>
    %734 = vector.extract_strided_slice %723 {offsets = [2, 0], sizes = [2, 16], strides = [1, 1]} : vector<4x16xf32> to vector<2x16xf32>
    %735 = tpu.transpose %734, [1, 0] : vector<2x16xf32> -> vector<16x2xf32>
    %cst_130 = arith.constant dense<0.000000e+00> : vector<4x2xf32>
    %736 = tpu.matmul %733, %735, %cst_130 {dimension_numbers = #tpu.dot_dimension_numbers<[1], [0], [0], [1], [0, 0, 1, 1], [], []>, precision = #tpu.contract_precision<fp32>} : vector<4x16xf32>, vector<16x2xf32>, vector<4x2xf32> -> vector<4x2xf32>
    %737 = arith.addf %732, %736 : vector<4x2xf32>
    %c0_131 = arith.constant 0 : index
    %c0_132 = arith.constant 0 : index
    %738 = vector.load %arg14[%c0_131, %c0_132] : memref<4x1xf32, #tpu.memory_space<vmem>>, vector<4x1xf32>
    %739 = vector.broadcast %738 : vector<4x1xf32> to vector<4x2xf32>
    %740 = arith.addf %737, %739 : vector<4x2xf32>
    %c0_133 = arith.constant 0 : index
    %c0_134 = arith.constant 0 : index
    %741 = vector.load %arg15[%c0_133, %c0_134] : memref<4x4xf32, #tpu.memory_space<vmem>>, vector<4x4xf32>
    %c0_135 = arith.constant 0 : index
    %c0_136 = arith.constant 0 : index
    %742 = vector.load %arg16[%c0_135, %c0_136] : memref<1x4xf32, #tpu.memory_space<vmem>>, vector<1x4xf32>
    %743 = vector.extract_strided_slice %28 {offsets = [0, 0, 12], sizes = [1, 4, 4], strides = [1, 1, 1]} : vector<2x4x16xf32> to vector<1x4x4xf32>
    %744 = vector.shape_cast %743 : vector<1x4x4xf32> to vector<4x4xf32>
    %cst_137 = arith.constant dense<0.000000e+00> : vector<4x4xf32>
    %745 = tpu.matmul %744, %741, %cst_137 {dimension_numbers = #tpu.dot_dimension_numbers<[1], [0], [0], [1], [0, 0, 1, 1], [], []>, precision = #tpu.contract_precision<fp32>} : vector<4x4xf32>, vector<4x4xf32>, vector<4x4xf32> -> vector<4x4xf32>
    %746 = vector.broadcast %742 : vector<1x4xf32> to vector<4x4xf32>
    %747 = arith.addf %745, %746 : vector<4x4xf32>
    %748 = vector.extract_strided_slice %740 {offsets = [0, 0], sizes = [4, 1], strides = [1, 1]} : vector<4x2xf32> to vector<4x1xf32>
    %749 = vector.broadcast %748 : vector<4x1xf32> to vector<4x4xf32>
    %750 = arith.addf %749, %747 : vector<4x4xf32>
    %c0_138 = arith.constant 0 : index
    %c0_139 = arith.constant 0 : index
    %c0_140 = arith.constant 0 : index
    %751 = vector.load %arg17[%c0_138, %c0_139, %c0_140] : memref<2x4x4xf32, #tpu.memory_space<vmem>>, vector<1x4x4xf32>
    %752 = vector.shape_cast %751 : vector<1x4x4xf32> to vector<4x4xf32>
    %753 = vector.shape_cast %750 : vector<4x4xf32> to vector<1x4x4xf32>
    tpu.vector_store %arg17[%c0_138, %c0_139, %c0_140], %753 {strides = array<i32>} : memref<2x4x4xf32, #tpu.memory_space<vmem>>, vector<1x4x4xf32>,
    %754 = vector.extract_strided_slice %28 {offsets = [1, 0, 12], sizes = [1, 4, 4], strides = [1, 1, 1]} : vector<2x4x16xf32> to vector<1x4x4xf32>
    %755 = vector.shape_cast %754 : vector<1x4x4xf32> to vector<4x4xf32>
    %cst_141 = arith.constant dense<0.000000e+00> : vector<4x4xf32>
    %756 = tpu.matmul %755, %741, %cst_141 {dimension_numbers = #tpu.dot_dimension_numbers<[1], [0], [0], [1], [0, 0, 1, 1], [], []>, precision = #tpu.contract_precision<fp32>} : vector<4x4xf32>, vector<4x4xf32>, vector<4x4xf32> -> vector<4x4xf32>
    %757 = vector.broadcast %742 : vector<1x4xf32> to vector<4x4xf32>
    %758 = arith.addf %756, %757 : vector<4x4xf32>
    %759 = vector.extract_strided_slice %740 {offsets = [0, 1], sizes = [4, 1], strides = [1, 1]} : vector<4x2xf32> to vector<4x1xf32>
    %760 = vector.broadcast %759 : vector<4x1xf32> to vector<4x4xf32>
    %761 = arith.addf %760, %758 : vector<4x4xf32>
    %c1 = arith.constant 1 : index
    %c0_142 = arith.constant 0 : index
    %c0_143 = arith.constant 0 : index
    %762 = vector.load %arg17[%c1, %c0_142, %c0_143] : memref<2x4x4xf32, #tpu.memory_space<vmem>>, vector<1x4x4xf32>
    %763 = vector.shape_cast %762 : vector<1x4x4xf32> to vector<4x4xf32>
    %764 = vector.shape_cast %761 : vector<4x4xf32> to vector<1x4x4xf32>
    tpu.vector_store %arg17[%c1, %c0_142, %c0_143], %764 {strides = array<i32>} : memref<2x4x4xf32, #tpu.memory_space<vmem>>, vector<1x4x4xf32>,
    return
  }
}

</mosaic_0001>

<bundles_post_ra>
// kernel: tpu_custom_call.1
= control target key start
LH: loop header
LB: loop body
LE: loop exit
PB: predicated region body
PF: predicated region fallthrough
CT: control target
= control target key end

     0   :  { %s19903_s0 = inlined_call_operand.hbm [shape: f32[2,4,16], index: 0, kind: input, shape index: {}]   ;;  %s19904_s1 = inlined_call_operand.hbm [shape: f32[2,4,16], index: 1, kind: input, shape index: {}]   ;;  %s19905_s2 = inlined_call_operand.vmem [shape: f32[12,8], index: 2, kind: input, shape index: {}]   ;;  %s19906_s3 = inlined_call_operand.hbm [shape: f32[1,8], index: 3, kind: input, shape index: {}]   ;;  %s19907_s4 = inlined_call_operand.hbm [shape: f32[8,96], index: 4, kind: input, shape index: {}]   ;;  %s19908_s5 = inlined_call_operand.vmem [shape: f32[32,96], index: 5, kind: input, shape index: {}]   ;;  %s19909_s6 = inlined_call_operand.hbm [shape: f32[1,96], index: 6, kind: input, shape index: {}]   ;;  %s19910_s7 = inlined_call_operand.hbm [shape: f32[1,96], index: 7, kind: input, shape index: {}]   ;;  %s19911_s8 = inlined_call_operand.vmem [shape: f32[8,48], index: 8, kind: input, shape index: {}]   ;;  %s19912_s9 = inlined_call_operand.hbm [shape: f32[16,48], index: 9, kind: input, shape index: {}]   ;;  %s19913_s10 = inlined_call_operand.hbm [shape: f32[1,48], index: 10, kind: input, shape index: {}]   ;;  %s19914_s11 = inlined_call_operand.hbm [shape: f32[1,48], index: 11, kind: input, shape index: {}]   ;;  %s19915_s12 = inlined_call_operand.vmem [shape: f32[4,32], index: 12, kind: input, shape index: {}]   ;;  %s19916_s13 = inlined_call_operand.vmem [shape: f32[4,32], index: 13, kind: input, shape index: {}]   ;;  %s19917_s14 = inlined_call_operand.vmem [shape: f32[4,1], index: 14, kind: input, shape index: {}]   ;;  %s19918_s15 = inlined_call_operand.vmem [shape: f32[4,4], index: 15, kind: input, shape index: {}]   ;;  %s19919_s16 = inlined_call_operand.vmem [shape: f32[1,4], index: 16, kind: input, shape index: {}]   ;;  %s19920_s17 = inlined_call_operand.hbm [shape: f32[2,4,4], index: 17, kind: output, shape index: {0}]   ;;  %s19921_s18 = inlined_call_operand.vmem [shape: f32[2,4,1], index: 18, kind: output, shape index: {1}]  }
   0x1   :  { %19926 = sst [smem:[#allocation24_spill]] %s19903_s0 }
   0x2   :  { %19927 = sst [smem:[#allocation25_spill]] %s19904_s1 }
   0x3   :  { %19928 = sst [smem:[#allocation26_spill]] %s19905_s2 }
   0x4   :  { %24 = vsyncpa [#allocation3], 0 }
   0x5   :  { %25 = vsyncpa [#allocation6], 0 }
   0x6   :  { %26 = vsyncpa [#allocation9], 0 }
   0x7   :  { %27 = vsyncpa [#allocation12], 0 }
   0x8   :  { %28 = vsyncpa [#allocation15], 0 }
   0x9   :  { %29 = vsyncpa [#allocation4], 0  ;;  %s17787_s27 = smov [#allocation5]   ;;  %s17788_s29 = smov [#allocation8]  }
   0xa   :  { %s47_s28 = sshll.u32 %s17787_s27, 4  ;;  %s72_s30 = sshll.u32 %s17788_s29, 4  ;;  %s48_s28 = int_to_ptr.vmem [resolvable:$true] %s47_s28  ;;  %s73_s30 = int_to_ptr.vmem [resolvable:$true] %s72_s30 }
   0xb   :  { %s17583_s0 = scalar_lea.vmem %s48_s28, 128  ;;  %p17588_p1 = scmp.lt.s32.totalorder %s48_s28, %s48_s28 }
   0xc   :  { %p17584_p0 = scmp.ne.s32.totalorder %s48_s28, %s17583_s0  ;;  %p17589_p2 = scmp.lt.s32.totalorder %s17583_s0, %s17583_s0 }
   0xe   :  { %p17590_p3 = por %p17589_p2, %p17588_p1 }
  0x10   :  { %p17591_p4 = pnand %p17590_p3, %p17584_p0 }
  0x12   :  { %17594 = shalt.err (!%p17591_p4)
}
  0x13   :  { %s17789_s19 = smov 64   ;;  %s17790_s1 = smov 4  }
  0x14   :  { %s19929_s22 = sld [smem:[#allocation25_spill]]  ;;  %s17603_s2 = scalar_lea.vmem %s73_s30, 128 }
  0x15   :  { %p17604_p5 = scmp.ne.s32.totalorder %s73_s30, %s17603_s2  ;;  %p17608_p6 = scmp.lt.s32.totalorder %s73_s30, %s73_s30 }
  0x16   :  { %p17609_p7 = scmp.lt.s32.totalorder %s17603_s2, %s17603_s2 }
  0x18   :  { %p17610_p8 = por %p17609_p7, %p17608_p6 }
  0x1a   :  { %53 = dma.hbm_to_vmem [thread:$0]  %s19929_s22, 128, %s48_s28, [#allocation6], %s17789_s19, %s17789_s19, %s17790_s1  }
  0x1b   :  { %p17611_p9 = pnand %p17610_p8, %p17604_p5 }
  0x1d   :  { %17614 = shalt.err (!%p17611_p9)
}
  0x1e   :  { %75 = dma.hbm_to_vmem [thread:$0]  %s19907_s4, 128, %s73_s30, [#allocation9]  }
  0x1f   :  { %s17791_s25 = smov [#allocation11]   ;;  %s17792_s27 = smov [#allocation14]  }
  0x20   :  { %s94_s26 = sshll.u32 %s17791_s25, 4  ;;  %s118_s29 = sshll.u32 %s17792_s27, 4  ;;  %s95_s26 = int_to_ptr.vmem [resolvable:$true] %s94_s26  ;;  %s119_s29 = int_to_ptr.vmem [resolvable:$true] %s118_s29 }
  0x21   :  { %s17623_s0 = scalar_lea.vmem %s95_s26, 16  ;;  %s17627_s28 = scalar_lea.vmem %s95_s26, 32 }
  0x22   :  { %p17624_p10 = scmp.ne.s32.totalorder %s95_s26, %s17623_s0  ;;  %p17628_p11 = scmp.lt.s32.totalorder %s95_s26, %s95_s26 }
  0x23   :  { %p17629_p12 = scmp.lt.s32.totalorder %s17627_s28, %s17623_s0 }
  0x25   :  { %p17630_p13 = por %p17629_p12, %p17628_p11 }
  0x27   :  { %p17631_p0 = pnand %p17630_p13, %p17624_p10 }
  0x29   :  { %17634 = shalt.err (!%p17631_p0)
}
  0x2a   :  { %97 = dma.hbm_to_vmem [thread:$0]  %s19910_s7, 16, %s95_s26, [#allocation12]  }
  0x2b   :  { %s17643_s22 = scalar_lea.vmem %s119_s29, 16  ;;  %s17647_s4 = scalar_lea.vmem %s119_s29, 32 }
  0x2c   :  { %p17644_p1 = scmp.ne.s32.totalorder %s119_s29, %s17643_s22  ;;  %p17648_p2 = scmp.lt.s32.totalorder %s119_s29, %s119_s29 }
  0x2d   :  { %p17649_p3 = scmp.lt.s32.totalorder %s17647_s4, %s17643_s22 }
  0x2f   :  { %p17650_p4 = por %p17649_p3, %p17648_p2 }
  0x31   :  { %p17651_p5 = pnand %p17650_p4, %p17644_p1 }
  0x33   :  { %17654 = shalt.err (!%p17651_p5)
}
  0x34   :  { %121 = dma.hbm_to_vmem [thread:$0]  %s19913_s10, 16, %s119_s29, [#allocation15]  }
  0x35   :  { %s17793_s23 = smov [#allocation2]   ;;  %s17794_s25 = smov [#allocation7]  }
  0x36   :  { %s35_s24 = sshll.u32 %s17793_s23, 4  ;;  %s62_s27 = sshll.u32 %s17794_s25, 4  ;;  %s36_s24 = int_to_ptr.vmem [resolvable:$true] %s35_s24  ;;  %s63_s27 = int_to_ptr.vmem [resolvable:$true] %s62_s27 }
  0x37   :  { %s17663_s0 = scalar_lea.vmem %s36_s24, 128  ;;  %p17668_p7 = scmp.lt.s32.totalorder %s36_s24, %s36_s24 }
  0x38   :  { %p17664_p6 = scmp.ne.s32.totalorder %s36_s24, %s17663_s0  ;;  %p17669_p8 = scmp.lt.s32.totalorder %s17663_s0, %s17663_s0 }
  0x3a   :  { %p17670_p9 = por %p17669_p8, %p17668_p7 }
  0x3c   :  { %p17671_p10 = pnand %p17670_p9, %p17664_p6 }
  0x3e   :  { %17674 = shalt.err (!%p17671_p10)
}
  0x3f   :  { %s19930_s28 = sld [smem:[#allocation24_spill]]  ;;  %s17683_s10 = scalar_lea.vmem %s63_s27, 16 }
  0x40   :  { %p17684_p11 = scmp.ne.s32.totalorder %s63_s27, %s17683_s10  ;;  %s17687_s29 = scalar_lea.vmem %s63_s27, 32 }
  0x41   :  { %p17688_p12 = scmp.lt.s32.totalorder %s63_s27, %s63_s27  ;;  %p17689_p13 = scmp.lt.s32.totalorder %s17687_s29, %s17683_s10 }
  0x43   :  { %p17690_p0 = por %p17689_p13, %p17688_p12 }
  0x45   :  { %41 = dma.hbm_to_vmem [thread:$0]  %s19930_s28, 128, %s36_s24, [#allocation3], %s17789_s19, %s17789_s19, %s17790_s1  }
  0x46   :  { %p17691_p1 = pnand %p17690_p0, %p17684_p11 }
  0x48   :  { %17694 = shalt.err (!%p17691_p1)
}
  0x49   :  { %65 = dma.hbm_to_vmem [thread:$0]  %s19906_s3, 16, %s63_s27, [#allocation6]  }
  0x4a   :  { %s17795_s22 = smov [#allocation10]   ;;  %s17796_s30 = smov [#allocation13]  }
  0x4b   :  { %s84_s4 = sshll.u32 %s17795_s22, 4  ;;  %s105_s2 = sshll.u32 %s17796_s30, 4  ;;  %s85_s4 = int_to_ptr.vmem [resolvable:$true] %s84_s4  ;;  %s106_s2 = int_to_ptr.vmem [resolvable:$true] %s105_s2 }
  0x4c   :  { %s17703_s23 = scalar_lea.vmem %s85_s4, 16  ;;  %s17707_s24 = scalar_lea.vmem %s85_s4, 32 }
  0x4d   :  { %p17704_p2 = scmp.ne.s32.totalorder %s85_s4, %s17703_s23  ;;  %p17708_p3 = scmp.lt.s32.totalorder %s85_s4, %s85_s4 }
  0x4e   :  { %p17709_p4 = scmp.lt.s32.totalorder %s17707_s24, %s17703_s23 }
  0x50   :  { %p17710_p5 = por %p17709_p4, %p17708_p3 }
  0x52   :  { %p17711_p6 = pnand %p17710_p5, %p17704_p2 }
  0x54   :  { %17714 = shalt.err (!%p17711_p6)
}
  0x55   :  { %87 = dma.hbm_to_vmem [thread:$0]  %s19909_s6, 16, %s85_s4, [#allocation9]  }
  0x56   :  { %s17723_s7 = scalar_lea.vmem %s106_s2, 256  ;;  %p17728_p8 = scmp.lt.s32.totalorder %s106_s2, %s106_s2 }
  0x57   :  { %p17724_p7 = scmp.ne.s32.totalorder %s106_s2, %s17723_s7  ;;  %p17729_p9 = scmp.lt.s32.totalorder %s17723_s7, %s17723_s7 }
  0x59   :  { %p17730_p10 = por %p17729_p9, %p17728_p8 }
  0x5b   :  { %p17731_p11 = pnand %p17730_p10, %p17724_p7 }
  0x5d   :  { %17734 = shalt.err (!%p17731_p11)
}
  0x5e   :  { %s17797_s3 = smov 128   ;;  %s17798_s27 = smov 8  }
  0x5f   :  { %111 = dma.hbm_to_vmem [thread:$0]  %s19912_s9, 256, %s106_s2, [#allocation12], %s17797_s3, %s17797_s3, %s17798_s27  }
  0x60   :  { %s17799_s10 = smov [#allocation16]  }
  0x61   :  { %s128_s29 = sshll.u32 %s17799_s10, 4  ;;  %s129_s29 = int_to_ptr.vmem [resolvable:$true] %s128_s29 }
  0x62   :  { %s17743_s20 = scalar_lea.vmem %s129_s29, 16  ;;  %s17747_s6 = scalar_lea.vmem %s129_s29, 32 }
  0x63   :  { %p17744_p12 = scmp.ne.s32.totalorder %s129_s29, %s17743_s20  ;;  %p17748_p13 = scmp.lt.s32.totalorder %s129_s29, %s129_s29 }
  0x64   :  { %p17749_p0 = scmp.lt.s32.totalorder %s17747_s6, %s17743_s20 }
  0x66   :  { %p17750_p1 = por %p17749_p0, %p17748_p13 }
  0x68   :  { %p17751_p2 = pnand %p17750_p1, %p17744_p12 }
  0x6a   :  { %17754 = shalt.err (!%p17751_p2)
}
  0x6b   :  { %131 = dma.hbm_to_vmem [thread:$0]  %s19914_s11, 16, %s129_s29, [#allocation15]  }
  0x6c   :  { %17775 = dma.done.wait [#allocation3], 128  }
  0x6d   :  { %17776 = vsyncadd [#allocation3], 4294967168 }
  0x6e   :  { %17777 = dma.done.wait [#allocation6], 144  }
  0x6f   :  { %17778 = vsyncadd [#allocation6], 4294967152 }
  0x70   :  { %17779 = dma.done.wait [#allocation9], 144  }
  0x71   :  { %17780 = vsyncadd [#allocation9], 4294967152 }
  0x72   :  { %17781 = dma.done.wait [#allocation12], 272  }
  0x73   :  { %17782 = vsyncadd [#allocation12], 4294967024 }
  0x74   :  { %17783 = dma.done.wait [#allocation15], 32  }
  0x75   :  { %17784 = vsyncadd [#allocation15], 4294967264  ;;  %vm173_vm0 = vcmask 125952   ;;  %v171_v0 = vld [vmem:[#allocation5] sm:$0xf]  ;;  %vm190_vm1 = vcmask 1043456  }
  0x76   :  { %v172_v1 = vld [vmem:[#allocation5 + $0x4] sm:$0xf]  ;;  %v169_v2 = vld [vmem:[#allocation2] sm:$0xf]  ;;  %v174_v3 = vsel %vm173_vm0, %v171_v0, 0.0  ;;  %s19931_s4 = sld [smem:[#allocation26_spill]] }
  0x77   :  { %v180_v4 = vand.u32 2147483647, %v169_v2  ;;  %v170_v5 = vld [vmem:[#allocation2 + $0x4] sm:$0xf]  ;;  %175 = vadd.xlane.f32.xlu0 %v174_v3  ;;  %v177_v8 = vsel %vm173_vm0, %v172_v1, 0.0  ;;  %vm212_vm4 = vcmask 3072  }
  0x78   :  { %v181_v6 = vand.u32 2147483647, %v170_v5  ;;  %vm256_vm5 = vcmask 1046528   ;;  %vm266_vm6 = vcmask 1045504   ;;  %vm276_vm7 = vcmask 31744   ;;  %s17803_s6 = smov 32  }
  0x79   :  { %v182_v9 = vmul.f32 %v180_v4, %v171_v0  ;;  %vm279_vm8 = vcmask 64512   ;;  %vm288_vm9 = vcmask 97280   ;;  %vm17801_vm10 = vmmov 0   ;;  %s17804_s21 = smov 112   ;;  %s17805_s11 = smov 116  }
  0x7a   :  { %v183_v11 = vmul.f32 %v181_v6, %v172_v1  ;;  %vm2562_vm11 = vcmask 1040384   ;;  %vm9864_vm12 = vcmask 1041408   ;;  %vm9866_vm13 = vcmask 1042432  }
  0x7b   :  { %v184_v12 = vsel %vm173_vm0, %v182_v9, 0.0  ;;  %178 = vadd.xlane.f32.xlu0 %v177_v8  ;;  %vm2570_vm14 = vcmask 261120   ;;  %vm9874_vm15 = vcmask 130048  }
  0x7c   :  { %v220_v7 = vld [vmem:[%s19931_s4 + $0x8] sm:$0xf]  ;;  %185 = vadd.xlane.f32.xlu1 %v184_v12  ;;  %v187_v14 = vsel %vm173_vm0, %v183_v11, 0.0  ;;  %v219_v43 = vld [vmem:[%s19931_s4] sm:$0xff]  ;;  %vm14704_vm0 = vcmask 27648  }
  0x7d   :  { %v296_v10 = vsel %vm190_vm1, %v220_v7, 0  ;;  %v17972_v44 = vand.u32 4294901760, %v219_v43 }
  0x7e   :  { %v17945_v13 = vand.u32 4294901760, %v296_v10 }
  0x7f   :  { %v17978_v46 = vsub.f32 %v219_v43, %v17972_v44 }
  0x80   :  { %15911 = vmatprep.subr.mxu0 %v17945_v13  ;;  %188 = vadd.xlane.f32.xlu1 %v187_v14  ;;  %v17967_v42 = vsub.f32 %v296_v10, %v17945_v13 }
  0x81   :  { %15912 = vmatpush3.msra.mxu0 %v17945_v13  ;;  %v17985_v48 = vand.u32 4294901760, %v17978_v46 }
  0x82   :  { %v17975_v45 = vand.u32 4294901760, %v17967_v42  ;;  %15913 = vmatprep.subr.mxu0 %v17972_v44 }
  0x83   :  { %15914 = vmatpush3.msra.mxu0 %v17972_v44  ;;  %v424_v52 = vsub.f32 %v17978_v46, %v17985_v48 }
  0x84   :  { %v417_v47 = vsub.f32 %v17967_v42, %v17975_v45  ;;  %15925 = vmatprep.subr.mxu0 %v17967_v42 }
  0x85   :  { %v17993_v53 = vand.u32 4294901760, %v424_v52 }
  0x86   :  { %v17988_v51 = vand.u32 4294901760, %v417_v47 }
  0x88   :  { %15918 = vmatprep.subr.mxu1 %v17988_v51 }
  0x89   :  { %15919 = vmatpush3.msra.mxu1 %v17988_v51 }
  0x8a   :  { %15920 = vmatprep.subr.mxu1 %v17993_v53 }
  0x8b   :  { %15921 = vmatpush3.msra.mxu1 %v17993_v53 }
  0x8c   :  { %15932 = vmatprep.subr.mxu1 %v17945_v13 }
 0x100   :  { %v176_v15 = vpop.xlane.xlu0 %175 }
 0x101   :  { %v202_v16 = vmax.f32 %v176_v15, 1.0  ;;  %v191_v18 = vsel %vm190_vm1, %v176_v15, 0.0 }
 0x103   :  { %17443 = vrcp.f32 %v202_v16 }
 0x104   :  { %v179_v17 = vpop.xlane.xlu0 %178 }
 0x105   :  { %v192_v19 = vsel %vm190_vm1, %v179_v17, 0.0  ;;  %v203_v20 = vmax.f32 %v179_v17, 1.0  ;;  %v186_v23 = vpop.xlane.xlu1 %185 }
 0x106   :  { %v193_v21 = vadd.f32 %v192_v19, %v191_v18  ;;  %v194_v25 = vsel %vm190_vm1, %v186_v23, 0.0  ;;  %vm200_vm2 = vcmp.gt.f32.partialorder %v186_v23, 0.0 }
 0x107   :  { %17445 = vrcp.f32 %v203_v20 }
 0x108   :  { %v197_v22 = vmax.f32 %v193_v21, 1.0 }
 0x109   :  { %v189_v24 = vpop.xlane.xlu1 %188 }
 0x10a   :  { %17447 = vrcp.f32 %v197_v22  ;;  %v195_v26 = vsel %vm190_vm1, %v189_v24, 0.0  ;;  %vm201_vm3 = vcmp.gt.f32.partialorder %v189_v24, 0.0 }
 0x10b   :  { %v196_v29 = vadd.f32 %v195_v26, %v194_v25 }
 0x110   :  { %v17444_v27 = vpop.eup %17443 }
 0x111   :  { %v205_v31 = vmul.f32 %v17444_v27, %v186_v23 }
 0x114   :  { %v17446_v28 = vpop.eup %17445 }
 0x115   :  { %v207_v33 = vmul.f32 %v17446_v28, %v189_v24 }
 0x117   :  { %v17448_v30 = vpop.eup %17447 }
 0x118   :  { %v199_v32 = vmul.f32 %v17448_v30, %v196_v29 }
 0x11a   :  { %v208_v34 = vsel %vm200_vm2, %v205_v31, %v199_v32  ;;  %v209_v35 = vsel %vm201_vm3, %v207_v33, %v199_v32 }
 0x11b   :  { %v210_v36 = vmax.f32 %v208_v34, 1e-10  ;;  %v211_v37 = vmax.f32 %v209_v35, 1e-10 }
 0x11d   :  { %213 = vst.msk [vmem:[%s19921_s18] sm:$0xf] %vm212_vm4, %v210_v36  ;;  %214 = vst.msk [vmem:[%s19921_s18 + $0x4] sm:$0xf] %vm212_vm4, %v211_v37  ;;  %17449 = vrcp.f32 %v211_v37 }
 0x11e   :  { %17451 = vrcp.f32 %v210_v36 }
 0x12a   :  { %v17450_v38 = vpop.eup %17449 }
 0x12b   :  { %v17452_v39 = vpop.eup %17451  ;;  %v17960_v40 = vmul.f32 %v17450_v38, %v170_v5 }
 0x12c   :  { %v17962_v41 = vmul.f32 %v17452_v39, %v169_v2 }
 0x12d   :  { %802 = vxpose.xlu1.b32.start.end [1/1] (short) (narrow) %v17960_v40, 16 }
 0x12e   :  { %222 = vxpose.xlu0.b32.start.end [1/1] (short) (narrow) %v17962_v41, 16 }
 0x1a9   :  { %v818_v49 = vpop.trf.xlu1 }
 0x1aa   :  { %v238_v50 = vpop.trf.xlu0  ;;  %v836_v58 = vrot.slane %v818_v49, 1  ;;  %v845_v0 = vrot.slane %v818_v49, 2 }
 0x1ab   :  { %v257_v56 = vrot.slane %v238_v50, 1  ;;  %v267_v62 = vrot.slane %v238_v50, 2 }
 0x1ad   :  { %v819_v54 = vpop.trf.xlu1 }
 0x1ae   :  { %v239_v55 = vpop.trf.xlu0  ;;  %v837_v59 = vrot.slane %v819_v54, 1  ;;  %v846_v1 = vrot.slane %v819_v54, 2 }
 0x1af   :  { %v258_v57 = vrot.slane %v239_v55, 1  ;;  %v268_v60 = vrot.slane %v239_v55, 2 }
 0x1b0   :  { %v838_v63 = vsel %vm256_vm5, %v836_v58, %v837_v59  ;;  %v847_v3 = vsel %vm266_vm6, %v845_v0, %v846_v1 }
 0x1b1   :  { %262 = vrot.lane.b32.xlu1 %v258_v57, %s17790_s1  ;;  %v259_v61 = vsel %vm256_vm5, %v257_v56, %v258_v57  ;;  %v269_v2 = vsel %vm266_vm6, %v267_v62, %v268_v60  ;;  %v15189_v57 = vld [vmem:[#allocation7] ss:$0 sm:$0xff] }
 0x1b2   :  { %260 = vrot.lane.b32.xlu0 %v259_v61, %s17790_s1 }
 0x1b5   :  { %270 = vrot.lane.b32.xlu1 %v269_v2, %s17798_s27 }
 0x1b6   :  { %839 = vrot.lane.b32.xlu0 %v838_v63, %s17790_s1 }
 0x1b9   :  { %272 = vrot.lane.b32.xlu1 %v268_v60, %s17798_s27 }
 0x1ba   :  { %848 = vrot.lane.b32.xlu0 %v847_v3, %s17798_s27 }
 0x1bd   :  { %841 = vrot.lane.b32.xlu1 %v837_v59, %s17790_s1 }
 0x1c1   :  { %850 = vrot.lane.b32.xlu1 %v846_v1, %s17798_s27 }
 0x223   :  { %v263_v4 = vpop.permute.xlu1 %262 }
 0x224   :  { %v261_v5 = vpop.permute.xlu0 %260  ;;  %v278_v12 = vsel %vm276_vm7, %v239_v55, %v263_v4 }
 0x225   :  { %v277_v6 = vsel %vm276_vm7, %v238_v50, %v261_v5 }
 0x227   :  { %v271_v7 = vpop.permute.xlu1 %270 }
 0x228   :  { %v280_v8 = vsel %vm279_vm8, %v277_v6, %v271_v7  ;;  %v840_v9 = vpop.permute.xlu0 %839 }
 0x229   :  { %v290_v10 = vsel %vm288_vm9, %v280_v8, 0  ;;  %v854_v18 = vsel %vm276_vm7, %v818_v49, %v840_v9 }
 0x22a   :  { %v365_v11 = vand.u32 4294901760, %v290_v10 }
 0x22b   :  { %v273_v14 = vpop.permute.xlu1 %272 }
 0x22c   :  { %v366_v15 = vsub.f32 %v290_v10, %v365_v11  ;;  %v281_v16 = vsel %vm279_vm8, %v278_v12, %v273_v14  ;;  %15922 = vmatprep.mubr.f32.mxu1 %v365_v11  ;;  %v849_v17 = vpop.permute.xlu0 %848 }
 0x22d   :  { %v293_v19 = vsel %vm288_vm9, %v281_v16, 0  ;;  %v856_v21 = vsel %vm279_vm8, %v854_v18, %v849_v17 }
 0x22e   :  { %v375_v20 = vand.u32 4294901760, %v293_v19  ;;  %v367_v22 = vand.u32 4294901760, %v366_v15  ;;  %v859_v26 = vsel %vm288_vm9, %v856_v21, 0 }
 0x22f   :  { %v842_v23 = vpop.permute.xlu1 %841  ;;  %v18022_v31 = vand.u32 4294901760, %v859_v26 }
 0x230   :  { %v376_v24 = vsub.f32 %v293_v19, %v375_v20  ;;  %15923 = vmatmul.mubr.f32.vlgmr.msra.gmra.mxu1 %v375_v20  ;;  %v368_v25 = vsub.f32 %v366_v15, %v367_v22  ;;  %v855_v29 = vsel %vm276_vm7, %v819_v54, %v842_v23 }
 0x231   :  { %15933 = vmatpush3.msra.mxu1 %v17945_v13  ;;  %15936 = vmatprep.mubr.f32.mxu1 %v367_v22  ;;  %v932_v36 = vsub.f32 %v859_v26, %v18022_v31 }
 0x232   :  { %15934 = vmatprep.subr.mxu1 %v17972_v44  ;;  %v369_v27 = vand.u32 4294901760, %v368_v25  ;;  %v377_v28 = vand.u32 4294901760, %v376_v24 }
 0x233   :  { %v851_v30 = vpop.permute.xlu1 %850  ;;  %15935 = vmatpush3.msra.mxu1 %v17972_v44  ;;  %v933_v39 = vand.u32 4294901760, %v932_v36 }
 0x234   :  { %v857_v32 = vsel %vm279_vm8, %v855_v29, %v851_v30  ;;  %15915 = vmatprep.mubr.f32.mxu0 %v369_v27  ;;  %15937 = vmatmul.mubr.f32.vlgmr.msra.gmra.mxu1 %v377_v28  ;;  %v378_v33 = vsub.f32 %v376_v24, %v377_v28 }
 0x235   :  { %v862_v34 = vsel %vm288_vm9, %v857_v32, 0  ;;  %15946 = vmatprep.subr.mxu1 %v17945_v13  ;;  %15950 = vmatprep.mubr.f32.mxu1 %v365_v11  ;;  %v934_v47 = vsub.f32 %v932_v36, %v933_v39 }
 0x236   :  { %15947 = vmatpush3.msra.mxu1 %v17945_v13  ;;  %v379_v35 = vand.u32 4294901760, %v378_v33  ;;  %v941_v37 = vand.u32 4294901760, %v862_v34 }
 0x237   :  { %15948 = vmatprep.subr.mxu1 %v17972_v44  ;;  %v935_v49 = vand.u32 4294901760, %v934_v47  ;;  %v1968_v47 = vld [vmem:[%s19911_s8] sm:$0xff] }
 0x238   :  { %15949 = vmatpush3.msra.mxu1 %v17972_v44  ;;  %15916 = vmatmul.mubr.f32.vlgmr.msra.gmra.mxu0 %v379_v35  ;;  %v942_v38 = vsub.f32 %v862_v34, %v941_v37 }
 0x239   :  { %15951 = vmatmul.mubr.f32.vlgmr.msra.gmra.mxu1 %v375_v20  ;;  %15960 = vmatprep.subr.mxu1 %v17988_v51 }
 0x23a   :  { %15926 = vmatpush3.msra.mxu0 %v17967_v42  ;;  %15929 = vmatprep.mubr.f32.mxu0 %v366_v15  ;;  %v943_v43 = vand.u32 4294901760, %v942_v38 }
 0x23b   :  { %15961 = vmatpush3.msra.mxu1 %v17988_v51  ;;  %15964 = vmatprep.mubr.f32.mxu1 %v18022_v31 }
 0x23c   :  { %15927 = vmatprep.subr.mxu0 %v17978_v46  ;;  %15962 = vmatprep.subr.mxu1 %v17993_v53  ;;  %v944_v50 = vsub.f32 %v942_v38, %v943_v43 }
 0x23d   :  { %15928 = vmatpush3.msra.mxu0 %v17978_v46  ;;  %15963 = vmatpush3.msra.mxu1 %v17993_v53 }
 0x23e   :  { %15930 = vmatmul.mubr.f32.vlgmr.msra.gmra.mxu0 %v376_v24  ;;  %15939 = vmatprep.subr.mxu0 %v17975_v45  ;;  %v945_v51 = vand.u32 4294901760, %v944_v50 }
 0x23f   :  { %15965 = vmatmul.mubr.f32.vlgmr.msra.gmra.mxu1 %v941_v37  ;;  %15974 = vmatprep.subr.mxu1 %v17945_v13 }
 0x240   :  { %15940 = vmatpush3.msra.mxu0 %v17975_v45  ;;  %15943 = vmatprep.mubr.f32.mxu0 %v365_v11 }
 0x241   :  { %15975 = vmatpush3.msra.mxu1 %v17945_v13  ;;  %15978 = vmatprep.mubr.f32.mxu1 %v933_v39 }
 0x242   :  { %15941 = vmatprep.subr.mxu0 %v17985_v48  ;;  %15976 = vmatprep.subr.mxu1 %v17972_v44 }
 0x243   :  { %15942 = vmatpush3.msra.mxu0 %v17985_v48  ;;  %15977 = vmatpush3.msra.mxu1 %v17972_v44 }
 0x244   :  { %15944 = vmatmul.mubr.f32.vlgmr.msra.gmra.mxu0 %v375_v20  ;;  %15953 = vmatprep.subr.mxu0 %v17945_v13 }
 0x245   :  { %15979 = vmatmul.mubr.f32.vlgmr.msra.gmra.mxu1 %v943_v43  ;;  %15988 = vmatprep.subr.mxu1 %v17945_v13 }
 0x246   :  { %15954 = vmatpush3.msra.mxu0 %v17945_v13  ;;  %15957 = vmatprep.mubr.f32.mxu0 %v935_v49 }
 0x247   :  { %15989 = vmatpush3.msra.mxu1 %v17945_v13  ;;  %15992 = vmatprep.mubr.f32.mxu1 %v18022_v31  ;;  %v1375_v13 = vld [vmem:[#allocation8] sm:$0xff] }
 0x248   :  { %15955 = vmatprep.subr.mxu0 %v17972_v44  ;;  %15990 = vmatprep.subr.mxu1 %v17972_v44 }
 0x249   :  { %15956 = vmatpush3.msra.mxu0 %v17972_v44  ;;  %15991 = vmatpush3.msra.mxu1 %v17972_v44  ;;  %v18065_v44 = vand.u32 4294901760, %v1375_v13 }
 0x24a   :  { %15958 = vmatmul.mubr.f32.vlgmr.msra.gmra.mxu0 %v945_v51  ;;  %15967 = vmatprep.subr.mxu0 %v17967_v42 }
 0x24b   :  { %15993 = vmatmul.mubr.f32.vlgmr.msra.gmra.mxu1 %v941_v37  ;;  %15968 = vmatpush3.msra.mxu0 %v17967_v42  ;;  %v18068_v42 = vsub.f32 %v1375_v13, %v18065_v44 }
 0x24c   :  { %15971 = vmatprep.mubr.f32.mxu0 %v932_v36  ;;  %15969 = vmatprep.subr.mxu0 %v17978_v46 }
 0x24d   :  { %15970 = vmatpush3.msra.mxu0 %v17978_v46  ;;  %v18073_v46 = vand.u32 4294901760, %v18068_v42 }
 0x24e   :  { %15972 = vmatmul.mubr.f32.vlgmr.msra.gmra.mxu0 %v942_v38  ;;  %15981 = vmatprep.subr.mxu0 %v17975_v45 }
 0x24f   :  { %15982 = vmatpush3.msra.mxu0 %v17975_v45  ;;  %15985 = vmatprep.mubr.f32.mxu0 %v18022_v31  ;;  %v1533_v45 = vsub.f32 %v18068_v42, %v18073_v46 }
 0x250   :  { %15983 = vmatprep.subr.mxu0 %v17985_v48 }
 0x251   :  { %15984 = vmatpush3.msra.mxu0 %v17985_v48  ;;  %v1534_v48 = vand.u32 4294901760, %v1533_v45 }
 0x252   :  { %15986 = vmatmul.mubr.f32.vlgmr.msra.gmra.mxu0 %v941_v37  ;;  %15995 = vmatprep.subr.mxu0 %v18065_v44 }
 0x253   :  { %15996 = vmatpush3.msra.mxu0 %v18065_v44  ;;  %16003 = vmatprep.subr.mxu1 %v1534_v48 }
 0x254   :  { %16011 = vmatprep.subr.mxu0 %v18068_v42  ;;  %16004 = vmatpush3.msra.mxu1 %v1534_v48  ;;  %v18097_v48 = vand.u32 4294901760, %v1968_v47 }
 0x255   :  { %16019 = vmatprep.subr.mxu1 %v18065_v44 }
 0x2f0   :  { %v15924_v52 = vpop.f32.mrf.mxu1 }
 0x2f2   :  { %v462_v53 = vpop.f32.mrf.mxu1 }
 0x2f4   :  { %v15938_v54 = vpop.f32.mrf.mxu1 }
 0x2f6   :  { %v626_v55 = vpop.f32.mrf.mxu1 }
 0x2f8   :  { %v15917_v56 = vpop.f32.mrf.mxu0 }
 0x2f9   :  { %v15952_v58 = vpop.f32.mrf.mxu1  ;;  %v382_v3 = vadd.f32 %v15917_v56, %v15189_v57 }
 0x2fa   :  { %v371_v59 = vpop.f32.mrf.mxu0 }
 0x2fb   :  { %v372_v60 = vadd.f32 %v15189_v57, %v371_v59  ;;  %v790_v62 = vpop.f32.mrf.mxu1  ;;  %v469_v8 = vadd.f32 %v15924_v52, %v382_v3  ;;  %v18103_v59 = vsub.f32 %v1968_v47, %v18097_v48 }
 0x2fd   :  { %v463_v61 = vadd.f32 %v462_v53, %v372_v60 }
 0x2fe   :  { %v15931_v63 = vpop.f32.mrf.mxu0 }
 0x2ff   :  { %v15966_v2 = vpop.f32.mrf.mxu1  ;;  %v552_v14 = vadd.f32 %v15931_v63, %v469_v8 }
 0x300   :  { %v544_v0 = vpop.f32.mrf.mxu0 }
 0x301   :  { %v545_v1 = vadd.f32 %v544_v0, %v463_v61  ;;  %v1028_v6 = vpop.f32.mrf.mxu1  ;;  %v635_v24 = vadd.f32 %v15938_v54, %v552_v14 }
 0x303   :  { %v627_v4 = vadd.f32 %v626_v55, %v545_v1 }
 0x304   :  { %v15945_v5 = vpop.f32.mrf.mxu0 }
 0x305   :  { %v15980_v11 = vpop.f32.mrf.mxu1  ;;  %v718_v34 = vadd.f32 %v15945_v5, %v635_v24 }
 0x306   :  { %v711_v7 = vpop.f32.mrf.mxu0 }
 0x307   :  { %v712_v9 = vadd.f32 %v711_v7, %v627_v4  ;;  %v1192_v22 = vpop.f32.mrf.mxu1  ;;  %v797_v51 = vadd.f32 %v15952_v58, %v718_v34 }
 0x309   :  { %v791_v10 = vadd.f32 %v790_v62, %v712_v9  ;;  %v801_v54 = vmax.f32 %v797_v51, 0.0 }
 0x30a   :  { %v15959_v12 = vpop.f32.mrf.mxu0 }
 0x30b   :  { %v800_v15 = vmax.f32 %v791_v10, 0.0  ;;  %v948_v16 = vadd.f32 %v15959_v12, %v15189_v57  ;;  %v15994_v31 = vpop.f32.mrf.mxu1 }
 0x30c   :  { %v937_v17 = vpop.f32.mrf.mxu0 }
 0x30d   :  { %v1384_v18 = vsel %vm279_vm8, %v800_v15, 0  ;;  %v938_v19 = vadd.f32 %v15189_v57, %v937_v17  ;;  %v1035_v20 = vadd.f32 %v15966_v2, %v948_v16  ;;  %v1356_v49 = vpop.f32.mrf.mxu1  ;;  %v18117_v2 = vand.u32 4294901760, %v18103_v59  ;;  %v2552_v17 = vld [vmem:[%s19908_s5 + $0x8] sm:$0xff] }
 0x30e   :  { %v18080_v21 = vand.u32 4294901760, %v1384_v18  ;;  %v15973_v23 = vpop.f32.mrf.mxu0 }
 0x30f   :  { %v1118_v25 = vadd.f32 %v15973_v23, %v1035_v20  ;;  %v1029_v26 = vadd.f32 %v1028_v6, %v938_v19  ;;  %v2116_v8 = vsub.f32 %v18103_v59, %v18117_v2  ;;  %v18189_v20 = vand.u32 4294901760, %v2552_v17 }
 0x310   :  { %v18083_v27 = vsub.f32 %v1384_v18, %v18080_v21  ;;  %v1110_v28 = vpop.f32.mrf.mxu0  ;;  %16005 = vmatprep.mubr.f32.mxu1 %v18080_v21 }
 0x311   :  { %v1111_v29 = vadd.f32 %v1110_v28, %v1029_v26  ;;  %v1201_v30 = vadd.f32 %v15980_v11, %v1118_v25  ;;  %v2117_v15 = vand.u32 4294901760, %v2116_v8  ;;  %v18205_v26 = vsub.f32 %v2552_v17, %v18189_v20 }
 0x312   :  { %v15987_v32 = vpop.f32.mrf.mxu0  ;;  %v18087_v33 = vand.u32 4294901760, %v18083_v27 }
 0x313   :  { %v1284_v35 = vadd.f32 %v15987_v32, %v1201_v30  ;;  %v1193_v36 = vadd.f32 %v1192_v22, %v1111_v29  ;;  %v2551_v22 = vld [vmem:[%s19908_s5] sm:$0xff]  ;;  %v19923_v29 = vmov 0.0   ;;  %v18222_v32 = vand.u32 4294901760, %v18205_v26 }
 0x314   :  { %v1277_v37 = vpop.f32.mrf.mxu0  ;;  %v1462_v38 = vsub.f32 %v18083_v27, %v18087_v33  ;;  %v18202_v25 = vand.u32 4294901760, %v2551_v22 }
 0x315   :  { %v1363_v39 = vadd.f32 %v15994_v31, %v1284_v35  ;;  %v1278_v43 = vadd.f32 %v1277_v37, %v1193_v36  ;;  %v2695_v36 = vsub.f32 %v18205_v26, %v18222_v32 }
 0x316   :  { %v18094_v50 = vand.u32 4294901760, %v1462_v38  ;;  %v18218_v31 = vsub.f32 %v2551_v22, %v18202_v25 }
 0x317   :  { %v1367_v13 = vmax.f32 %v1363_v39, 0.0  ;;  %v1357_v45 = vadd.f32 %v1356_v49, %v1278_v43  ;;  %v18248_v38 = vand.u32 4294901760, %v2695_v36 }
 0x318   :  { %15997 = vmatprep.mubr.f32.mxu0 %v18094_v50  ;;  %v18231_v35 = vand.u32 4294901760, %v18218_v31 }
 0x319   :  { %v1371_v52 = vrot.slane %v1367_v13, 2  ;;  %v1366_v53 = vmax.f32 %v1357_v45, 0.0 }
 0x31a   :  { %v2702_v37 = vsub.f32 %v18218_v31, %v18231_v35 }
 0x31b   :  { %v1391_v55 = vsel %vm279_vm8, %v1371_v52, 0  ;;  %v1370_v56 = vrot.slane %v1366_v53, 2 }
 0x31c   :  { %v18100_v57 = vand.u32 4294901760, %v1391_v55  ;;  %v18256_v39 = vand.u32 4294901760, %v2702_v37 }
 0x31d   :  { %v1372_v60 = vsel %vm266_vm6, %v1370_v56, %v1371_v52  ;;  %v1374_v58 = vsel %vm266_vm6, %v801_v54, %v1370_v56 }
 0x31e   :  { %v1387_v61 = vsel %vm279_vm8, %v1374_v58, 0  ;;  %v1389_v62 = vsel %vm279_vm8, %v1372_v60, 0  ;;  %v18110_v63 = vsub.f32 %v1391_v55, %v18100_v57 }
 0x31f   :  { %v18112_v0 = vand.u32 4294901760, %v1387_v61  ;;  %v18114_v1 = vand.u32 4294901760, %v1389_v62 }
 0x320   :  { %v18133_v7 = vand.u32 4294901760, %v18110_v63 }
 0x321   :  { %v18120_v3 = vsub.f32 %v1387_v61, %v18112_v0  ;;  %v18123_v4 = vsub.f32 %v1389_v62, %v18114_v1  ;;  %16006 = vmatmul.mubr.f32.vlgmr.msra.gmra.mxu1 %v18112_v0 }
 0x322   :  { %16008 = vmatprep.mubr.f32.mxu1 %v18114_v1  ;;  %16020 = vmatpush3.msra.mxu1 %v18065_v44  ;;  %v1492_v14 = vsub.f32 %v18110_v63, %v18133_v7 }
 0x323   :  { %v1471_v5 = vand.u32 4294901760, %v18120_v3  ;;  %v18130_v6 = vand.u32 4294901760, %v18123_v4  ;;  %16035 = vmatprep.subr.mxu1 %v18065_v44 }
 0x324   :  { %v1493_v16 = vand.u32 4294901760, %v1492_v14 }
 0x325   :  { %16009 = vmatmul.mubr.f32.gmra.mxu1 %v18100_v57  ;;  %v1472_v9 = vsub.f32 %v18120_v3, %v1471_v5  ;;  %v1482_v10 = vsub.f32 %v18123_v4, %v18130_v6 }
 0x326   :  { %16021 = vmatprep.mubr.f32.mxu1 %v18087_v33 }
 0x327   :  { %v1473_v11 = vand.u32 4294901760, %v1472_v9  ;;  %v1483_v12 = vand.u32 4294901760, %v1482_v10 }
 0x329   :  { %15998 = vmatmul.mubr.f32.vlgmr.msra.gmra.mxu0 %v1473_v11  ;;  %16022 = vmatmul.mubr.f32.vlgmr.msra.gmra.mxu1 %v1471_v5 }
 0x32a   :  { %16000 = vmatprep.mubr.f32.mxu0 %v1483_v12  ;;  %16012 = vmatpush3.msra.mxu0 %v18068_v42 }
 0x32b   :  { %16024 = vmatprep.mubr.f32.mxu1 %v18130_v6  ;;  %16036 = vmatpush3.msra.mxu1 %v18065_v44  ;;  %v2554_v44 = vld [vmem:[%s19908_s5 + $0x18] sm:$0xff] }
 0x32c   :  { %16027 = vmatprep.subr.mxu0 %v18073_v46  ;;  %16051 = vmatprep.subr.mxu1 %v2117_v15  ;;  %v18166_v42 = vand.u32 4294901760, %v2554_v44 }
 0x32d   :  { %16001 = vmatmul.mubr.f32.gmra.mxu0 %v1493_v16  ;;  %16025 = vmatmul.mubr.f32.gmra.mxu1 %v18133_v7 }
 0x32e   :  { %16013 = vmatprep.mubr.f32.mxu0 %v18083_v27  ;;  %16037 = vmatprep.mubr.f32.mxu1 %v18080_v21  ;;  %v18185_v19 = vsub.f32 %v2554_v44, %v18166_v42 }
 0x330   :  { %v18200_v24 = vand.u32 4294901760, %v18185_v19 }
 0x331   :  { %16014 = vmatmul.mubr.f32.vlgmr.msra.gmra.mxu0 %v18120_v3  ;;  %16038 = vmatmul.mubr.f32.vlgmr.msra.gmra.mxu1 %v18112_v0 }
 0x332   :  { %16016 = vmatprep.mubr.f32.mxu0 %v18123_v4  ;;  %16028 = vmatpush3.msra.mxu0 %v18073_v46  ;;  %v2553_v46 = vld [vmem:[%s19908_s5 + $0x10] sm:$0xff]  ;;  %v2681_v30 = vsub.f32 %v18185_v19, %v18200_v24  ;;  %s17802_s5 = smov 96  }
 0x333   :  { %16040 = vmatprep.mubr.f32.mxu1 %v18114_v1  ;;  %16052 = vmatpush3.msra.mxu1 %v2117_v15  ;;  %v18180_v18 = vand.u32 4294901760, %v2553_v46 }
 0x334   :  { %16043 = vmatprep.subr.mxu0 %v18097_v48  ;;  %16067 = vmatprep.subr.mxu1 %v18097_v48  ;;  %v18228_v34 = vand.u32 4294901760, %v2681_v30 }
 0x335   :  { %16017 = vmatmul.mubr.f32.gmra.mxu0 %v18110_v63  ;;  %16041 = vmatmul.mubr.f32.gmra.mxu1 %v18100_v57  ;;  %v18197_v23 = vsub.f32 %v2553_v46, %v18180_v18 }
 0x336   :  { %16029 = vmatprep.mubr.f32.mxu0 %v18080_v21  ;;  %16053 = vmatprep.mubr.f32.mxu1 %v18080_v21 }
 0x337   :  { %v18211_v28 = vand.u32 4294901760, %v18197_v23 }
 0x339   :  { %16030 = vmatmul.mubr.f32.vlgmr.msra.gmra.mxu0 %v18112_v0  ;;  %16054 = vmatmul.mubr.f32.vlgmr.msra.gmra.mxu1 %v18112_v0 }
 0x33a   :  { %16032 = vmatprep.mubr.f32.mxu0 %v18114_v1  ;;  %16044 = vmatpush3.msra.mxu0 %v18097_v48 }
 0x33b   :  { %16056 = vmatprep.mubr.f32.mxu1 %v18114_v1  ;;  %16068 = vmatpush3.msra.mxu1 %v18097_v48 }
 0x33c   :  { %16059 = vmatprep.subr.mxu0 %v18103_v59  ;;  %16083 = vmatprep.subr.mxu1 %v18097_v48 }
 0x33d   :  { %16033 = vmatmul.mubr.f32.gmra.mxu0 %v18100_v57  ;;  %16057 = vmatmul.mubr.f32.gmra.mxu1 %v18100_v57 }
 0x33e   :  { %16045 = vmatprep.mubr.f32.mxu0 %v18094_v50  ;;  %16069 = vmatprep.mubr.f32.mxu1 %v18087_v33  ;;  %v2688_v33 = vsub.f32 %v18197_v23, %v18211_v28  ;;  %v15190_v50 = vld [vmem:[#allocation10] ss:$0 sm:$0xff] }
 0x341   :  { %16046 = vmatmul.mubr.f32.vlgmr.msra.gmra.mxu0 %v1473_v11  ;;  %16070 = vmatmul.mubr.f32.vlgmr.msra.gmra.mxu1 %v1471_v5 }
 0x342   :  { %16048 = vmatprep.mubr.f32.mxu0 %v1483_v12  ;;  %16060 = vmatpush3.msra.mxu0 %v18103_v59 }
 0x343   :  { %16072 = vmatprep.mubr.f32.mxu1 %v18130_v6  ;;  %16084 = vmatpush3.msra.mxu1 %v18097_v48 }
 0x344   :  { %16075 = vmatprep.subr.mxu0 %v18117_v2  ;;  %16102 = vmatprep.subr.mxu1 %v19923_v29 }
 0x345   :  { %16049 = vmatmul.mubr.f32.gmra.mxu0 %v1493_v16  ;;  %16073 = vmatmul.mubr.f32.gmra.mxu1 %v18133_v7 }
 0x346   :  { %16061 = vmatprep.mubr.f32.mxu0 %v18083_v27  ;;  %16085 = vmatprep.mubr.f32.mxu1 %v18080_v21  ;;  %v18241_v27 = vand.u32 4294901760, %v2688_v33 }
 0x349   :  { %16062 = vmatmul.mubr.f32.vlgmr.msra.gmra.mxu0 %v18120_v3  ;;  %16086 = vmatmul.mubr.f32.vlgmr.msra.gmra.mxu1 %v18112_v0 }
 0x34a   :  { %16064 = vmatprep.mubr.f32.mxu0 %v18123_v4  ;;  %16076 = vmatpush3.msra.mxu0 %v18117_v2 }
 0x34b   :  { %16088 = vmatprep.mubr.f32.mxu1 %v18114_v1  ;;  %16091 = vmatprep.subr.mxu0 %v19923_v29 }
 0x34c   :  { %16103 = vmatpush3.msra.mxu1 %v18228_v34 }
 0x34d   :  { %16065 = vmatmul.mubr.f32.gmra.mxu0 %v18110_v63  ;;  %16089 = vmatmul.mubr.f32.gmra.mxu1 %v18100_v57 }
 0x34e   :  { %16077 = vmatprep.mubr.f32.mxu0 %v18080_v21  ;;  %16104 = vmatprep.subr.mxu1 %v19923_v29 }
 0x34f   :  { %16105 = vmatpush3.msra.mxu1 %v18241_v27  ;;  %16110 = vmatprep.mubr.msk.f32.mxu1 %vm17801_vm10, %v19923_v29 }
 0x350   :  { %16106 = vmatprep.subr.mxu1 %v19923_v29 }
 0x351   :  { %16078 = vmatmul.mubr.f32.vlgmr.msra.gmra.mxu0 %v18112_v0  ;;  %16107 = vmatpush3.msra.mxu1 %v18248_v38 }
 0x352   :  { %16092 = vmatpush3.msra.mxu0 %v18166_v42  ;;  %16080 = vmatprep.mubr.f32.mxu0 %v18114_v1 }
 0x353   :  { %16093 = vmatprep.subr.mxu0 %v19923_v29  ;;  %16108 = vmatprep.subr.mxu1 %v19923_v29 }
 0x354   :  { %16094 = vmatpush3.msra.mxu0 %v18180_v18  ;;  %16109 = vmatpush3.msra.mxu1 %v18256_v39 }
 0x355   :  { %16095 = vmatprep.subr.mxu0 %v19923_v29  ;;  %16081 = vmatmul.mubr.f32.gmra.mxu0 %v18100_v57 }
 0x356   :  { %16096 = vmatpush3.msra.mxu0 %v18189_v20  ;;  %16099 = vmatprep.mubr.msk.f32.mxu0 %vm17801_vm10, %v19923_v29 }
 0x357   :  { %16097 = vmatprep.subr.mxu0 %v19923_v29  ;;  %16124 = vmatprep.subr.mxu1 %v19923_v29 }
 0x358   :  { %16098 = vmatpush3.msra.mxu0 %v18202_v25  ;;  %16111 = vmatmul.mubr.f32.vlgmr.msra.gmra.mxu1 %v19923_v29 }
 0x359   :  { %16113 = vmatprep.subr.mxu0 %v19923_v29  ;;  %16100 = vmatmul.mubr.f32.vlgmr.msra.gmra.mxu0 %v19923_v29 }
 0x35a   :  { %16114 = vmatpush3.msra.mxu0 %v18185_v19  ;;  %16125 = vmatpush3.msra.mxu1 %v18166_v42 }
 0x35b   :  { %16115 = vmatprep.subr.mxu0 %v19923_v29  ;;  %16126 = vmatprep.subr.mxu1 %v19923_v29 }
 0x35c   :  { %16116 = vmatpush3.msra.mxu0 %v18197_v23  ;;  %16127 = vmatpush3.msra.mxu1 %v18180_v18 }
 0x35d   :  { %16117 = vmatprep.subr.mxu0 %v19923_v29  ;;  %16128 = vmatprep.subr.mxu1 %v19923_v29 }
 0x35e   :  { %16118 = vmatpush3.msra.mxu0 %v18205_v26  ;;  %16129 = vmatpush3.msra.mxu1 %v18189_v20 }
 0x35f   :  { %16119 = vmatprep.subr.mxu0 %v19923_v29  ;;  %16130 = vmatprep.subr.mxu1 %v19923_v29 }
 0x360   :  { %16120 = vmatpush3.msra.mxu0 %v18218_v31  ;;  %16121 = vmatprep.mubr.msk.f32.mxu0 %vm17801_vm10, %v19923_v29 }
 0x361   :  { %16131 = vmatpush3.msra.mxu1 %v18202_v25  ;;  %16122 = vmatmul.mubr.f32.vlgmr.msra.gmra.mxu0 %v19923_v29 }
 0x362   :  { %16132 = vmatprep.mubr.msk.f32.mxu1 %vm17801_vm10, %v19923_v29  ;;  %16135 = vmatprep.subr.mxu0 %v19923_v29 }
 0x363   :  { %16146 = vmatprep.subr.mxu1 %v19923_v29  ;;  %16133 = vmatmul.mubr.f32.vlgmr.msra.gmra.mxu1 %v19923_v29 }
 0x364   :  { %16136 = vmatpush3.msra.mxu0 %v18200_v24  ;;  %16147 = vmatpush3.msra.mxu1 %v18166_v42 }
 0x365   :  { %16137 = vmatprep.subr.mxu0 %v19923_v29  ;;  %16148 = vmatprep.subr.mxu1 %v19923_v29 }
 0x366   :  { %16138 = vmatpush3.msra.mxu0 %v18211_v28  ;;  %16149 = vmatpush3.msra.mxu1 %v18180_v18 }
 0x367   :  { %16139 = vmatprep.subr.mxu0 %v19923_v29  ;;  %16150 = vmatprep.subr.mxu1 %v19923_v29 }
 0x368   :  { %16140 = vmatpush3.msra.mxu0 %v18222_v32  ;;  %16151 = vmatpush3.msra.mxu1 %v18189_v20 }
 0x369   :  { %16141 = vmatprep.subr.mxu0 %v19923_v29  ;;  %16152 = vmatprep.subr.mxu1 %v19923_v29 }
 0x36a   :  { %16142 = vmatpush3.msra.mxu0 %v18231_v35  ;;  %16143 = vmatprep.mubr.msk.f32.mxu0 %vm17801_vm10, %v19923_v29 }
 0x36b   :  { %16153 = vmatpush3.msra.mxu1 %v18202_v25  ;;  %16154 = vmatprep.mubr.msk.f32.mxu1 %vm17801_vm10, %v19923_v29 }
 0x36c   :  { %16144 = vmatmul.mubr.f32.vlgmr.msra.gmra.mxu0 %v19923_v29  ;;  %16155 = vmatmul.mubr.f32.vlgmr.msra.gmra.mxu1 %v19923_v29 }
 0x36d   :  { %16168 = vmatprep.subr.mxu1 %v19923_v29  ;;  %16157 = vmatprep.subr.mxu0 %v19923_v29 }
 0x36e   :  { %16169 = vmatpush3.msra.mxu1 %v18228_v34  ;;  %16176 = vmatprep.mubr.msk.f32.mxu1 %vm17801_vm10, %v19923_v29 }
 0x36f   :  { %16170 = vmatprep.subr.mxu1 %v19923_v29  ;;  %16158 = vmatpush3.msra.mxu0 %v18166_v42 }
 0x370   :  { %16171 = vmatpush3.msra.mxu1 %v18241_v27  ;;  %16159 = vmatprep.subr.mxu0 %v19923_v29 }
 0x371   :  { %16172 = vmatprep.subr.mxu1 %v19923_v29  ;;  %16160 = vmatpush3.msra.mxu0 %v18180_v18 }
 0x372   :  { %16173 = vmatpush3.msra.mxu1 %v18248_v38  ;;  %16161 = vmatprep.subr.mxu0 %v19923_v29 }
 0x373   :  { %16174 = vmatprep.subr.mxu1 %v19923_v29  ;;  %16162 = vmatpush3.msra.mxu0 %v18189_v20 }
 0x374   :  { %16175 = vmatpush3.msra.mxu1 %v18256_v39  ;;  %16163 = vmatprep.subr.mxu0 %v19923_v29 }
 0x375   :  { %16190 = vmatprep.subr.mxu1 %v19923_v29  ;;  %16164 = vmatpush3.msra.mxu0 %v18202_v25 }
 0x376   :  { %16165 = vmatprep.mubr.msk.f32.mxu0 %vm17801_vm10, %v19923_v29  ;;  %16179 = vmatprep.subr.mxu0 %v19923_v29 }
 0x3e1   :  { %v16007_v21 = vpop.f32.mrf.mxu1 }
 0x3e3   :  { %v1571_v43 = vpop.f32.mrf.mxu1 }
 0x3e5   :  { %v16010_v47 = vpop.f32.mrf.mxu1 }
 0x3e7   :  { %v1583_v49 = vpop.f32.mrf.mxu1 }
 0x3e9   :  { %v15999_v51 = vpop.f32.mrf.mxu0  ;;  %v16023_v13 = vpop.f32.mrf.mxu1 }
 0x3ea   :  { %v1476_v45 = vadd.f32 %v15999_v51, %v15190_v50  ;;  %v15191_v51 = vld [vmem:[#allocation14] ss:$0 sm:$0xff] }
 0x3eb   :  { %v1465_v48 = vpop.f32.mrf.mxu0  ;;  %v1758_v52 = vpop.f32.mrf.mxu1 }
 0x3ec   :  { %v1578_v53 = vadd.f32 %v16007_v21, %v1476_v45  ;;  %v1466_v60 = vadd.f32 %v15190_v50, %v1465_v48 }
 0x3ed   :  { %v16002_v54 = vpop.f32.mrf.mxu0  ;;  %v16026_v55 = vpop.f32.mrf.mxu1 }
 0x3ee   :  { %v1496_v56 = vadd.f32 %v16002_v54, %v15190_v50  ;;  %v1572_v3 = vadd.f32 %v1571_v43, %v1466_v60 }
 0x3ef   :  { %v1485_v57 = vpop.f32.mrf.mxu0  ;;  %v1774_v59 = vpop.f32.mrf.mxu1 }
 0x3f0   :  { %v1590_v58 = vadd.f32 %v16010_v47, %v1496_v56  ;;  %v1486_v2 = vadd.f32 %v15190_v50, %v1485_v57 }
 0x3f1   :  { %v16015_v61 = vpop.f32.mrf.mxu0  ;;  %v16039_v62 = vpop.f32.mrf.mxu1 }
 0x3f2   :  { %v1671_v63 = vadd.f32 %v16015_v61, %v1578_v53  ;;  %v1584_v11 = vadd.f32 %v1583_v49, %v1486_v2 }
 0x3f3   :  { %v1663_v0 = vpop.f32.mrf.mxu0  ;;  %v1946_v1 = vpop.f32.mrf.mxu1 }
 0x3f4   :  { %v1767_v4 = vadd.f32 %v16023_v13, %v1671_v63  ;;  %v1664_v7 = vadd.f32 %v1663_v0, %v1572_v3 }
 0x3f5   :  { %v16018_v5 = vpop.f32.mrf.mxu0  ;;  %v16042_v6 = vpop.f32.mrf.mxu1 }
 0x3f6   :  { %v1685_v8 = vadd.f32 %v16018_v5, %v1590_v58  ;;  %v1759_v46 = vadd.f32 %v1758_v52, %v1664_v7 }
 0x3f7   :  { %v1677_v9 = vpop.f32.mrf.mxu0  ;;  %v1958_v10 = vpop.f32.mrf.mxu1 }
 0x3f8   :  { %v1783_v12 = vadd.f32 %v16026_v55, %v1685_v8  ;;  %v1678_v16 = vadd.f32 %v1677_v9, %v1584_v11 }
 0x3f9   :  { %v16031_v14 = vpop.f32.mrf.mxu0  ;;  %v16055_v15 = vpop.f32.mrf.mxu1 }
 0x3fa   :  { %v1863_v44 = vadd.f32 %v16031_v14, %v1767_v4  ;;  %v1775_v47 = vadd.f32 %v1774_v59, %v1678_v16 }
 0x3fb   :  { %v1856_v17 = vpop.f32.mrf.mxu0  ;;  %v18341_v22 = vpop.f32.mrf.mxu1 }
 0x3fc   :  { %v18343_v30 = vadd.f32 %v16039_v62, %v1863_v44  ;;  %v1857_v33 = vadd.f32 %v1856_v17, %v1759_v46 }
 0x3fd   :  { %v16034_v36 = vpop.f32.mrf.mxu0  ;;  %v16058_v37 = vpop.f32.mrf.mxu1 }
 0x3fe   :  { %v18345_v21 = vadd.f32 %v1946_v1, %v1857_v33  ;;  %v1875_v43 = vadd.f32 %v16034_v36, %v1783_v12  ;;  %v3088_v13 = vrot.slane %v18343_v30, 6  ;;  %v7251_v45 = vrot.slane %v18343_v30, 1 }
 0x3ff   :  { %v1868_v50 = vpop.f32.mrf.mxu0  ;;  %v18347_v49 = vpop.f32.mrf.mxu1  ;;  %v7772_v54 = vrot.slane %v18343_v30, 2  ;;  %v8294_v58 = vrot.slane %v18343_v30, 3 }
 0x400   :  { %v1965_v48 = vadd.f32 %v16042_v6, %v1875_v43  ;;  %v1869_v52 = vadd.f32 %v1868_v50, %v1775_v47  ;;  %v3086_v53 = vrot.slane %v18345_v21, 1  ;;  %v3607_v57 = vrot.slane %v18345_v21, 2 }
 0x401   :  { %v16047_v55 = vpop.f32.mrf.mxu0  ;;  %v16071_v56 = vpop.f32.mrf.mxu1  ;;  %v4129_v59 = vrot.slane %v18345_v21, 3  ;;  %v4648_v60 = vrot.slane %v18345_v21, 4  ;;  %v5169_v0 = vrot.slane %v18345_v21, 5  ;;  %v5690_v3 = vrot.slane %v18345_v21, 6 }
 0x402   :  { %v1959_v61 = vadd.f32 %v1958_v10, %v1869_v52  ;;  %v2059_v62 = vadd.f32 %v16047_v55, %v15191_v51  ;;  %v18358_v63 = vsel %vm2562_vm11, %v3086_v53, %v3088_v13  ;;  %v6211_v4 = vrot.slane %v18345_v21, 7 }
 0x403   :  { %v2048_v1 = vpop.f32.mrf.mxu0  ;;  %v2341_v2 = vpop.f32.mrf.mxu1  ;;  %v7775_v5 = vrot.slane %v1965_v48, 7  ;;  %v18364_v6 = vsel %vm2562_vm11, %v8294_v58, %v1965_v48  ;;  %v8815_v10 = vrot.slane %v1965_v48, 1  ;;  %v8813_v43 = vrot.slane %v18343_v30, 4 }
 0x404   :  { %v2161_v7 = vadd.f32 %v16055_v15, %v2059_v62  ;;  %v3610_v8 = vrot.slane %v1959_v61, 7  ;;  %v18367_v9 = vsel %vm2562_vm11, %v4129_v59, %v1959_v61  ;;  %v4650_v14 = vrot.slane %v1959_v61, 1 }
 0x405   :  { %v16050_v11 = vpop.f32.mrf.mxu0  ;;  %v16074_v12 = vpop.f32.mrf.mxu1  ;;  %v5171_v16 = vrot.slane %v1959_v61, 2  ;;  %v5692_v44 = vrot.slane %v1959_v61, 3  ;;  %v6213_v46 = vrot.slane %v1959_v61, 4  ;;  %v6732_v36 = vrot.slane %v1959_v61, 5 }
 0x406   :  { %v2079_v17 = vadd.f32 %v16050_v11, %v15191_v51  ;;  %v18370_v33 = vsel %vm2562_vm11, %v3607_v57, %v3610_v8  ;;  %v18374_v50 = vsel %vm2562_vm11, %v4648_v60, %v4650_v14  ;;  %v2049_v55 = vadd.f32 %v15191_v51, %v2048_v1 }
 0x407   :  { %v2068_v47 = vpop.f32.mrf.mxu0  ;;  %v2357_v15 = vpop.f32.mrf.mxu1  ;;  %v18377_v13 = vsel %vm2562_vm11, %v5169_v0, %v5171_v16  ;;  %v18380_v52 = vsel %vm2562_vm11, %v5690_v3, %v5692_v44  ;;  %v18383_v53 = vsel %vm2562_vm11, %v6211_v4, %v6213_v46  ;;  %v18387_v59 = vsel %vm2562_vm11, %v18343_v30, %v6732_v36 }
 0x408   :  { %v2173_v57 = vadd.f32 %v16058_v37, %v2079_v17  ;;  %v7253_v58 = vrot.slane %v1959_v61, 6  ;;  %v19925_v60 = vrot.slane %v18343_v30, 5  ;;  %v18391_v8 = vsel %vm2562_vm11, %v7772_v54, %v7775_v5 }
 0x409   :  { %v16063_v62 = vpop.f32.mrf.mxu0  ;;  %v18394_v0 = vsel %vm2562_vm11, %v8813_v43, %v8815_v10  ;;  %v9334_v3 = vrot.slane %v1965_v48, 2  ;;  %v16087_v4 = vpop.f32.mrf.mxu1  ;;  %v2069_v14 = vadd.f32 %v15191_v51, %v2068_v47  ;;  %v2155_v16 = vadd.f32 %v18341_v22, %v2049_v55 }
 0x40a   :  { %v2254_v11 = vadd.f32 %v16063_v62, %v2161_v7  ;;  %v18397_v1 = vsel %vm2562_vm11, %v7251_v45, %v7253_v58 }
 0x40b   :  { %v2246_v37 = vpop.f32.mrf.mxu0  ;;  %v18402_v61 = vsel %vm2562_vm11, %v19925_v60, %v9334_v3  ;;  %v2529_v10 = vpop.f32.mrf.mxu1  ;;  %v2167_v7 = vadd.f32 %v18347_v49, %v2069_v14 }
 0x40c   :  { %v2350_v54 = vadd.f32 %v16071_v56, %v2254_v11  ;;  %v2247_v44 = vadd.f32 %v2246_v37, %v2155_v16 }
 0x40d   :  { %v16066_v5 = vpop.f32.mrf.mxu0  ;;  %v16090_v36 = vpop.f32.mrf.mxu1 }
 0x40e   :  { %v2268_v46 = vadd.f32 %v16066_v5, %v2173_v57  ;;  %v2342_v62 = vadd.f32 %v2341_v2, %v2247_v44  ;;  %v18410_v2 = vld [vmem:[#allocation11] ss:$0 sm:$0xff] }
 0x40f   :  { %v2260_v48 = vpop.f32.mrf.mxu0  ;;  %v2541_v47 = vpop.f32.mrf.mxu1 }
 0x410   :  { %v2366_v17 = vadd.f32 %v16074_v12, %v2268_v46  ;;  %v2261_v43 = vadd.f32 %v2260_v48, %v2167_v7 }
 0x411   :  { %v16079_v45 = vpop.f32.mrf.mxu0 }
 0x412   :  { %v2446_v58 = vadd.f32 %v16079_v45, %v2350_v54  ;;  %v2358_v56 = vadd.f32 %v2357_v15, %v2261_v43 }
 0x413   :  { %v2439_v29 = vpop.f32.mrf.mxu0 }
 0x414   :  { %v2536_v3 = vadd.f32 %v16087_v4, %v2446_v58  ;;  %v2440_v60 = vadd.f32 %v2439_v29, %v2342_v62 }
 0x415   :  { %v16082_v51 = vpop.f32.mrf.mxu0 }
 0x416   :  { %v2458_v22 = vadd.f32 %v16082_v51, %v2366_v17  ;;  %v18406_v11 = vadd.f32 %v2529_v10, %v2440_v60  ;;  %v11365_v4 = vrot.slane %v2536_v3, 7  ;;  %v11862_v44 = vrot.slane %v2536_v3, 2 }
 0x417   :  { %v2451_v55 = vpop.f32.mrf.mxu0  ;;  %v11867_v15 = vrot.slane %v2536_v3, 1  ;;  %v12364_v46 = vrot.slane %v2536_v3, 4  ;;  %v12368_v60 = vrot.slane %v2536_v3, 3 }
 0x418   :  { %v2548_v57 = vadd.f32 %v16090_v36, %v2458_v22  ;;  %v2452_v37 = vadd.f32 %v2451_v55, %v2358_v56  ;;  %v2740_v16 = vpop.f32.mrf.mxu1  ;;  %v10362_v10 = vrot.slane %v18406_v11, 4  ;;  %v10366_v7 = vrot.slane %v18406_v11, 3 }
 0x419   :  { %v2649_v49 = vpop.f32.mrf.mxu0  ;;  %v10861_v17 = vrot.slane %v18406_v11, 6  ;;  %v10865_v43 = vrot.slane %v18406_v11, 5 }
 0x41a   :  { %v11865_v12 = vrot.slane %v2548_v57, 7  ;;  %v12366_v14 = vrot.slane %v2548_v57, 1  ;;  %v18408_v54 = vadd.f32 %v2541_v47, %v2452_v37  ;;  %v16112_v29 = vpop.f32.mrf.mxu1  ;;  %v2650_v45 = vadd.f32 %v18410_v2, %v2649_v49 }
 0x41b   :  { %v16101_v5 = vpop.f32.mrf.mxu0 }
 0x41c   :  { %v10364_v48 = vrot.slane %v18408_v54, 1  ;;  %v10863_v36 = vrot.slane %v18408_v54, 3  ;;  %v11362_v58 = vrot.slane %v18408_v54, 5  ;;  %v10867_v51 = vrot.slane %v18408_v54, 2 }
 0x41d   :  { %v11871_v47 = vsel %vm2562_vm11, %v11862_v44, %v11865_v12  ;;  %v12370_v22 = vsel %vm2562_vm11, %v12364_v46, %v12366_v14  ;;  %v11367_v37 = vrot.slane %v18408_v54, 4 }
 0x41e   :  { %v10368_v62 = vsel %vm2562_vm11, %v10362_v10, %v10364_v48  ;;  %v10869_v55 = vsel %vm2562_vm11, %v10861_v17, %v10863_v36  ;;  %v11369_v49 = vsel %vm2562_vm11, %v2536_v3, %v11362_v58  ;;  %v11869_v48 = vrot.slane %v2548_v57, 6 }
 0x41f   :  { %v10369_v56 = vsel %vm9864_vm12, %v10368_v62, %v10366_v7  ;;  %v10870_v5 = vsel %vm9864_vm12, %v10869_v55, %v10865_v43  ;;  %v11370_v10 = vsel %vm9864_vm12, %v11369_v49, %v11365_v4  ;;  %v11872_v46 = vsel %vm9864_vm12, %v11871_v47, %v11867_v15 }
 0x420   :  { %v18430_v29 = vsel %vm9866_vm13, %v10369_v56, %v18408_v54  ;;  %v18435_v14 = vsel %vm9866_vm13, %v10870_v5, %v10867_v51  ;;  %v18438_v44 = vsel %vm9866_vm13, %v11370_v10, %v11367_v37  ;;  %v12371_v3 = vsel %vm9864_vm12, %v12370_v22, %v12368_v60 }
 0x421   :  { %v2820_v12 = vpop.f32.mrf.mxu0  ;;  %v18443_v7 = vsel %vm9866_vm13, %v11872_v46, %v11869_v48  ;;  %v18446_v17 = vsel %vm9866_vm13, %v12371_v3, %v2548_v57  ;;  %v2741_v43 = vadd.f32 %v2740_v16, %v2650_v45  ;;  %v19932_v60 = vrot.slane %v18343_v30, 5 }
 0x423   :  { %v2897_v36 = vpop.f32.mrf.mxu1  ;;  %v16123_v4 = vpop.f32.mrf.mxu0  ;;  %v2821_v62 = vadd.f32 %v2820_v12, %v2741_v43  ;;  %v2563_v57 = vsel %vm2562_vm11, %v18345_v21, %v19932_v60 }
 0x425   :  { %v16134_v58 = vpop.f32.mrf.mxu1  ;;  %v2898_v51 = vadd.f32 %v2897_v36, %v2821_v62 }
 0x42c   :  { %v2980_v56 = vpop.f32.mrf.mxu0  ;;  %v3055_v55 = vpop.f32.mrf.mxu1 }
 0x42d   :  { %v2981_v37 = vadd.f32 %v2980_v56, %v2898_v51 }
 0x42e   :  { %v16145_v49 = vpop.f32.mrf.mxu0  ;;  %v16156_v5 = vpop.f32.mrf.mxu1 }
 0x42f   :  { %v3056_v15 = vadd.f32 %v3055_v55, %v2981_v37  ;;  %v19933_v37 = vmov 0.0  }
 0x431   :  { %3067 = vrot.lane.b32.xlu0 %v3056_v15, %s17789_s19  ;;  %v3059_v47 = vadd.f32 %v3056_v15, %v2563_v57 }
 0x433   :  { %v15193_v22 = vmul.f32 -1.442695, %v3059_v47 }
 0x435   :  { %17453 = vpow2.f32 %v15193_v22 }
 0x442   :  { %v17454_v16 = vpop.eup %17453 }
 0x443   :  { %v3063_v45 = vadd.f32 1.0, %v17454_v16 }
 0x445   :  { %17455 = vrcp.f32 %v3063_v45 }
 0x452   :  { %v17456_v10 = vpop.eup %17455 }
 0x453   :  { %v3077_v30 = vsub.f32 1.0, %v17456_v10  ;;  %v3083_v4 = vmul.f32 0.0, %v17456_v10 }
 0x4a3   :  { %v3068_v48 = vpop.permute.xlu0 %3067 }
 0x4a4   :  { %v3070_v12 = vmul.f32 %v17456_v10, %v3068_v48 }
 0x4a6   :  { %3072 = vrot.lane.b32.xlu1 %v3070_v12, %s17789_s19 }
 0x518   :  { %v3073_v46 = vpop.permute.xlu1 %3072 }
 0x519   :  { %v3075_v3 = vadd.f32 %v3073_v46, %v2563_v57 }
 0x51b   :  { %17457 = vtanh.f32 %v3075_v3 }
 0x528   :  { %v17458_v36 = vpop.eup %17457 }
 0x529   :  { %3079 = vrot.lane.b32.xlu0 %v17458_v36, %s17802_s5 }
 0x59b   :  { %v3080_v21 = vpop.permute.xlu0 %3079 }
 0x59c   :  { %v3082_v43 = vmul.f32 %v3080_v21, %v3077_v30 }
 0x59e   :  { %v18455_v58 = vadd.f32 %v3083_v4, %v3082_v43 }
 0x5a0   :  { %3092 = vrot.lane.b32.xlu1 %v18455_v58, %s17802_s5 }
 0x612   :  { %v3093_v62 = vpop.permute.xlu1 %3092 }
 0x613   :  { %v3094_v51 = vsel %vm2570_vm14, %v3093_v62, 0 }
 0x614   :  { %v3165_v56 = vand.u32 4294901760, %v3094_v51 }
 0x616   :  { %v3166_v55 = vsub.f32 %v3094_v51, %v3165_v56  ;;  %16177 = vmatmul.mubr.f32.vlgmr.msra.gmra.mxu1 %v3165_v56 }
 0x617   :  { %16191 = vmatpush3.msra.mxu1 %v18166_v42  ;;  %16198 = vmatprep.mubr.msk.f32.mxu1 %vm17801_vm10, %v19933_v37 }
 0x618   :  { %v3167_v49 = vand.u32 4294901760, %v3166_v55  ;;  %16192 = vmatprep.subr.mxu1 %v19933_v37 }
 0x619   :  { %16193 = vmatpush3.msra.mxu1 %v18180_v18 }
 0x61a   :  { %v3168_v5 = vsub.f32 %v3166_v55, %v3167_v49  ;;  %16194 = vmatprep.subr.mxu1 %v19933_v37 }
 0x61b   :  { %16195 = vmatpush3.msra.mxu1 %v18189_v20 }
 0x61c   :  { %v3169_v15 = vand.u32 4294901760, %v3168_v5  ;;  %16196 = vmatprep.subr.mxu1 %v19933_v37 }
 0x61d   :  { %16197 = vmatpush3.msra.mxu1 %v18202_v25 }
 0x61e   :  { %16199 = vmatmul.mubr.f32.vlgmr.msra.gmra.mxu1 %v3167_v49  ;;  %16212 = vmatprep.subr.mxu1 %v19933_v37 }
 0x61f   :  { %16166 = vmatmul.mubr.f32.vlgmr.msra.gmra.mxu0 %v3169_v15  ;;  %16213 = vmatpush3.msra.mxu1 %v18166_v42 }
 0x620   :  { %16180 = vmatpush3.msra.mxu0 %v18185_v19  ;;  %16214 = vmatprep.subr.mxu1 %v19933_v37 }
 0x621   :  { %16181 = vmatprep.subr.mxu0 %v19933_v37  ;;  %16215 = vmatpush3.msra.mxu1 %v18180_v18 }
 0x622   :  { %16182 = vmatpush3.msra.mxu0 %v18197_v23  ;;  %16216 = vmatprep.subr.mxu1 %v19933_v37 }
 0x623   :  { %16183 = vmatprep.subr.mxu0 %v19933_v37  ;;  %16217 = vmatpush3.msra.mxu1 %v18189_v20 }
 0x624   :  { %16184 = vmatpush3.msra.mxu0 %v18205_v26  ;;  %16218 = vmatprep.subr.mxu1 %v19933_v37 }
 0x625   :  { %16185 = vmatprep.subr.mxu0 %v19933_v37  ;;  %16187 = vmatprep.mubr.msk.f32.mxu0 %vm17801_vm10, %v19933_v37 }
 0x626   :  { %16186 = vmatpush3.msra.mxu0 %v18218_v31  ;;  %16219 = vmatpush3.msra.mxu1 %v18202_v25 }
 0x627   :  { %16220 = vmatprep.mubr.msk.f32.mxu1 %vm17801_vm10, %v19933_v37  ;;  %16188 = vmatmul.mubr.f32.vlgmr.msra.gmra.mxu0 %v3166_v55 }
 0x628   :  { %16201 = vmatprep.subr.mxu0 %v19933_v37  ;;  %16221 = vmatmul.mubr.f32.vlgmr.msra.gmra.mxu1 %v3165_v56 }
 0x629   :  { %16202 = vmatpush3.msra.mxu0 %v18200_v24  ;;  %16209 = vmatprep.mubr.msk.f32.mxu0 %vm17801_vm10, %v19933_v37 }
 0x62a   :  { %16203 = vmatprep.subr.mxu0 %v19933_v37  ;;  %16234 = vmatprep.subr.mxu1 %v19933_v37 }
 0x62b   :  { %16204 = vmatpush3.msra.mxu0 %v18211_v28  ;;  %16235 = vmatpush3.msra.mxu1 %v18228_v34 }
 0x62c   :  { %16205 = vmatprep.subr.mxu0 %v19933_v37  ;;  %16236 = vmatprep.subr.mxu1 %v19933_v37 }
 0x62d   :  { %16206 = vmatpush3.msra.mxu0 %v18222_v32  ;;  %16237 = vmatpush3.msra.mxu1 %v18241_v27 }
 0x62e   :  { %16207 = vmatprep.subr.mxu0 %v19933_v37  ;;  %16238 = vmatprep.subr.mxu1 %v19933_v37 }
 0x62f   :  { %16208 = vmatpush3.msra.mxu0 %v18231_v35  ;;  %16239 = vmatpush3.msra.mxu1 %v18248_v38 }
 0x630   :  { %16210 = vmatmul.mubr.f32.vlgmr.msra.gmra.mxu0 %v3165_v56  ;;  %16240 = vmatprep.subr.mxu1 %v19933_v37 }
 0x631   :  { %16241 = vmatpush3.msra.mxu1 %v18256_v39  ;;  %16223 = vmatprep.subr.mxu0 %v19933_v37 }
 0x632   :  { %16242 = vmatprep.mubr.msk.f32.mxu1 %vm17801_vm10, %v19933_v37  ;;  %16256 = vmatprep.subr.mxu1 %v19933_v37 }
 0x633   :  { %16224 = vmatpush3.msra.mxu0 %v18166_v42  ;;  %16231 = vmatprep.mubr.msk.f32.mxu0 %vm17801_vm10, %v19933_v37 }
 0x634   :  { %16225 = vmatprep.subr.mxu0 %v19933_v37 }
 0x635   :  { %16226 = vmatpush3.msra.mxu0 %v18180_v18 }
 0x636   :  { %16227 = vmatprep.subr.mxu0 %v19933_v37 }
 0x637   :  { %16228 = vmatpush3.msra.mxu0 %v18189_v20 }
 0x638   :  { %16229 = vmatprep.subr.mxu0 %v19933_v37 }
 0x639   :  { %16230 = vmatpush3.msra.mxu0 %v18202_v25 }
 0x63a   :  { %16245 = vmatprep.subr.mxu0 %v19933_v37 }
 0x6d6   :  { %v3262_v60 = vpop.f32.mrf.mxu1 }
 0x6d8   :  { %v16178_v57 = vpop.f32.mrf.mxu1 }
 0x6de   :  { %v3419_v47 = vpop.f32.mrf.mxu1 }
 0x6df   :  { %v3171_v22 = vpop.f32.mrf.mxu0 }
 0x6e0   :  { %v16200_v16 = vpop.f32.mrf.mxu1  ;;  %v3172_v10 = vadd.f32 %v18410_v2, %v3171_v22 }
 0x6e1   :  { %v16167_v45 = vpop.f32.mrf.mxu0 }
 0x6e2   :  { %v3263_v46 = vadd.f32 %v3262_v60, %v3172_v10 }
 0x6e7   :  { %v3342_v48 = vpop.f32.mrf.mxu0 }
 0x6e8   :  { %v3577_v12 = vpop.f32.mrf.mxu1  ;;  %v3343_v30 = vadd.f32 %v3342_v48, %v3263_v46 }
 0x6e9   :  { %v16189_v3 = vpop.f32.mrf.mxu0 }
 0x6ea   :  { %v16222_v36 = vpop.f32.mrf.mxu1  ;;  %v3420_v21 = vadd.f32 %v3419_v47, %v3343_v30 }
 0x6f0   :  { %v3502_v4 = vpop.f32.mrf.mxu0 }
 0x6f1   :  { %v3503_v43 = vadd.f32 %v3502_v4, %v3420_v21 }
 0x6f2   :  { %v16211_v62 = vpop.f32.mrf.mxu0 }
 0x6f3   :  { %v3578_v51 = vadd.f32 %v3577_v12, %v3503_v43 }
 0x6f5   :  { %3589 = vrot.lane.b32.xlu0 %v3578_v51, %s17789_s19  ;;  %v3581_v56 = vadd.f32 %v3578_v51, %v18358_v63 }
 0x6f7   :  { %v15194_v55 = vmul.f32 -1.442695, %v3581_v56 }
 0x6f9   :  { %17459 = vpow2.f32 %v15194_v55 }
 0x706   :  { %v17460_v49 = vpop.eup %17459 }
 0x707   :  { %v3585_v5 = vadd.f32 1.0, %v17460_v49 }
 0x709   :  { %17461 = vrcp.f32 %v3585_v5 }
 0x716   :  { %v17462_v15 = vpop.eup %17461 }
 0x717   :  { %v3599_v45 = vsub.f32 1.0, %v17462_v15  ;;  %v3605_v48 = vmul.f32 %v17462_v15, %v18455_v58 }
 0x767   :  { %v3590_v57 = vpop.permute.xlu0 %3589 }
 0x768   :  { %v3592_v60 = vmul.f32 %v17462_v15, %v3590_v57 }
 0x76a   :  { %3594 = vrot.lane.b32.xlu1 %v3592_v60, %s17789_s19 }
 0x7dc   :  { %v3595_v22 = vpop.permute.xlu1 %3594 }
 0x7dd   :  { %v3597_v47 = vadd.f32 %v3595_v22, %v18358_v63 }
 0x7df   :  { %17463 = vtanh.f32 %v3597_v47 }
 0x7ec   :  { %v17464_v16 = vpop.eup %17463 }
 0x7ed   :  { %3601 = vrot.lane.b32.xlu0 %v17464_v16, %s17802_s5 }
 0x85f   :  { %v3602_v10 = vpop.permute.xlu0 %3601 }
 0x860   :  { %v3604_v12 = vmul.f32 %v3602_v10, %v3599_v45 }
 0x862   :  { %v18527_v46 = vadd.f32 %v3605_v48, %v3604_v12 }
 0x864   :  { %3614 = vrot.lane.b32.xlu1 %v18527_v46, %s17802_s5 }
 0x8d6   :  { %v3615_v3 = vpop.permute.xlu1 %3614 }
 0x8d7   :  { %v3616_v36 = vsel %vm2570_vm14, %v3615_v3, 0 }
 0x8d8   :  { %v3687_v30 = vand.u32 4294901760, %v3616_v36 }
 0x8da   :  { %v3688_v21 = vsub.f32 %v3616_v36, %v3687_v30  ;;  %16243 = vmatmul.mubr.f32.vlgmr.msra.gmra.mxu1 %v3687_v30 }
 0x8db   :  { %16257 = vmatpush3.msra.mxu1 %v18166_v42  ;;  %16264 = vmatprep.mubr.msk.f32.mxu1 %vm17801_vm10, %v19933_v37 }
 0x8dc   :  { %v3689_v63 = vand.u32 4294901760, %v3688_v21  ;;  %16258 = vmatprep.subr.mxu1 %v19933_v37 }
 0x8dd   :  { %16259 = vmatpush3.msra.mxu1 %v18180_v18 }
 0x8de   :  { %v3690_v58 = vsub.f32 %v3688_v21, %v3689_v63  ;;  %16260 = vmatprep.subr.mxu1 %v19933_v37 }
 0x8df   :  { %16261 = vmatpush3.msra.mxu1 %v18189_v20 }
 0x8e0   :  { %v3691_v4 = vand.u32 4294901760, %v3690_v58  ;;  %16262 = vmatprep.subr.mxu1 %v19933_v37 }
 0x8e1   :  { %16263 = vmatpush3.msra.mxu1 %v18202_v25 }
 0x8e2   :  { %16265 = vmatmul.mubr.f32.vlgmr.msra.gmra.mxu1 %v3689_v63  ;;  %16278 = vmatprep.subr.mxu1 %v19933_v37 }
 0x8e3   :  { %16232 = vmatmul.mubr.f32.vlgmr.msra.gmra.mxu0 %v3691_v4  ;;  %16279 = vmatpush3.msra.mxu1 %v18166_v42 }
 0x8e4   :  { %16246 = vmatpush3.msra.mxu0 %v18185_v19  ;;  %16280 = vmatprep.subr.mxu1 %v19933_v37 }
 0x8e5   :  { %16247 = vmatprep.subr.mxu0 %v19933_v37  ;;  %16281 = vmatpush3.msra.mxu1 %v18180_v18 }
 0x8e6   :  { %16248 = vmatpush3.msra.mxu0 %v18197_v23  ;;  %16282 = vmatprep.subr.mxu1 %v19933_v37 }
 0x8e7   :  { %16249 = vmatprep.subr.mxu0 %v19933_v37  ;;  %16283 = vmatpush3.msra.mxu1 %v18189_v20 }
 0x8e8   :  { %16250 = vmatpush3.msra.mxu0 %v18205_v26  ;;  %16284 = vmatprep.subr.mxu1 %v19933_v37 }
 0x8e9   :  { %16251 = vmatprep.subr.mxu0 %v19933_v37  ;;  %16253 = vmatprep.mubr.msk.f32.mxu0 %vm17801_vm10, %v19933_v37 }
 0x8ea   :  { %16252 = vmatpush3.msra.mxu0 %v18218_v31  ;;  %16285 = vmatpush3.msra.mxu1 %v18202_v25 }
 0x8eb   :  { %16286 = vmatprep.mubr.msk.f32.mxu1 %vm17801_vm10, %v19933_v37  ;;  %16254 = vmatmul.mubr.f32.vlgmr.msra.gmra.mxu0 %v3688_v21 }
 0x8ec   :  { %16267 = vmatprep.subr.mxu0 %v19933_v37  ;;  %16287 = vmatmul.mubr.f32.vlgmr.msra.gmra.mxu1 %v3687_v30 }
 0x8ed   :  { %16268 = vmatpush3.msra.mxu0 %v18200_v24  ;;  %16275 = vmatprep.mubr.msk.f32.mxu0 %vm17801_vm10, %v19933_v37 }
 0x8ee   :  { %16269 = vmatprep.subr.mxu0 %v19933_v37  ;;  %16300 = vmatprep.subr.mxu1 %v19933_v37 }
 0x8ef   :  { %16270 = vmatpush3.msra.mxu0 %v18211_v28  ;;  %16301 = vmatpush3.msra.mxu1 %v18228_v34 }
 0x8f0   :  { %16271 = vmatprep.subr.mxu0 %v19933_v37  ;;  %16302 = vmatprep.subr.mxu1 %v19933_v37 }
 0x8f1   :  { %16272 = vmatpush3.msra.mxu0 %v18222_v32  ;;  %16303 = vmatpush3.msra.mxu1 %v18241_v27 }
 0x8f2   :  { %16273 = vmatprep.subr.mxu0 %v19933_v37  ;;  %16304 = vmatprep.subr.mxu1 %v19933_v37 }
 0x8f3   :  { %16274 = vmatpush3.msra.mxu0 %v18231_v35  ;;  %16305 = vmatpush3.msra.mxu1 %v18248_v38 }
 0x8f4   :  { %16276 = vmatmul.mubr.f32.vlgmr.msra.gmra.mxu0 %v3687_v30  ;;  %16306 = vmatprep.subr.mxu1 %v19933_v37 }
 0x8f5   :  { %16307 = vmatpush3.msra.mxu1 %v18256_v39  ;;  %16289 = vmatprep.subr.mxu0 %v19933_v37 }
 0x8f6   :  { %16308 = vmatprep.mubr.msk.f32.mxu1 %vm17801_vm10, %v19933_v37  ;;  %16322 = vmatprep.subr.mxu1 %v19933_v37 }
 0x8f7   :  { %16290 = vmatpush3.msra.mxu0 %v18166_v42  ;;  %16297 = vmatprep.mubr.msk.f32.mxu0 %vm17801_vm10, %v19933_v37 }
 0x8f8   :  { %16291 = vmatprep.subr.mxu0 %v19933_v37 }
 0x8f9   :  { %16292 = vmatpush3.msra.mxu0 %v18180_v18 }
 0x8fa   :  { %16293 = vmatprep.subr.mxu0 %v19933_v37 }
 0x8fb   :  { %16294 = vmatpush3.msra.mxu0 %v18189_v20 }
 0x8fc   :  { %16295 = vmatprep.subr.mxu0 %v19933_v37 }
 0x8fd   :  { %16296 = vmatpush3.msra.mxu0 %v18202_v25 }
 0x8fe   :  { %16311 = vmatprep.subr.mxu0 %v19933_v37 }
 0x99a   :  { %v3784_v43 = vpop.f32.mrf.mxu1 }
 0x99c   :  { %v16244_v62 = vpop.f32.mrf.mxu1 }
 0x9a2   :  { %v3941_v51 = vpop.f32.mrf.mxu1 }
 0x9a3   :  { %v3693_v56 = vpop.f32.mrf.mxu0 }
 0x9a4   :  { %v16266_v55 = vpop.f32.mrf.mxu1  ;;  %v3694_v5 = vadd.f32 %v18410_v2, %v3693_v56 }
 0x9a5   :  { %v16233_v49 = vpop.f32.mrf.mxu0 }
 0x9a6   :  { %v3785_v60 = vadd.f32 %v3784_v43, %v3694_v5 }
 0x9ab   :  { %v3864_v15 = vpop.f32.mrf.mxu0 }
 0x9ac   :  { %v4099_v57 = vpop.f32.mrf.mxu1  ;;  %v3865_v16 = vadd.f32 %v3864_v15, %v3785_v60 }
 0x9ad   :  { %v16255_v22 = vpop.f32.mrf.mxu0 }
 0x9ae   :  { %v16288_v47 = vpop.f32.mrf.mxu1  ;;  %v3942_v45 = vadd.f32 %v3941_v51, %v3865_v16 }
 0x9b4   :  { %v4024_v10 = vpop.f32.mrf.mxu0 }
 0x9b5   :  { %v4025_v48 = vadd.f32 %v4024_v10, %v3942_v45 }
 0x9b6   :  { %v16277_v12 = vpop.f32.mrf.mxu0 }
 0x9b7   :  { %v4100_v3 = vadd.f32 %v4099_v57, %v4025_v48 }
 0x9b9   :  { %4111 = vrot.lane.b32.xlu0 %v4100_v3, %s17789_s19  ;;  %v4103_v36 = vadd.f32 %v4100_v3, %v18370_v33 }
 0x9bb   :  { %v15195_v30 = vmul.f32 -1.442695, %v4103_v36 }
 0x9bd   :  { %17465 = vpow2.f32 %v15195_v30 }
 0x9ca   :  { %v17466_v21 = vpop.eup %17465 }
 0x9cb   :  { %v4107_v63 = vadd.f32 1.0, %v17466_v21 }
 0x9cd   :  { %17467 = vrcp.f32 %v4107_v63 }
 0x9da   :  { %v17468_v58 = vpop.eup %17467 }
 0x9db   :  { %v4121_v55 = vsub.f32 1.0, %v17468_v58  ;;  %v4127_v5 = vmul.f32 %v17468_v58, %v18527_v46 }
 0xa2b   :  { %v4112_v4 = vpop.permute.xlu0 %4111 }
 0xa2c   :  { %v4114_v43 = vmul.f32 %v17468_v58, %v4112_v4 }
 0xa2e   :  { %4116 = vrot.lane.b32.xlu1 %v4114_v43, %s17789_s19 }
 0xaa0   :  { %v4117_v62 = vpop.permute.xlu1 %4116 }
 0xaa1   :  { %v4119_v51 = vadd.f32 %v4117_v62, %v18370_v33 }
 0xaa3   :  { %17469 = vtanh.f32 %v4119_v51 }
 0xab0   :  { %v17470_v56 = vpop.eup %17469 }
 0xab1   :  { %4123 = vrot.lane.b32.xlu0 %v17470_v56, %s17802_s5 }
 0xb23   :  { %v4124_v49 = vpop.permute.xlu0 %4123 }
 0xb24   :  { %v4126_v15 = vmul.f32 %v4124_v49, %v4121_v55 }
 0xb26   :  { %v18599_v57 = vadd.f32 %v4127_v5, %v4126_v15 }
 0xb28   :  { %4133 = vrot.lane.b32.xlu1 %v18599_v57, %s17802_s5 }
 0xb9a   :  { %v4134_v60 = vpop.permute.xlu1 %4133 }
 0xb9b   :  { %v4135_v22 = vsel %vm2570_vm14, %v4134_v60, 0 }
 0xb9c   :  { %v4206_v47 = vand.u32 4294901760, %v4135_v22 }
 0xb9e   :  { %v4207_v16 = vsub.f32 %v4135_v22, %v4206_v47  ;;  %16309 = vmatmul.mubr.f32.vlgmr.msra.gmra.mxu1 %v4206_v47 }
 0xb9f   :  { %16323 = vmatpush3.msra.mxu1 %v18166_v42  ;;  %16330 = vmatprep.mubr.msk.f32.mxu1 %vm17801_vm10, %v19933_v37 }
 0xba0   :  { %v4208_v33 = vand.u32 4294901760, %v4207_v16  ;;  %16324 = vmatprep.subr.mxu1 %v19933_v37 }
 0xba1   :  { %16325 = vmatpush3.msra.mxu1 %v18180_v18 }
 0xba2   :  { %v4209_v46 = vsub.f32 %v4207_v16, %v4208_v33  ;;  %16326 = vmatprep.subr.mxu1 %v19933_v37 }
 0xba3   :  { %16327 = vmatpush3.msra.mxu1 %v18189_v20 }
 0xba4   :  { %v4210_v45 = vand.u32 4294901760, %v4209_v46  ;;  %16328 = vmatprep.subr.mxu1 %v19933_v37 }
 0xba5   :  { %16329 = vmatpush3.msra.mxu1 %v18202_v25 }
 0xba6   :  { %16331 = vmatmul.mubr.f32.vlgmr.msra.gmra.mxu1 %v4208_v33  ;;  %16344 = vmatprep.subr.mxu1 %v19933_v37 }
 0xba7   :  { %16298 = vmatmul.mubr.f32.vlgmr.msra.gmra.mxu0 %v4210_v45  ;;  %16345 = vmatpush3.msra.mxu1 %v18166_v42 }
 0xba8   :  { %16312 = vmatpush3.msra.mxu0 %v18185_v19  ;;  %16346 = vmatprep.subr.mxu1 %v19933_v37 }
 0xba9   :  { %16313 = vmatprep.subr.mxu0 %v19933_v37  ;;  %16347 = vmatpush3.msra.mxu1 %v18180_v18 }
 0xbaa   :  { %16314 = vmatpush3.msra.mxu0 %v18197_v23  ;;  %16348 = vmatprep.subr.mxu1 %v19933_v37 }
 0xbab   :  { %16315 = vmatprep.subr.mxu0 %v19933_v37  ;;  %16349 = vmatpush3.msra.mxu1 %v18189_v20 }
 0xbac   :  { %16316 = vmatpush3.msra.mxu0 %v18205_v26  ;;  %16350 = vmatprep.subr.mxu1 %v19933_v37 }
 0xbad   :  { %16317 = vmatprep.subr.mxu0 %v19933_v37  ;;  %16319 = vmatprep.mubr.msk.f32.mxu0 %vm17801_vm10, %v19933_v37 }
 0xbae   :  { %16318 = vmatpush3.msra.mxu0 %v18218_v31  ;;  %16351 = vmatpush3.msra.mxu1 %v18202_v25 }
 0xbaf   :  { %16352 = vmatprep.mubr.msk.f32.mxu1 %vm17801_vm10, %v19933_v37  ;;  %16320 = vmatmul.mubr.f32.vlgmr.msra.gmra.mxu0 %v4207_v16 }
 0xbb0   :  { %16333 = vmatprep.subr.mxu0 %v19933_v37  ;;  %16353 = vmatmul.mubr.f32.vlgmr.msra.gmra.mxu1 %v4206_v47 }
 0xbb1   :  { %16334 = vmatpush3.msra.mxu0 %v18200_v24  ;;  %16341 = vmatprep.mubr.msk.f32.mxu0 %vm17801_vm10, %v19933_v37 }
 0xbb2   :  { %16335 = vmatprep.subr.mxu0 %v19933_v37  ;;  %16366 = vmatprep.subr.mxu1 %v19933_v37 }
 0xbb3   :  { %16336 = vmatpush3.msra.mxu0 %v18211_v28  ;;  %16367 = vmatpush3.msra.mxu1 %v18228_v34 }
 0xbb4   :  { %16337 = vmatprep.subr.mxu0 %v19933_v37  ;;  %16368 = vmatprep.subr.mxu1 %v19933_v37 }
 0xbb5   :  { %16338 = vmatpush3.msra.mxu0 %v18222_v32  ;;  %16369 = vmatpush3.msra.mxu1 %v18241_v27 }
 0xbb6   :  { %16339 = vmatprep.subr.mxu0 %v19933_v37  ;;  %16370 = vmatprep.subr.mxu1 %v19933_v37 }
 0xbb7   :  { %16340 = vmatpush3.msra.mxu0 %v18231_v35  ;;  %16371 = vmatpush3.msra.mxu1 %v18248_v38 }
 0xbb8   :  { %16342 = vmatmul.mubr.f32.vlgmr.msra.gmra.mxu0 %v4206_v47  ;;  %16372 = vmatprep.subr.mxu1 %v19933_v37 }
 0xbb9   :  { %16373 = vmatpush3.msra.mxu1 %v18256_v39  ;;  %16355 = vmatprep.subr.mxu0 %v19933_v37 }
 0xbba   :  { %16374 = vmatprep.mubr.msk.f32.mxu1 %vm17801_vm10, %v19933_v37  ;;  %16388 = vmatprep.subr.mxu1 %v19933_v37 }
 0xbbb   :  { %16356 = vmatpush3.msra.mxu0 %v18166_v42  ;;  %16363 = vmatprep.mubr.msk.f32.mxu0 %vm17801_vm10, %v19933_v37 }
 0xbbc   :  { %16357 = vmatprep.subr.mxu0 %v19933_v37 }
 0xbbd   :  { %16358 = vmatpush3.msra.mxu0 %v18180_v18 }
 0xbbe   :  { %16359 = vmatprep.subr.mxu0 %v19933_v37 }
 0xbbf   :  { %16360 = vmatpush3.msra.mxu0 %v18189_v20 }
 0xbc0   :  { %16361 = vmatprep.subr.mxu0 %v19933_v37 }
 0xbc1   :  { %16362 = vmatpush3.msra.mxu0 %v18202_v25 }
 0xbc2   :  { %16377 = vmatprep.subr.mxu0 %v19933_v37 }
 0xc5e   :  { %v4303_v10 = vpop.f32.mrf.mxu1 }
 0xc60   :  { %v16310_v48 = vpop.f32.mrf.mxu1 }
 0xc66   :  { %v4460_v12 = vpop.f32.mrf.mxu1 }
 0xc67   :  { %v4212_v3 = vpop.f32.mrf.mxu0 }
 0xc68   :  { %v16332_v36 = vpop.f32.mrf.mxu1  ;;  %v4213_v21 = vadd.f32 %v18410_v2, %v4212_v3 }
 0xc69   :  { %v16299_v30 = vpop.f32.mrf.mxu0 }
 0xc6a   :  { %v4304_v4 = vadd.f32 %v4303_v10, %v4213_v21 }
 0xc6f   :  { %v4383_v63 = vpop.f32.mrf.mxu0 }
 0xc70   :  { %v4618_v58 = vpop.f32.mrf.mxu1  ;;  %v4384_v51 = vadd.f32 %v4383_v63, %v4304_v4 }
 0xc71   :  { %v16321_v43 = vpop.f32.mrf.mxu0 }
 0xc72   :  { %v16354_v62 = vpop.f32.mrf.mxu1  ;;  %v4461_v56 = vadd.f32 %v4460_v12, %v4384_v51 }
 0xc78   :  { %v4543_v55 = vpop.f32.mrf.mxu0 }
 0xc79   :  { %v4544_v49 = vadd.f32 %v4543_v55, %v4461_v56 }
 0xc7a   :  { %v16343_v5 = vpop.f32.mrf.mxu0 }
 0xc7b   :  { %v4619_v15 = vadd.f32 %v4618_v58, %v4544_v49 }
 0xc7d   :  { %4630 = vrot.lane.b32.xlu0 %v4619_v15, %s17789_s19  ;;  %v4622_v60 = vadd.f32 %v4619_v15, %v18367_v9 }
 0xc7f   :  { %v15196_v22 = vmul.f32 -1.442695, %v4622_v60 }
 0xc81   :  { %17471 = vpow2.f32 %v15196_v22 }
 0xc8e   :  { %v17472_v47 = vpop.eup %17471 }
 0xc8f   :  { %v4626_v16 = vadd.f32 1.0, %v17472_v47 }
 0xc91   :  { %17473 = vrcp.f32 %v4626_v16 }
 0xc9e   :  { %v17474_v33 = vpop.eup %17473 }
 0xc9f   :  { %v4640_v3 = vsub.f32 1.0, %v17474_v33  ;;  %v4646_v30 = vmul.f32 %v17474_v33, %v18599_v57 }
 0xcef   :  { %v4631_v46 = vpop.permute.xlu0 %4630 }
 0xcf0   :  { %v4633_v45 = vmul.f32 %v17474_v33, %v4631_v46 }
 0xcf2   :  { %4635 = vrot.lane.b32.xlu1 %v4633_v45, %s17789_s19 }
 0xd64   :  { %v4636_v10 = vpop.permute.xlu1 %4635 }
 0xd65   :  { %v4638_v48 = vadd.f32 %v4636_v10, %v18367_v9 }
 0xd67   :  { %17475 = vtanh.f32 %v4638_v48 }
 0xd74   :  { %v17476_v12 = vpop.eup %17475 }
 0xd75   :  { %4642 = vrot.lane.b32.xlu0 %v17476_v12, %s17802_s5 }
 0xde7   :  { %v4643_v36 = vpop.permute.xlu0 %4642 }
 0xde8   :  { %v4645_v21 = vmul.f32 %v4643_v36, %v4640_v3 }
 0xdea   :  { %v18671_v63 = vadd.f32 %v4646_v30, %v4645_v21 }
 0xdec   :  { %4654 = vrot.lane.b32.xlu1 %v18671_v63, %s17802_s5 }
 0xe5e   :  { %v4655_v58 = vpop.permute.xlu1 %4654 }
 0xe5f   :  { %v4656_v4 = vsel %vm2570_vm14, %v4655_v58, 0 }
 0xe60   :  { %v4727_v43 = vand.u32 4294901760, %v4656_v4 }
 0xe62   :  { %v4728_v62 = vsub.f32 %v4656_v4, %v4727_v43  ;;  %16375 = vmatmul.mubr.f32.vlgmr.msra.gmra.mxu1 %v4727_v43 }
 0xe63   :  { %16389 = vmatpush3.msra.mxu1 %v18166_v42  ;;  %16396 = vmatprep.mubr.msk.f32.mxu1 %vm17801_vm10, %v19933_v37 }
 0xe64   :  { %v4729_v9 = vand.u32 4294901760, %v4728_v62  ;;  %16390 = vmatprep.subr.mxu1 %v19933_v37 }
 0xe65   :  { %16391 = vmatpush3.msra.mxu1 %v18180_v18 }
 0xe66   :  { %v4730_v57 = vsub.f32 %v4728_v62, %v4729_v9  ;;  %16392 = vmatprep.subr.mxu1 %v19933_v37 }
 0xe67   :  { %16393 = vmatpush3.msra.mxu1 %v18189_v20 }
 0xe68   :  { %v4731_v51 = vand.u32 4294901760, %v4730_v57  ;;  %16394 = vmatprep.subr.mxu1 %v19933_v37 }
 0xe69   :  { %16395 = vmatpush3.msra.mxu1 %v18202_v25 }
 0xe6a   :  { %16397 = vmatmul.mubr.f32.vlgmr.msra.gmra.mxu1 %v4729_v9  ;;  %16410 = vmatprep.subr.mxu1 %v19933_v37 }
 0xe6b   :  { %16364 = vmatmul.mubr.f32.vlgmr.msra.gmra.mxu0 %v4731_v51  ;;  %16411 = vmatpush3.msra.mxu1 %v18166_v42 }
 0xe6c   :  { %16378 = vmatpush3.msra.mxu0 %v18185_v19  ;;  %16412 = vmatprep.subr.mxu1 %v19933_v37 }
 0xe6d   :  { %16379 = vmatprep.subr.mxu0 %v19933_v37  ;;  %16413 = vmatpush3.msra.mxu1 %v18180_v18 }
 0xe6e   :  { %16380 = vmatpush3.msra.mxu0 %v18197_v23  ;;  %16414 = vmatprep.subr.mxu1 %v19933_v37 }
 0xe6f   :  { %16381 = vmatprep.subr.mxu0 %v19933_v37  ;;  %16415 = vmatpush3.msra.mxu1 %v18189_v20 }
 0xe70   :  { %16382 = vmatpush3.msra.mxu0 %v18205_v26  ;;  %16416 = vmatprep.subr.mxu1 %v19933_v37 }
 0xe71   :  { %16383 = vmatprep.subr.mxu0 %v19933_v37  ;;  %16385 = vmatprep.mubr.msk.f32.mxu0 %vm17801_vm10, %v19933_v37 }
 0xe72   :  { %16384 = vmatpush3.msra.mxu0 %v18218_v31  ;;  %16417 = vmatpush3.msra.mxu1 %v18202_v25 }
 0xe73   :  { %16418 = vmatprep.mubr.msk.f32.mxu1 %vm17801_vm10, %v19933_v37  ;;  %16386 = vmatmul.mubr.f32.vlgmr.msra.gmra.mxu0 %v4728_v62 }
 0xe74   :  { %16399 = vmatprep.subr.mxu0 %v19933_v37  ;;  %16419 = vmatmul.mubr.f32.vlgmr.msra.gmra.mxu1 %v4727_v43 }
 0xe75   :  { %16400 = vmatpush3.msra.mxu0 %v18200_v24  ;;  %16407 = vmatprep.mubr.msk.f32.mxu0 %vm17801_vm10, %v19933_v37 }
 0xe76   :  { %16401 = vmatprep.subr.mxu0 %v19933_v37  ;;  %16432 = vmatprep.subr.mxu1 %v19933_v37 }
 0xe77   :  { %16402 = vmatpush3.msra.mxu0 %v18211_v28  ;;  %16433 = vmatpush3.msra.mxu1 %v18228_v34 }
 0xe78   :  { %16403 = vmatprep.subr.mxu0 %v19933_v37  ;;  %16434 = vmatprep.subr.mxu1 %v19933_v37 }
 0xe79   :  { %16404 = vmatpush3.msra.mxu0 %v18222_v32  ;;  %16435 = vmatpush3.msra.mxu1 %v18241_v27 }
 0xe7a   :  { %16405 = vmatprep.subr.mxu0 %v19933_v37  ;;  %16436 = vmatprep.subr.mxu1 %v19933_v37 }
 0xe7b   :  { %16406 = vmatpush3.msra.mxu0 %v18231_v35  ;;  %16437 = vmatpush3.msra.mxu1 %v18248_v38 }
 0xe7c   :  { %16408 = vmatmul.mubr.f32.vlgmr.msra.gmra.mxu0 %v4727_v43  ;;  %16438 = vmatprep.subr.mxu1 %v19933_v37 }
 0xe7d   :  { %16439 = vmatpush3.msra.mxu1 %v18256_v39  ;;  %16421 = vmatprep.subr.mxu0 %v19933_v37 }
 0xe7e   :  { %16440 = vmatprep.mubr.msk.f32.mxu1 %vm17801_vm10, %v19933_v37  ;;  %16454 = vmatprep.subr.mxu1 %v19933_v37 }
 0xe7f   :  { %16422 = vmatpush3.msra.mxu0 %v18166_v42  ;;  %16429 = vmatprep.mubr.msk.f32.mxu0 %vm17801_vm10, %v19933_v37 }
 0xe80   :  { %16423 = vmatprep.subr.mxu0 %v19933_v37 }
 0xe81   :  { %16424 = vmatpush3.msra.mxu0 %v18180_v18 }
 0xe82   :  { %16425 = vmatprep.subr.mxu0 %v19933_v37 }
 0xe83   :  { %16426 = vmatpush3.msra.mxu0 %v18189_v20 }
 0xe84   :  { %16427 = vmatprep.subr.mxu0 %v19933_v37 }
 0xe85   :  { %16428 = vmatpush3.msra.mxu0 %v18202_v25 }
 0xe86   :  { %16443 = vmatprep.subr.mxu0 %v19933_v37 }
 0xf22   :  { %v4824_v56 = vpop.f32.mrf.mxu1 }
 0xf24   :  { %v16376_v55 = vpop.f32.mrf.mxu1 }
 0xf2a   :  { %v4981_v49 = vpop.f32.mrf.mxu1 }
 0xf2b   :  { %v4733_v5 = vpop.f32.mrf.mxu0 }
 0xf2c   :  { %v16398_v15 = vpop.f32.mrf.mxu1  ;;  %v4734_v22 = vadd.f32 %v18410_v2, %v4733_v5 }
 0xf2d   :  { %v16365_v60 = vpop.f32.mrf.mxu0 }
 0xf2e   :  { %v4825_v33 = vadd.f32 %v4824_v56, %v4734_v22 }
 0xf33   :  { %v4904_v47 = vpop.f32.mrf.mxu0 }
 0xf34   :  { %v5139_v16 = vpop.f32.mrf.mxu1  ;;  %v4905_v10 = vadd.f32 %v4904_v47, %v4825_v33 }
 0xf35   :  { %v16387_v46 = vpop.f32.mrf.mxu0 }
 0xf36   :  { %v16420_v45 = vpop.f32.mrf.mxu1  ;;  %v4982_v48 = vadd.f32 %v4981_v49, %v4905_v10 }
 0xf3c   :  { %v5064_v12 = vpop.f32.mrf.mxu0 }
 0xf3d   :  { %v5065_v3 = vadd.f32 %v5064_v12, %v4982_v48 }
 0xf3e   :  { %v16409_v36 = vpop.f32.mrf.mxu0 }
 0xf3f   :  { %v5140_v30 = vadd.f32 %v5139_v16, %v5065_v3 }
 0xf41   :  { %5151 = vrot.lane.b32.xlu0 %v5140_v30, %s17789_s19  ;;  %v5143_v21 = vadd.f32 %v5140_v30, %v18374_v50  ;;  %v18808_v30 = vld [vmem:[#allocation11] ss:$0 sm:$0xff] }
 0xf43   :  { %v15197_v58 = vmul.f32 -1.442695, %v5143_v21 }
 0xf45   :  { %17477 = vpow2.f32 %v15197_v58 }
 0xf52   :  { %v17478_v4 = vpop.eup %17477 }
 0xf53   :  { %v5147_v43 = vadd.f32 1.0, %v17478_v4 }
 0xf55   :  { %17479 = vrcp.f32 %v5147_v43 }
 0xf62   :  { %v17480_v2 = vpop.eup %17479 }
 0xf63   :  { %v5161_v55 = vsub.f32 1.0, %v17480_v2  ;;  %v5167_v5 = vmul.f32 %v17480_v2, %v18671_v63 }
 0xfb3   :  { %v5152_v62 = vpop.permute.xlu0 %5151 }
 0xfb4   :  { %v5154_v9 = vmul.f32 %v17480_v2, %v5152_v62 }
 0xfb6   :  { %5156 = vrot.lane.b32.xlu1 %v5154_v9, %s17789_s19 }
0x1028   :  { %v5157_v57 = vpop.permute.xlu1 %5156 }
0x1029   :  { %v5159_v51 = vadd.f32 %v5157_v57, %v18374_v50 }
0x102b   :  { %17481 = vtanh.f32 %v5159_v51 }
0x1038   :  { %v17482_v56 = vpop.eup %17481 }
0x1039   :  { %5163 = vrot.lane.b32.xlu0 %v17482_v56, %s17802_s5 }
0x10ab   :  { %v5164_v49 = vpop.permute.xlu0 %5163 }
0x10ac   :  { %v5166_v15 = vmul.f32 %v5164_v49, %v5161_v55 }
0x10ae   :  { %v18743_v60 = vadd.f32 %v5167_v5, %v5166_v15 }
0x10b0   :  { %5175 = vrot.lane.b32.xlu1 %v18743_v60, %s17802_s5 }
0x1122   :  { %v5176_v22 = vpop.permute.xlu1 %5175 }
0x1123   :  { %v5177_v47 = vsel %vm2570_vm14, %v5176_v22, 0 }
0x1124   :  { %v5248_v16 = vand.u32 4294901760, %v5177_v47 }
0x1126   :  { %v5249_v33 = vsub.f32 %v5177_v47, %v5248_v16  ;;  %16441 = vmatmul.mubr.f32.vlgmr.msra.gmra.mxu1 %v5248_v16 }
0x1127   :  { %16455 = vmatpush3.msra.mxu1 %v18166_v42  ;;  %16462 = vmatprep.mubr.msk.f32.mxu1 %vm17801_vm10, %v19933_v37 }
0x1128   :  { %v5250_v50 = vand.u32 4294901760, %v5249_v33  ;;  %16456 = vmatprep.subr.mxu1 %v19933_v37 }
0x1129   :  { %16457 = vmatpush3.msra.mxu1 %v18180_v18 }
0x112a   :  { %v5251_v63 = vsub.f32 %v5249_v33, %v5250_v50  ;;  %16458 = vmatprep.subr.mxu1 %v19933_v37 }
0x112b   :  { %16459 = vmatpush3.msra.mxu1 %v18189_v20 }
0x112c   :  { %v5252_v46 = vand.u32 4294901760, %v5251_v63  ;;  %16460 = vmatprep.subr.mxu1 %v19933_v37 }
0x112d   :  { %16461 = vmatpush3.msra.mxu1 %v18202_v25 }
0x112e   :  { %16463 = vmatmul.mubr.f32.vlgmr.msra.gmra.mxu1 %v5250_v50  ;;  %16476 = vmatprep.subr.mxu1 %v19933_v37 }
0x112f   :  { %16430 = vmatmul.mubr.f32.vlgmr.msra.gmra.mxu0 %v5252_v46  ;;  %16477 = vmatpush3.msra.mxu1 %v18166_v42 }
0x1130   :  { %16444 = vmatpush3.msra.mxu0 %v18185_v19  ;;  %16478 = vmatprep.subr.mxu1 %v19933_v37 }
0x1131   :  { %16445 = vmatprep.subr.mxu0 %v19933_v37  ;;  %16479 = vmatpush3.msra.mxu1 %v18180_v18 }
0x1132   :  { %16446 = vmatpush3.msra.mxu0 %v18197_v23  ;;  %16480 = vmatprep.subr.mxu1 %v19933_v37 }
0x1133   :  { %16447 = vmatprep.subr.mxu0 %v19933_v37  ;;  %16481 = vmatpush3.msra.mxu1 %v18189_v20 }
0x1134   :  { %16448 = vmatpush3.msra.mxu0 %v18205_v26  ;;  %16482 = vmatprep.subr.mxu1 %v19933_v37 }
0x1135   :  { %16449 = vmatprep.subr.mxu0 %v19933_v37  ;;  %16451 = vmatprep.mubr.msk.f32.mxu0 %vm17801_vm10, %v19933_v37 }
0x1136   :  { %16450 = vmatpush3.msra.mxu0 %v18218_v31  ;;  %16483 = vmatpush3.msra.mxu1 %v18202_v25 }
0x1137   :  { %16484 = vmatprep.mubr.msk.f32.mxu1 %vm17801_vm10, %v19933_v37  ;;  %16452 = vmatmul.mubr.f32.vlgmr.msra.gmra.mxu0 %v5249_v33 }
0x1138   :  { %16465 = vmatprep.subr.mxu0 %v19933_v37  ;;  %16485 = vmatmul.mubr.f32.vlgmr.msra.gmra.mxu1 %v5248_v16 }
0x1139   :  { %16466 = vmatpush3.msra.mxu0 %v18200_v24  ;;  %16473 = vmatprep.mubr.msk.f32.mxu0 %vm17801_vm10, %v19933_v37 }
0x113a   :  { %16467 = vmatprep.subr.mxu0 %v19933_v37  ;;  %16498 = vmatprep.subr.mxu1 %v19933_v37 }
0x113b   :  { %16468 = vmatpush3.msra.mxu0 %v18211_v28  ;;  %16499 = vmatpush3.msra.mxu1 %v18228_v34 }
0x113c   :  { %16469 = vmatprep.subr.mxu0 %v19933_v37  ;;  %16500 = vmatprep.subr.mxu1 %v19933_v37 }
0x113d   :  { %16470 = vmatpush3.msra.mxu0 %v18222_v32  ;;  %16501 = vmatpush3.msra.mxu1 %v18241_v27 }
0x113e   :  { %16471 = vmatprep.subr.mxu0 %v19933_v37  ;;  %16502 = vmatprep.subr.mxu1 %v19933_v37 }
0x113f   :  { %16472 = vmatpush3.msra.mxu0 %v18231_v35  ;;  %16503 = vmatpush3.msra.mxu1 %v18248_v38 }
0x1140   :  { %16474 = vmatmul.mubr.f32.vlgmr.msra.gmra.mxu0 %v5248_v16  ;;  %16504 = vmatprep.subr.mxu1 %v19933_v37 }
0x1141   :  { %16505 = vmatpush3.msra.mxu1 %v18256_v39  ;;  %16487 = vmatprep.subr.mxu0 %v19933_v37 }
0x1142   :  { %16506 = vmatprep.mubr.msk.f32.mxu1 %vm17801_vm10, %v19933_v37  ;;  %16520 = vmatprep.subr.mxu1 %v19933_v37 }
0x1143   :  { %16488 = vmatpush3.msra.mxu0 %v18166_v42  ;;  %16495 = vmatprep.mubr.msk.f32.mxu0 %vm17801_vm10, %v19933_v37 }
0x1144   :  { %16489 = vmatprep.subr.mxu0 %v19933_v37 }
0x1145   :  { %16490 = vmatpush3.msra.mxu0 %v18180_v18 }
0x1146   :  { %16491 = vmatprep.subr.mxu0 %v19933_v37 }
0x1147   :  { %16492 = vmatpush3.msra.mxu0 %v18189_v20 }
0x1148   :  { %16493 = vmatprep.subr.mxu0 %v19933_v37 }
0x1149   :  { %16494 = vmatpush3.msra.mxu0 %v18202_v25 }
0x114a   :  { %16509 = vmatprep.subr.mxu0 %v19933_v37 }
0x11e6   :  { %v5345_v45 = vpop.f32.mrf.mxu1 }
0x11e8   :  { %v16442_v10 = vpop.f32.mrf.mxu1 }
0x11ee   :  { %v5502_v48 = vpop.f32.mrf.mxu1 }
0x11ef   :  { %v5254_v12 = vpop.f32.mrf.mxu0 }
0x11f0   :  { %v16464_v3 = vpop.f32.mrf.mxu1  ;;  %v5255_v21 = vadd.f32 %v18808_v30, %v5254_v12 }
0x11f1   :  { %v16431_v36 = vpop.f32.mrf.mxu0 }
0x11f2   :  { %v5346_v43 = vadd.f32 %v5345_v45, %v5255_v21 }
0x11f7   :  { %v5425_v58 = vpop.f32.mrf.mxu0 }
0x11f8   :  { %v5660_v4 = vpop.f32.mrf.mxu1  ;;  %v5426_v9 = vadd.f32 %v5425_v58, %v5346_v43 }
0x11f9   :  { %v16453_v2 = vpop.f32.mrf.mxu0 }
0x11fa   :  { %v16486_v62 = vpop.f32.mrf.mxu1  ;;  %v5503_v57 = vadd.f32 %v5502_v48, %v5426_v9 }
0x1200   :  { %v5585_v51 = vpop.f32.mrf.mxu0 }
0x1201   :  { %v5586_v56 = vadd.f32 %v5585_v51, %v5503_v57 }
0x1202   :  { %v16475_v55 = vpop.f32.mrf.mxu0 }
0x1203   :  { %v5661_v49 = vadd.f32 %v5660_v4, %v5586_v56 }
0x1205   :  { %5672 = vrot.lane.b32.xlu0 %v5661_v49, %s17789_s19  ;;  %v5664_v5 = vadd.f32 %v5661_v49, %v18377_v13 }
0x1207   :  { %v15198_v15 = vmul.f32 -1.442695, %v5664_v5 }
0x1209   :  { %17483 = vpow2.f32 %v15198_v15 }
0x1216   :  { %v17484_v22 = vpop.eup %17483 }
0x1217   :  { %v5668_v47 = vadd.f32 1.0, %v17484_v22 }
0x1219   :  { %17485 = vrcp.f32 %v5668_v47 }
0x1226   :  { %v17486_v16 = vpop.eup %17485 }
0x1227   :  { %v5682_v10 = vsub.f32 1.0, %v17486_v16  ;;  %v5688_v12 = vmul.f32 %v17486_v16, %v18743_v60 }
0x1277   :  { %v5673_v33 = vpop.permute.xlu0 %5672 }
0x1278   :  { %v5675_v50 = vmul.f32 %v17486_v16, %v5673_v33 }
0x127a   :  { %5677 = vrot.lane.b32.xlu1 %v5675_v50, %s17789_s19 }
0x12ec   :  { %v5678_v63 = vpop.permute.xlu1 %5677 }
0x12ed   :  { %v5680_v46 = vadd.f32 %v5678_v63, %v18377_v13 }
0x12ef   :  { %17487 = vtanh.f32 %v5680_v46 }
0x12fc   :  { %v17488_v45 = vpop.eup %17487 }
0x12fd   :  { %5684 = vrot.lane.b32.xlu0 %v17488_v45, %s17802_s5 }
0x136f   :  { %v5685_v48 = vpop.permute.xlu0 %5684 }
0x1370   :  { %v5687_v3 = vmul.f32 %v5685_v48, %v5682_v10 }
0x1372   :  { %v18817_v36 = vadd.f32 %v5688_v12, %v5687_v3 }
0x1374   :  { %5696 = vrot.lane.b32.xlu1 %v18817_v36, %s17802_s5 }
0x13e6   :  { %v5697_v21 = vpop.permute.xlu1 %5696 }
0x13e7   :  { %v5698_v58 = vsel %vm2570_vm14, %v5697_v21, 0 }
0x13e8   :  { %v5769_v4 = vand.u32 4294901760, %v5698_v58 }
0x13ea   :  { %v5770_v43 = vsub.f32 %v5698_v58, %v5769_v4  ;;  %16507 = vmatmul.mubr.f32.vlgmr.msra.gmra.mxu1 %v5769_v4 }
0x13eb   :  { %16521 = vmatpush3.msra.mxu1 %v18166_v42  ;;  %16528 = vmatprep.mubr.msk.f32.mxu1 %vm17801_vm10, %v19933_v37 }
0x13ec   :  { %v5771_v13 = vand.u32 4294901760, %v5770_v43  ;;  %16522 = vmatprep.subr.mxu1 %v19933_v37 }
0x13ed   :  { %16523 = vmatpush3.msra.mxu1 %v18180_v18 }
0x13ee   :  { %v5772_v60 = vsub.f32 %v5770_v43, %v5771_v13  ;;  %16524 = vmatprep.subr.mxu1 %v19933_v37 }
0x13ef   :  { %16525 = vmatpush3.msra.mxu1 %v18189_v20 }
0x13f0   :  { %v5773_v2 = vand.u32 4294901760, %v5772_v60  ;;  %16526 = vmatprep.subr.mxu1 %v19933_v37 }
0x13f1   :  { %16527 = vmatpush3.msra.mxu1 %v18202_v25 }
0x13f2   :  { %16529 = vmatmul.mubr.f32.vlgmr.msra.gmra.mxu1 %v5771_v13  ;;  %16542 = vmatprep.subr.mxu1 %v19933_v37 }
0x13f3   :  { %16496 = vmatmul.mubr.f32.vlgmr.msra.gmra.mxu0 %v5773_v2  ;;  %16543 = vmatpush3.msra.mxu1 %v18166_v42 }
0x13f4   :  { %16510 = vmatpush3.msra.mxu0 %v18185_v19  ;;  %16544 = vmatprep.subr.mxu1 %v19933_v37 }
0x13f5   :  { %16511 = vmatprep.subr.mxu0 %v19933_v37  ;;  %16545 = vmatpush3.msra.mxu1 %v18180_v18 }
0x13f6   :  { %16512 = vmatpush3.msra.mxu0 %v18197_v23  ;;  %16546 = vmatprep.subr.mxu1 %v19933_v37 }
0x13f7   :  { %16513 = vmatprep.subr.mxu0 %v19933_v37  ;;  %16547 = vmatpush3.msra.mxu1 %v18189_v20 }
0x13f8   :  { %16514 = vmatpush3.msra.mxu0 %v18205_v26  ;;  %16548 = vmatprep.subr.mxu1 %v19933_v37 }
0x13f9   :  { %16515 = vmatprep.subr.mxu0 %v19933_v37  ;;  %16517 = vmatprep.mubr.msk.f32.mxu0 %vm17801_vm10, %v19933_v37 }
0x13fa   :  { %16516 = vmatpush3.msra.mxu0 %v18218_v31  ;;  %16549 = vmatpush3.msra.mxu1 %v18202_v25 }
0x13fb   :  { %16550 = vmatprep.mubr.msk.f32.mxu1 %vm17801_vm10, %v19933_v37  ;;  %16518 = vmatmul.mubr.f32.vlgmr.msra.gmra.mxu0 %v5770_v43 }
0x13fc   :  { %16531 = vmatprep.subr.mxu0 %v19933_v37  ;;  %16551 = vmatmul.mubr.f32.vlgmr.msra.gmra.mxu1 %v5769_v4 }
0x13fd   :  { %16532 = vmatpush3.msra.mxu0 %v18200_v24  ;;  %16539 = vmatprep.mubr.msk.f32.mxu0 %vm17801_vm10, %v19933_v37 }
0x13fe   :  { %16533 = vmatprep.subr.mxu0 %v19933_v37  ;;  %16564 = vmatprep.subr.mxu1 %v19933_v37 }
0x13ff   :  { %16534 = vmatpush3.msra.mxu0 %v18211_v28  ;;  %16565 = vmatpush3.msra.mxu1 %v18228_v34 }
0x1400   :  { %16535 = vmatprep.subr.mxu0 %v19933_v37  ;;  %16566 = vmatprep.subr.mxu1 %v19933_v37 }
0x1401   :  { %16536 = vmatpush3.msra.mxu0 %v18222_v32  ;;  %16567 = vmatpush3.msra.mxu1 %v18241_v27 }
0x1402   :  { %16537 = vmatprep.subr.mxu0 %v19933_v37  ;;  %16568 = vmatprep.subr.mxu1 %v19933_v37 }
0x1403   :  { %16538 = vmatpush3.msra.mxu0 %v18231_v35  ;;  %16569 = vmatpush3.msra.mxu1 %v18248_v38 }
0x1404   :  { %16540 = vmatmul.mubr.f32.vlgmr.msra.gmra.mxu0 %v5769_v4  ;;  %16570 = vmatprep.subr.mxu1 %v19933_v37 }
0x1405   :  { %16571 = vmatpush3.msra.mxu1 %v18256_v39  ;;  %16553 = vmatprep.subr.mxu0 %v19933_v37 }
0x1406   :  { %16572 = vmatprep.mubr.msk.f32.mxu1 %vm17801_vm10, %v19933_v37  ;;  %16586 = vmatprep.subr.mxu1 %v19933_v37 }
0x1407   :  { %16554 = vmatpush3.msra.mxu0 %v18166_v42  ;;  %16561 = vmatprep.mubr.msk.f32.mxu0 %vm17801_vm10, %v19933_v37 }
0x1408   :  { %16555 = vmatprep.subr.mxu0 %v19933_v37 }
0x1409   :  { %16556 = vmatpush3.msra.mxu0 %v18180_v18 }
0x140a   :  { %16557 = vmatprep.subr.mxu0 %v19933_v37 }
0x140b   :  { %16558 = vmatpush3.msra.mxu0 %v18189_v20 }
0x140c   :  { %16559 = vmatprep.subr.mxu0 %v19933_v37 }
0x140d   :  { %16560 = vmatpush3.msra.mxu0 %v18202_v25 }
0x140e   :  { %16575 = vmatprep.subr.mxu0 %v19933_v37 }
0x14aa   :  { %v5866_v62 = vpop.f32.mrf.mxu1 }
0x14ac   :  { %v16508_v9 = vpop.f32.mrf.mxu1 }
0x14b2   :  { %v6023_v57 = vpop.f32.mrf.mxu1 }
0x14b3   :  { %v5775_v51 = vpop.f32.mrf.mxu0 }
0x14b4   :  { %v16530_v56 = vpop.f32.mrf.mxu1  ;;  %v5776_v49 = vadd.f32 %v18808_v30, %v5775_v51 }
0x14b5   :  { %v16497_v55 = vpop.f32.mrf.mxu0 }
0x14b6   :  { %v5867_v22 = vadd.f32 %v5866_v62, %v5776_v49 }
0x14bb   :  { %v5946_v5 = vpop.f32.mrf.mxu0 }
0x14bc   :  { %v6181_v15 = vpop.f32.mrf.mxu1  ;;  %v5947_v33 = vadd.f32 %v5946_v5, %v5867_v22 }
0x14bd   :  { %v16519_v47 = vpop.f32.mrf.mxu0 }
0x14be   :  { %v16552_v16 = vpop.f32.mrf.mxu1  ;;  %v6024_v50 = vadd.f32 %v6023_v57, %v5947_v33 }
0x14c4   :  { %v6106_v63 = vpop.f32.mrf.mxu0 }
0x14c5   :  { %v6107_v46 = vadd.f32 %v6106_v63, %v6024_v50 }
0x14c6   :  { %v16541_v45 = vpop.f32.mrf.mxu0 }
0x14c7   :  { %v6182_v10 = vadd.f32 %v6181_v15, %v6107_v46 }
0x14c9   :  { %6193 = vrot.lane.b32.xlu0 %v6182_v10, %s17789_s19  ;;  %v6185_v48 = vadd.f32 %v6182_v10, %v18380_v52 }
0x14cb   :  { %v15199_v12 = vmul.f32 -1.442695, %v6185_v48 }
0x14cd   :  { %17489 = vpow2.f32 %v15199_v12 }
0x14da   :  { %v17490_v3 = vpop.eup %17489 }
0x14db   :  { %v6189_v21 = vadd.f32 1.0, %v17490_v3 }
0x14dd   :  { %17491 = vrcp.f32 %v6189_v21 }
0x14ea   :  { %v17492_v58 = vpop.eup %17491 }
0x14eb   :  { %v6203_v62 = vsub.f32 1.0, %v17492_v58  ;;  %v6209_v57 = vmul.f32 %v17492_v58, %v18817_v36 }
0x153b   :  { %v6194_v4 = vpop.permute.xlu0 %6193 }
0x153c   :  { %v6196_v43 = vmul.f32 %v17492_v58, %v6194_v4 }
0x153e   :  { %6198 = vrot.lane.b32.xlu1 %v6196_v43, %s17789_s19 }
0x15b0   :  { %v6199_v13 = vpop.permute.xlu1 %6198 }
0x15b1   :  { %v6201_v60 = vadd.f32 %v6199_v13, %v18380_v52 }
0x15b3   :  { %17493 = vtanh.f32 %v6201_v60 }
0x15c0   :  { %v17494_v2 = vpop.eup %17493 }
0x15c1   :  { %6205 = vrot.lane.b32.xlu0 %v17494_v2, %s17802_s5 }
0x1633   :  { %v6206_v9 = vpop.permute.xlu0 %6205 }
0x1634   :  { %v6208_v51 = vmul.f32 %v6206_v9, %v6203_v62 }
0x1636   :  { %v18889_v56 = vadd.f32 %v6209_v57, %v6208_v51 }
0x1638   :  { %6217 = vrot.lane.b32.xlu1 %v18889_v56, %s17802_s5 }
0x16aa   :  { %v6218_v55 = vpop.permute.xlu1 %6217 }
0x16ab   :  { %v6219_v49 = vsel %vm2570_vm14, %v6218_v55, 0 }
0x16ac   :  { %v6290_v5 = vand.u32 4294901760, %v6219_v49 }
0x16ae   :  { %v6291_v15 = vsub.f32 %v6219_v49, %v6290_v5  ;;  %16573 = vmatmul.mubr.f32.vlgmr.msra.gmra.mxu1 %v6290_v5 }
0x16af   :  { %16587 = vmatpush3.msra.mxu1 %v18166_v42  ;;  %16594 = vmatprep.mubr.msk.f32.mxu1 %vm17801_vm10, %v19933_v37 }
0x16b0   :  { %v6292_v52 = vand.u32 4294901760, %v6291_v15  ;;  %16588 = vmatprep.subr.mxu1 %v19933_v37 }
0x16b1   :  { %16589 = vmatpush3.msra.mxu1 %v18180_v18 }
0x16b2   :  { %v6293_v36 = vsub.f32 %v6291_v15, %v6292_v52  ;;  %16590 = vmatprep.subr.mxu1 %v19933_v37 }
0x16b3   :  { %16591 = vmatpush3.msra.mxu1 %v18189_v20 }
0x16b4   :  { %v6294_v22 = vand.u32 4294901760, %v6293_v36  ;;  %16592 = vmatprep.subr.mxu1 %v19933_v37 }
0x16b5   :  { %16593 = vmatpush3.msra.mxu1 %v18202_v25 }
0x16b6   :  { %16595 = vmatmul.mubr.f32.vlgmr.msra.gmra.mxu1 %v6292_v52  ;;  %16608 = vmatprep.subr.mxu1 %v19933_v37 }
0x16b7   :  { %16562 = vmatmul.mubr.f32.vlgmr.msra.gmra.mxu0 %v6294_v22  ;;  %16609 = vmatpush3.msra.mxu1 %v18166_v42 }
0x16b8   :  { %16576 = vmatpush3.msra.mxu0 %v18185_v19  ;;  %16610 = vmatprep.subr.mxu1 %v19933_v37 }
0x16b9   :  { %16577 = vmatprep.subr.mxu0 %v19933_v37  ;;  %16611 = vmatpush3.msra.mxu1 %v18180_v18 }
0x16ba   :  { %16578 = vmatpush3.msra.mxu0 %v18197_v23  ;;  %16612 = vmatprep.subr.mxu1 %v19933_v37 }
0x16bb   :  { %16579 = vmatprep.subr.mxu0 %v19933_v37  ;;  %16613 = vmatpush3.msra.mxu1 %v18189_v20 }
0x16bc   :  { %16580 = vmatpush3.msra.mxu0 %v18205_v26  ;;  %16614 = vmatprep.subr.mxu1 %v19933_v37 }
0x16bd   :  { %16581 = vmatprep.subr.mxu0 %v19933_v37  ;;  %16583 = vmatprep.mubr.msk.f32.mxu0 %vm17801_vm10, %v19933_v37 }
0x16be   :  { %16582 = vmatpush3.msra.mxu0 %v18218_v31  ;;  %16615 = vmatpush3.msra.mxu1 %v18202_v25 }
0x16bf   :  { %16616 = vmatprep.mubr.msk.f32.mxu1 %vm17801_vm10, %v19933_v37  ;;  %16584 = vmatmul.mubr.f32.vlgmr.msra.gmra.mxu0 %v6291_v15 }
0x16c0   :  { %16597 = vmatprep.subr.mxu0 %v19933_v37  ;;  %16617 = vmatmul.mubr.f32.vlgmr.msra.gmra.mxu1 %v6290_v5 }
0x16c1   :  { %16598 = vmatpush3.msra.mxu0 %v18200_v24  ;;  %16605 = vmatprep.mubr.msk.f32.mxu0 %vm17801_vm10, %v19933_v37 }
0x16c2   :  { %16599 = vmatprep.subr.mxu0 %v19933_v37  ;;  %16630 = vmatprep.subr.mxu1 %v19933_v37 }
0x16c3   :  { %16600 = vmatpush3.msra.mxu0 %v18211_v28  ;;  %16631 = vmatpush3.msra.mxu1 %v18228_v34 }
0x16c4   :  { %16601 = vmatprep.subr.mxu0 %v19933_v37  ;;  %16632 = vmatprep.subr.mxu1 %v19933_v37 }
0x16c5   :  { %16602 = vmatpush3.msra.mxu0 %v18222_v32  ;;  %16633 = vmatpush3.msra.mxu1 %v18241_v27 }
0x16c6   :  { %16603 = vmatprep.subr.mxu0 %v19933_v37  ;;  %16634 = vmatprep.subr.mxu1 %v19933_v37 }
0x16c7   :  { %16604 = vmatpush3.msra.mxu0 %v18231_v35  ;;  %16635 = vmatpush3.msra.mxu1 %v18248_v38 }
0x16c8   :  { %16606 = vmatmul.mubr.f32.vlgmr.msra.gmra.mxu0 %v6290_v5  ;;  %16636 = vmatprep.subr.mxu1 %v19933_v37 }
0x16c9   :  { %16637 = vmatpush3.msra.mxu1 %v18256_v39  ;;  %16619 = vmatprep.subr.mxu0 %v19933_v37 }
0x16ca   :  { %16638 = vmatprep.mubr.msk.f32.mxu1 %vm17801_vm10, %v19933_v37  ;;  %16652 = vmatprep.subr.mxu1 %v19933_v37 }
0x16cb   :  { %16620 = vmatpush3.msra.mxu0 %v18166_v42  ;;  %16627 = vmatprep.mubr.msk.f32.mxu0 %vm17801_vm10, %v19933_v37 }
0x16cc   :  { %16621 = vmatprep.subr.mxu0 %v19933_v37 }
0x16cd   :  { %16622 = vmatpush3.msra.mxu0 %v18180_v18 }
0x16ce   :  { %16623 = vmatprep.subr.mxu0 %v19933_v37 }
0x16cf   :  { %16624 = vmatpush3.msra.mxu0 %v18189_v20 }
0x16d0   :  { %16625 = vmatprep.subr.mxu0 %v19933_v37 }
0x16d1   :  { %16626 = vmatpush3.msra.mxu0 %v18202_v25 }
0x16d2   :  { %16641 = vmatprep.subr.mxu0 %v19933_v37 }
0x176e   :  { %v6387_v47 = vpop.f32.mrf.mxu1 }
0x1770   :  { %v16574_v16 = vpop.f32.mrf.mxu1 }
0x1776   :  { %v6544_v33 = vpop.f32.mrf.mxu1 }
0x1777   :  { %v6296_v50 = vpop.f32.mrf.mxu0 }
0x1778   :  { %v16596_v63 = vpop.f32.mrf.mxu1  ;;  %v6297_v45 = vadd.f32 %v18808_v30, %v6296_v50 }
0x1779   :  { %v16563_v46 = vpop.f32.mrf.mxu0 }
0x177a   :  { %v6388_v12 = vadd.f32 %v6387_v47, %v6297_v45 }
0x177f   :  { %v6467_v10 = vpop.f32.mrf.mxu0 }
0x1780   :  { %v6702_v48 = vpop.f32.mrf.mxu1  ;;  %v6468_v58 = vadd.f32 %v6467_v10, %v6388_v12 }
0x1781   :  { %v16585_v3 = vpop.f32.mrf.mxu0 }
0x1782   :  { %v16618_v21 = vpop.f32.mrf.mxu1  ;;  %v6545_v4 = vadd.f32 %v6544_v33, %v6468_v58 }
0x1788   :  { %v6627_v43 = vpop.f32.mrf.mxu0 }
0x1789   :  { %v6628_v13 = vadd.f32 %v6627_v43, %v6545_v4 }
0x178a   :  { %v16607_v60 = vpop.f32.mrf.mxu0 }
0x178b   :  { %v6703_v2 = vadd.f32 %v6702_v48, %v6628_v13 }
0x178d   :  { %6714 = vrot.lane.b32.xlu0 %v6703_v2, %s17789_s19  ;;  %v6706_v62 = vadd.f32 %v6703_v2, %v18383_v53 }
0x178f   :  { %v15200_v9 = vmul.f32 -1.442695, %v6706_v62 }
0x1791   :  { %17495 = vpow2.f32 %v15200_v9 }
0x179e   :  { %v17496_v57 = vpop.eup %17495 }
0x179f   :  { %v6710_v51 = vadd.f32 1.0, %v17496_v57 }
0x17a1   :  { %17497 = vrcp.f32 %v6710_v51 }
0x17ae   :  { %v17498_v55 = vpop.eup %17497 }
0x17af   :  { %v6724_v22 = vsub.f32 1.0, %v17498_v55  ;;  %v6730_v16 = vmul.f32 %v17498_v55, %v18889_v56 }
0x17ff   :  { %v6715_v49 = vpop.permute.xlu0 %6714 }
0x1800   :  { %v6717_v5 = vmul.f32 %v17498_v55, %v6715_v49 }
0x1802   :  { %6719 = vrot.lane.b32.xlu1 %v6717_v5, %s17789_s19 }
0x1874   :  { %v6720_v15 = vpop.permute.xlu1 %6719 }
0x1875   :  { %v6722_v52 = vadd.f32 %v6720_v15, %v18383_v53 }
0x1877   :  { %17499 = vtanh.f32 %v6722_v52 }
0x1884   :  { %v17500_v36 = vpop.eup %17499 }
0x1885   :  { %6726 = vrot.lane.b32.xlu0 %v17500_v36, %s17802_s5 }
0x18f7   :  { %v6727_v47 = vpop.permute.xlu0 %6726 }
0x18f8   :  { %v6729_v33 = vmul.f32 %v6727_v47, %v6724_v22 }
0x18fa   :  { %v18961_v50 = vadd.f32 %v6730_v16, %v6729_v33 }
0x18fc   :  { %6736 = vrot.lane.b32.xlu1 %v18961_v50, %s17802_s5 }
0x196e   :  { %v6737_v63 = vpop.permute.xlu1 %6736 }
0x196f   :  { %v6738_v46 = vsel %vm2570_vm14, %v6737_v63, 0 }
0x1970   :  { %v6809_v45 = vand.u32 4294901760, %v6738_v46 }
0x1972   :  { %v6810_v10 = vsub.f32 %v6738_v46, %v6809_v45  ;;  %16639 = vmatmul.mubr.f32.vlgmr.msra.gmra.mxu1 %v6809_v45 }
0x1973   :  { %16653 = vmatpush3.msra.mxu1 %v18166_v42  ;;  %16660 = vmatprep.mubr.msk.f32.mxu1 %vm17801_vm10, %v19933_v37 }
0x1974   :  { %v6811_v53 = vand.u32 4294901760, %v6810_v10  ;;  %16654 = vmatprep.subr.mxu1 %v19933_v37 }
0x1975   :  { %16655 = vmatpush3.msra.mxu1 %v18180_v18 }
0x1976   :  { %v6812_v56 = vsub.f32 %v6810_v10, %v6811_v53  ;;  %16656 = vmatprep.subr.mxu1 %v19933_v37 }
0x1977   :  { %16657 = vmatpush3.msra.mxu1 %v18189_v20 }
0x1978   :  { %v6813_v48 = vand.u32 4294901760, %v6812_v56  ;;  %16658 = vmatprep.subr.mxu1 %v19933_v37 }
0x1979   :  { %16659 = vmatpush3.msra.mxu1 %v18202_v25 }
0x197a   :  { %16661 = vmatmul.mubr.f32.vlgmr.msra.gmra.mxu1 %v6811_v53  ;;  %16674 = vmatprep.subr.mxu1 %v19933_v37 }
0x197b   :  { %16628 = vmatmul.mubr.f32.vlgmr.msra.gmra.mxu0 %v6813_v48  ;;  %16675 = vmatpush3.msra.mxu1 %v18166_v42 }
0x197c   :  { %16642 = vmatpush3.msra.mxu0 %v18185_v19  ;;  %16676 = vmatprep.subr.mxu1 %v19933_v37 }
0x197d   :  { %16643 = vmatprep.subr.mxu0 %v19933_v37  ;;  %16677 = vmatpush3.msra.mxu1 %v18180_v18 }
0x197e   :  { %16644 = vmatpush3.msra.mxu0 %v18197_v23  ;;  %16678 = vmatprep.subr.mxu1 %v19933_v37 }
0x197f   :  { %16645 = vmatprep.subr.mxu0 %v19933_v37  ;;  %16679 = vmatpush3.msra.mxu1 %v18189_v20 }
0x1980   :  { %16646 = vmatpush3.msra.mxu0 %v18205_v26  ;;  %16680 = vmatprep.subr.mxu1 %v19933_v37 }
0x1981   :  { %16647 = vmatprep.subr.mxu0 %v19933_v37  ;;  %16649 = vmatprep.mubr.msk.f32.mxu0 %vm17801_vm10, %v19933_v37 }
0x1982   :  { %16648 = vmatpush3.msra.mxu0 %v18218_v31  ;;  %16681 = vmatpush3.msra.mxu1 %v18202_v25 }
0x1983   :  { %16682 = vmatprep.mubr.msk.f32.mxu1 %vm17801_vm10, %v19933_v37  ;;  %16650 = vmatmul.mubr.f32.vlgmr.msra.gmra.mxu0 %v6810_v10 }
0x1984   :  { %16663 = vmatprep.subr.mxu0 %v19933_v37  ;;  %16683 = vmatmul.mubr.f32.vlgmr.msra.gmra.mxu1 %v6809_v45 }
0x1985   :  { %16664 = vmatpush3.msra.mxu0 %v18200_v24  ;;  %16671 = vmatprep.mubr.msk.f32.mxu0 %vm17801_vm10, %v19933_v37 }
0x1986   :  { %16665 = vmatprep.subr.mxu0 %v19933_v37  ;;  %16696 = vmatprep.subr.mxu1 %v19933_v37 }
0x1987   :  { %16666 = vmatpush3.msra.mxu0 %v18211_v28  ;;  %16697 = vmatpush3.msra.mxu1 %v18228_v34 }
0x1988   :  { %16667 = vmatprep.subr.mxu0 %v19933_v37  ;;  %16698 = vmatprep.subr.mxu1 %v19933_v37 }
0x1989   :  { %16668 = vmatpush3.msra.mxu0 %v18222_v32  ;;  %16699 = vmatpush3.msra.mxu1 %v18241_v27 }
0x198a   :  { %16669 = vmatprep.subr.mxu0 %v19933_v37  ;;  %16700 = vmatprep.subr.mxu1 %v19933_v37 }
0x198b   :  { %16670 = vmatpush3.msra.mxu0 %v18231_v35  ;;  %16701 = vmatpush3.msra.mxu1 %v18248_v38 }
0x198c   :  { %16672 = vmatmul.mubr.f32.vlgmr.msra.gmra.mxu0 %v6809_v45  ;;  %16702 = vmatprep.subr.mxu1 %v19933_v37 }
0x198d   :  { %16703 = vmatpush3.msra.mxu1 %v18256_v39  ;;  %16685 = vmatprep.subr.mxu0 %v19933_v37 }
0x198e   :  { %16704 = vmatprep.mubr.msk.f32.mxu1 %vm17801_vm10, %v19933_v37  ;;  %16718 = vmatprep.subr.mxu1 %v19933_v37 }
0x198f   :  { %16686 = vmatpush3.msra.mxu0 %v18166_v42  ;;  %16693 = vmatprep.mubr.msk.f32.mxu0 %vm17801_vm10, %v19933_v37 }
0x1990   :  { %16687 = vmatprep.subr.mxu0 %v19933_v37 }
0x1991   :  { %16688 = vmatpush3.msra.mxu0 %v18180_v18 }
0x1992   :  { %16689 = vmatprep.subr.mxu0 %v19933_v37 }
0x1993   :  { %16690 = vmatpush3.msra.mxu0 %v18189_v20 }
0x1994   :  { %16691 = vmatprep.subr.mxu0 %v19933_v37 }
0x1995   :  { %16692 = vmatpush3.msra.mxu0 %v18202_v25 }
0x1996   :  { %16707 = vmatprep.subr.mxu0 %v19933_v37 }
0x1a32   :  { %v6906_v12 = vpop.f32.mrf.mxu1 }
0x1a34   :  { %v16640_v3 = vpop.f32.mrf.mxu1 }
0x1a3a   :  { %v7063_v21 = vpop.f32.mrf.mxu1 }
0x1a3b   :  { %v6815_v58 = vpop.f32.mrf.mxu0 }
0x1a3c   :  { %v16662_v4 = vpop.f32.mrf.mxu1  ;;  %v6816_v13 = vadd.f32 %v18808_v30, %v6815_v58 }
0x1a3d   :  { %v16629_v43 = vpop.f32.mrf.mxu0 }
0x1a3e   :  { %v6907_v62 = vadd.f32 %v6906_v12, %v6816_v13 }
0x1a43   :  { %v6986_v60 = vpop.f32.mrf.mxu0 }
0x1a44   :  { %v7221_v2 = vpop.f32.mrf.mxu1  ;;  %v6987_v51 = vadd.f32 %v6986_v60, %v6907_v62 }
0x1a45   :  { %v16651_v9 = vpop.f32.mrf.mxu0 }
0x1a46   :  { %v16684_v57 = vpop.f32.mrf.mxu1  ;;  %v7064_v55 = vadd.f32 %v7063_v21, %v6987_v51 }
0x1a4c   :  { %v7146_v49 = vpop.f32.mrf.mxu0 }
0x1a4d   :  { %v7147_v5 = vadd.f32 %v7146_v49, %v7064_v55 }
0x1a4e   :  { %v16673_v15 = vpop.f32.mrf.mxu0 }
0x1a4f   :  { %v7222_v52 = vadd.f32 %v7221_v2, %v7147_v5 }
0x1a51   :  { %7233 = vrot.lane.b32.xlu0 %v7222_v52, %s17789_s19  ;;  %v7225_v36 = vadd.f32 %v7222_v52, %v18387_v59 }
0x1a53   :  { %v15201_v22 = vmul.f32 -1.442695, %v7225_v36 }
0x1a55   :  { %17501 = vpow2.f32 %v15201_v22 }
0x1a62   :  { %v17502_v47 = vpop.eup %17501 }
0x1a63   :  { %v7229_v16 = vadd.f32 1.0, %v17502_v47 }
0x1a65   :  { %17503 = vrcp.f32 %v7229_v16 }
0x1a72   :  { %v17504_v33 = vpop.eup %17503 }
0x1a73   :  { %v7243_v56 = vsub.f32 1.0, %v17504_v33  ;;  %v7249_v12 = vmul.f32 %v17504_v33, %v18961_v50 }
0x1ac3   :  { %v7234_v63 = vpop.permute.xlu0 %7233 }
0x1ac4   :  { %v7236_v46 = vmul.f32 %v17504_v33, %v7234_v63 }
0x1ac6   :  { %7238 = vrot.lane.b32.xlu1 %v7236_v46, %s17789_s19 }
0x1b38   :  { %v7239_v45 = vpop.permute.xlu1 %7238 }
0x1b39   :  { %v7241_v10 = vadd.f32 %v7239_v45, %v18387_v59 }
0x1b3b   :  { %17505 = vtanh.f32 %v7241_v10 }
0x1b48   :  { %v17506_v53 = vpop.eup %17505 }
0x1b49   :  { %7245 = vrot.lane.b32.xlu0 %v17506_v53, %s17802_s5 }
0x1bbb   :  { %v7246_v48 = vpop.permute.xlu0 %7245 }
0x1bbc   :  { %v7248_v3 = vmul.f32 %v7246_v48, %v7243_v56 }
0x1bbe   :  { %v19033_v21 = vadd.f32 %v7249_v12, %v7248_v3 }
0x1bc0   :  { %7257 = vrot.lane.b32.xlu1 %v19033_v21, %s17802_s5 }
0x1c32   :  { %v7258_v58 = vpop.permute.xlu1 %7257 }
0x1c33   :  { %v7259_v4 = vsel %vm2570_vm14, %v7258_v58, 0 }
0x1c34   :  { %v7330_v43 = vand.u32 4294901760, %v7259_v4 }
0x1c36   :  { %v7331_v13 = vsub.f32 %v7259_v4, %v7330_v43  ;;  %16705 = vmatmul.mubr.f32.vlgmr.msra.gmra.mxu1 %v7330_v43 }
0x1c37   :  { %16719 = vmatpush3.msra.mxu1 %v18166_v42  ;;  %16726 = vmatprep.mubr.msk.f32.mxu1 %vm17801_vm10, %v19933_v37 }
0x1c38   :  { %v7332_v59 = vand.u32 4294901760, %v7331_v13  ;;  %16720 = vmatprep.subr.mxu1 %v19933_v37 }
0x1c39   :  { %16721 = vmatpush3.msra.mxu1 %v18180_v18 }
0x1c3a   :  { %v7333_v50 = vsub.f32 %v7331_v13, %v7332_v59  ;;  %16722 = vmatprep.subr.mxu1 %v19933_v37 }
0x1c3b   :  { %16723 = vmatpush3.msra.mxu1 %v18189_v20 }
0x1c3c   :  { %v7334_v60 = vand.u32 4294901760, %v7333_v50  ;;  %16724 = vmatprep.subr.mxu1 %v19933_v37 }
0x1c3d   :  { %16725 = vmatpush3.msra.mxu1 %v18202_v25 }
0x1c3e   :  { %16727 = vmatmul.mubr.f32.vlgmr.msra.gmra.mxu1 %v7332_v59  ;;  %16740 = vmatprep.subr.mxu1 %v19933_v37 }
0x1c3f   :  { %16694 = vmatmul.mubr.f32.vlgmr.msra.gmra.mxu0 %v7334_v60  ;;  %16741 = vmatpush3.msra.mxu1 %v18166_v42 }
0x1c40   :  { %16708 = vmatpush3.msra.mxu0 %v18185_v19  ;;  %16742 = vmatprep.subr.mxu1 %v19933_v37 }
0x1c41   :  { %16709 = vmatprep.subr.mxu0 %v19933_v37  ;;  %16743 = vmatpush3.msra.mxu1 %v18180_v18 }
0x1c42   :  { %16710 = vmatpush3.msra.mxu0 %v18197_v23  ;;  %16744 = vmatprep.subr.mxu1 %v19933_v37 }
0x1c43   :  { %16711 = vmatprep.subr.mxu0 %v19933_v37  ;;  %16745 = vmatpush3.msra.mxu1 %v18189_v20 }
0x1c44   :  { %16712 = vmatpush3.msra.mxu0 %v18205_v26  ;;  %16746 = vmatprep.subr.mxu1 %v19933_v37 }
0x1c45   :  { %16713 = vmatprep.subr.mxu0 %v19933_v37  ;;  %16715 = vmatprep.mubr.msk.f32.mxu0 %vm17801_vm10, %v19933_v37 }
0x1c46   :  { %16714 = vmatpush3.msra.mxu0 %v18218_v31  ;;  %16747 = vmatpush3.msra.mxu1 %v18202_v25 }
0x1c47   :  { %16748 = vmatprep.mubr.msk.f32.mxu1 %vm17801_vm10, %v19933_v37  ;;  %16716 = vmatmul.mubr.f32.vlgmr.msra.gmra.mxu0 %v7331_v13 }
0x1c48   :  { %16729 = vmatprep.subr.mxu0 %v19933_v37  ;;  %16749 = vmatmul.mubr.f32.vlgmr.msra.gmra.mxu1 %v7330_v43 }
0x1c49   :  { %16730 = vmatpush3.msra.mxu0 %v18200_v24  ;;  %16737 = vmatprep.mubr.msk.f32.mxu0 %vm17801_vm10, %v19933_v37 }
0x1c4a   :  { %16731 = vmatprep.subr.mxu0 %v19933_v37  ;;  %16762 = vmatprep.subr.mxu1 %v19933_v37 }
0x1c4b   :  { %16732 = vmatpush3.msra.mxu0 %v18211_v28  ;;  %16763 = vmatpush3.msra.mxu1 %v18228_v34 }
0x1c4c   :  { %16733 = vmatprep.subr.mxu0 %v19933_v37  ;;  %16764 = vmatprep.subr.mxu1 %v19933_v37 }
0x1c4d   :  { %16734 = vmatpush3.msra.mxu0 %v18222_v32  ;;  %16765 = vmatpush3.msra.mxu1 %v18241_v27 }
0x1c4e   :  { %16735 = vmatprep.subr.mxu0 %v19933_v37  ;;  %16766 = vmatprep.subr.mxu1 %v19933_v37 }
0x1c4f   :  { %16736 = vmatpush3.msra.mxu0 %v18231_v35  ;;  %16767 = vmatpush3.msra.mxu1 %v18248_v38 }
0x1c50   :  { %16738 = vmatmul.mubr.f32.vlgmr.msra.gmra.mxu0 %v7330_v43  ;;  %16768 = vmatprep.subr.mxu1 %v19933_v37 }
0x1c51   :  { %16769 = vmatpush3.msra.mxu1 %v18256_v39  ;;  %16751 = vmatprep.subr.mxu0 %v19933_v37 }
0x1c52   :  { %16770 = vmatprep.mubr.msk.f32.mxu1 %vm17801_vm10, %v19933_v37  ;;  %16784 = vmatprep.subr.mxu1 %v19933_v37 }
0x1c53   :  { %16752 = vmatpush3.msra.mxu0 %v18166_v42  ;;  %16759 = vmatprep.mubr.msk.f32.mxu0 %vm17801_vm10, %v19933_v37 }
0x1c54   :  { %16753 = vmatprep.subr.mxu0 %v19933_v37 }
0x1c55   :  { %16754 = vmatpush3.msra.mxu0 %v18180_v18 }
0x1c56   :  { %16755 = vmatprep.subr.mxu0 %v19933_v37 }
0x1c57   :  { %16756 = vmatpush3.msra.mxu0 %v18189_v20 }
0x1c58   :  { %16757 = vmatprep.subr.mxu0 %v19933_v37 }
0x1c59   :  { %16758 = vmatpush3.msra.mxu0 %v18202_v25 }
0x1c5a   :  { %16773 = vmatprep.subr.mxu0 %v19933_v37 }
0x1cf6   :  { %v7427_v2 = vpop.f32.mrf.mxu1 }
0x1cf8   :  { %v16706_v62 = vpop.f32.mrf.mxu1 }
0x1cfe   :  { %v7584_v9 = vpop.f32.mrf.mxu1 }
0x1cff   :  { %v7336_v57 = vpop.f32.mrf.mxu0 }
0x1d00   :  { %v16728_v51 = vpop.f32.mrf.mxu1  ;;  %v7337_v49 = vadd.f32 %v18808_v30, %v7336_v57 }
0x1d01   :  { %v16695_v55 = vpop.f32.mrf.mxu0 }
0x1d02   :  { %v7428_v52 = vadd.f32 %v7427_v2, %v7337_v49 }
0x1d07   :  { %v7507_v5 = vpop.f32.mrf.mxu0 }
0x1d08   :  { %v7742_v15 = vpop.f32.mrf.mxu1  ;;  %v7508_v47 = vadd.f32 %v7507_v5, %v7428_v52 }
0x1d09   :  { %v16717_v36 = vpop.f32.mrf.mxu0 }
0x1d0a   :  { %v16750_v22 = vpop.f32.mrf.mxu1  ;;  %v7585_v16 = vadd.f32 %v7584_v9, %v7508_v47  ;;  %v19170_v47 = vld [vmem:[#allocation11] ss:$0 sm:$0xff] }
0x1d10   :  { %v7667_v33 = vpop.f32.mrf.mxu0 }
0x1d11   :  { %v7668_v63 = vadd.f32 %v7667_v33, %v7585_v16 }
0x1d12   :  { %v16739_v46 = vpop.f32.mrf.mxu0 }
0x1d13   :  { %v7743_v45 = vadd.f32 %v7742_v15, %v7668_v63 }
0x1d15   :  { %7754 = vrot.lane.b32.xlu0 %v7743_v45, %s17789_s19  ;;  %v7746_v10 = vadd.f32 %v7743_v45, %v18397_v1 }
0x1d17   :  { %v15202_v53 = vmul.f32 -1.442695, %v7746_v10 }
0x1d19   :  { %17507 = vpow2.f32 %v15202_v53 }
0x1d26   :  { %v17508_v56 = vpop.eup %17507 }
0x1d27   :  { %v7750_v48 = vadd.f32 1.0, %v17508_v56 }
0x1d29   :  { %17509 = vrcp.f32 %v7750_v48 }
0x1d36   :  { %v17510_v30 = vpop.eup %17509 }
0x1d37   :  { %v7764_v13 = vsub.f32 1.0, %v17510_v30  ;;  %v7770_v50 = vmul.f32 %v17510_v30, %v19033_v21 }
0x1d87   :  { %v7755_v12 = vpop.permute.xlu0 %7754 }
0x1d88   :  { %v7757_v3 = vmul.f32 %v17510_v30, %v7755_v12 }
0x1d8a   :  { %7759 = vrot.lane.b32.xlu1 %v7757_v3, %s17789_s19 }
0x1dfc   :  { %v7760_v58 = vpop.permute.xlu1 %7759 }
0x1dfd   :  { %v7762_v4 = vadd.f32 %v7760_v58, %v18397_v1 }
0x1dff   :  { %17511 = vtanh.f32 %v7762_v4 }
0x1e0c   :  { %v17512_v43 = vpop.eup %17511 }
0x1e0d   :  { %7766 = vrot.lane.b32.xlu0 %v17512_v43, %s17802_s5 }
0x1e7f   :  { %v7767_v59 = vpop.permute.xlu0 %7766 }
0x1e80   :  { %v7769_v60 = vmul.f32 %v7767_v59, %v7764_v13 }
0x1e82   :  { %v19105_v2 = vadd.f32 %v7770_v50, %v7769_v60 }
0x1e84   :  { %7779 = vrot.lane.b32.xlu1 %v19105_v2, %s17802_s5 }
0x1ef6   :  { %v7780_v62 = vpop.permute.xlu1 %7779 }
0x1ef7   :  { %v7781_v9 = vsel %vm2570_vm14, %v7780_v62, 0 }
0x1ef8   :  { %v7852_v57 = vand.u32 4294901760, %v7781_v9 }
0x1efa   :  { %v7853_v51 = vsub.f32 %v7781_v9, %v7852_v57  ;;  %16771 = vmatmul.mubr.f32.vlgmr.msra.gmra.mxu1 %v7852_v57 }
0x1efb   :  { %16785 = vmatpush3.msra.mxu1 %v18166_v42  ;;  %16792 = vmatprep.mubr.msk.f32.mxu1 %vm17801_vm10, %v19933_v37 }
0x1efc   :  { %v7854_v1 = vand.u32 4294901760, %v7853_v51  ;;  %16786 = vmatprep.subr.mxu1 %v19933_v37 }
0x1efd   :  { %16787 = vmatpush3.msra.mxu1 %v18180_v18 }
0x1efe   :  { %v7855_v21 = vsub.f32 %v7853_v51, %v7854_v1  ;;  %16788 = vmatprep.subr.mxu1 %v19933_v37 }
0x1eff   :  { %16789 = vmatpush3.msra.mxu1 %v18189_v20 }
0x1f00   :  { %v7856_v55 = vand.u32 4294901760, %v7855_v21  ;;  %16790 = vmatprep.subr.mxu1 %v19933_v37 }
0x1f01   :  { %16791 = vmatpush3.msra.mxu1 %v18202_v25 }
0x1f02   :  { %16793 = vmatmul.mubr.f32.vlgmr.msra.gmra.mxu1 %v7854_v1  ;;  %16806 = vmatprep.subr.mxu1 %v19933_v37 }
0x1f03   :  { %16760 = vmatmul.mubr.f32.vlgmr.msra.gmra.mxu0 %v7856_v55  ;;  %16807 = vmatpush3.msra.mxu1 %v18166_v42 }
0x1f04   :  { %16774 = vmatpush3.msra.mxu0 %v18185_v19  ;;  %16808 = vmatprep.subr.mxu1 %v19933_v37 }
0x1f05   :  { %16775 = vmatprep.subr.mxu0 %v19933_v37  ;;  %16809 = vmatpush3.msra.mxu1 %v18180_v18 }
0x1f06   :  { %16776 = vmatpush3.msra.mxu0 %v18197_v23  ;;  %16810 = vmatprep.subr.mxu1 %v19933_v37 }
0x1f07   :  { %16777 = vmatprep.subr.mxu0 %v19933_v37  ;;  %16811 = vmatpush3.msra.mxu1 %v18189_v20 }
0x1f08   :  { %16778 = vmatpush3.msra.mxu0 %v18205_v26  ;;  %16812 = vmatprep.subr.mxu1 %v19933_v37 }
0x1f09   :  { %16779 = vmatprep.subr.mxu0 %v19933_v37  ;;  %16781 = vmatprep.mubr.msk.f32.mxu0 %vm17801_vm10, %v19933_v37 }
0x1f0a   :  { %16780 = vmatpush3.msra.mxu0 %v18218_v31  ;;  %16813 = vmatpush3.msra.mxu1 %v18202_v25 }
0x1f0b   :  { %16814 = vmatprep.mubr.msk.f32.mxu1 %vm17801_vm10, %v19933_v37  ;;  %16782 = vmatmul.mubr.f32.vlgmr.msra.gmra.mxu0 %v7853_v51 }
0x1f0c   :  { %16795 = vmatprep.subr.mxu0 %v19933_v37  ;;  %16815 = vmatmul.mubr.f32.vlgmr.msra.gmra.mxu1 %v7852_v57 }
0x1f0d   :  { %16796 = vmatpush3.msra.mxu0 %v18200_v24  ;;  %16803 = vmatprep.mubr.msk.f32.mxu0 %vm17801_vm10, %v19933_v37 }
0x1f0e   :  { %16797 = vmatprep.subr.mxu0 %v19933_v37  ;;  %16828 = vmatprep.subr.mxu1 %v19933_v37 }
0x1f0f   :  { %16798 = vmatpush3.msra.mxu0 %v18211_v28  ;;  %16829 = vmatpush3.msra.mxu1 %v18228_v34 }
0x1f10   :  { %16799 = vmatprep.subr.mxu0 %v19933_v37  ;;  %16830 = vmatprep.subr.mxu1 %v19933_v37 }
0x1f11   :  { %16800 = vmatpush3.msra.mxu0 %v18222_v32  ;;  %16831 = vmatpush3.msra.mxu1 %v18241_v27 }
0x1f12   :  { %16801 = vmatprep.subr.mxu0 %v19933_v37  ;;  %16832 = vmatprep.subr.mxu1 %v19933_v37 }
0x1f13   :  { %16802 = vmatpush3.msra.mxu0 %v18231_v35  ;;  %16833 = vmatpush3.msra.mxu1 %v18248_v38 }
0x1f14   :  { %16804 = vmatmul.mubr.f32.vlgmr.msra.gmra.mxu0 %v7852_v57  ;;  %16834 = vmatprep.subr.mxu1 %v19933_v37 }
0x1f15   :  { %16835 = vmatpush3.msra.mxu1 %v18256_v39  ;;  %16817 = vmatprep.subr.mxu0 %v19933_v37 }
0x1f16   :  { %16836 = vmatprep.mubr.msk.f32.mxu1 %vm17801_vm10, %v19933_v37  ;;  %16850 = vmatprep.subr.mxu1 %v19933_v37 }
0x1f17   :  { %16818 = vmatpush3.msra.mxu0 %v18166_v42  ;;  %16825 = vmatprep.mubr.msk.f32.mxu0 %vm17801_vm10, %v19933_v37 }
0x1f18   :  { %16819 = vmatprep.subr.mxu0 %v19933_v37 }
0x1f19   :  { %16820 = vmatpush3.msra.mxu0 %v18180_v18 }
0x1f1a   :  { %16821 = vmatprep.subr.mxu0 %v19933_v37 }
0x1f1b   :  { %16822 = vmatpush3.msra.mxu0 %v18189_v20 }
0x1f1c   :  { %16823 = vmatprep.subr.mxu0 %v19933_v37 }
0x1f1d   :  { %16824 = vmatpush3.msra.mxu0 %v18202_v25 }
0x1f1e   :  { %16839 = vmatprep.subr.mxu0 %v19933_v37 }
0x1fba   :  { %v7949_v49 = vpop.f32.mrf.mxu1 }
0x1fbc   :  { %v16772_v5 = vpop.f32.mrf.mxu1 }
0x1fc2   :  { %v8106_v15 = vpop.f32.mrf.mxu1 }
0x1fc3   :  { %v7858_v52 = vpop.f32.mrf.mxu0 }
0x1fc4   :  { %v16794_v36 = vpop.f32.mrf.mxu1  ;;  %v7859_v16 = vadd.f32 %v19170_v47, %v7858_v52 }
0x1fc5   :  { %v16761_v22 = vpop.f32.mrf.mxu0 }
0x1fc6   :  { %v7950_v46 = vadd.f32 %v7949_v49, %v7859_v16 }
0x1fcb   :  { %v8029_v33 = vpop.f32.mrf.mxu0 }
0x1fcc   :  { %v8264_v63 = vpop.f32.mrf.mxu1  ;;  %v8030_v53 = vadd.f32 %v8029_v33, %v7950_v46 }
0x1fcd   :  { %v16783_v45 = vpop.f32.mrf.mxu0 }
0x1fce   :  { %v16816_v10 = vpop.f32.mrf.mxu1  ;;  %v8107_v56 = vadd.f32 %v8106_v15, %v8030_v53 }
0x1fd4   :  { %v8189_v48 = vpop.f32.mrf.mxu0 }
0x1fd5   :  { %v8190_v30 = vadd.f32 %v8189_v48, %v8107_v56 }
0x1fd6   :  { %v16805_v12 = vpop.f32.mrf.mxu0 }
0x1fd7   :  { %v8265_v3 = vadd.f32 %v8264_v63, %v8190_v30 }
0x1fd9   :  { %8276 = vrot.lane.b32.xlu0 %v8265_v3, %s17789_s19  ;;  %v8268_v58 = vadd.f32 %v8265_v3, %v18391_v8 }
0x1fdb   :  { %v15203_v4 = vmul.f32 -1.442695, %v8268_v58 }
0x1fdd   :  { %17513 = vpow2.f32 %v15203_v4 }
0x1fea   :  { %v17514_v43 = vpop.eup %17513 }
0x1feb   :  { %v8272_v13 = vadd.f32 1.0, %v17514_v43 }
0x1fed   :  { %17515 = vrcp.f32 %v8272_v13 }
0x1ffa   :  { %v17516_v59 = vpop.eup %17515 }
0x1ffb   :  { %v8286_v51 = vsub.f32 1.0, %v17516_v59  ;;  %v8292_v21 = vmul.f32 %v17516_v59, %v19105_v2 }
0x204b   :  { %v8277_v50 = vpop.permute.xlu0 %8276 }
0x204c   :  { %v8279_v60 = vmul.f32 %v17516_v59, %v8277_v50 }
0x204e   :  { %8281 = vrot.lane.b32.xlu1 %v8279_v60, %s17789_s19 }
0x20c0   :  { %v8282_v62 = vpop.permute.xlu1 %8281 }
0x20c1   :  { %v8284_v9 = vadd.f32 %v8282_v62, %v18391_v8 }
0x20c3   :  { %17517 = vtanh.f32 %v8284_v9 }
0x20d0   :  { %v17518_v57 = vpop.eup %17517 }
0x20d1   :  { %8288 = vrot.lane.b32.xlu0 %v17518_v57, %s17802_s5 }
0x2143   :  { %v8289_v1 = vpop.permute.xlu0 %8288 }
0x2144   :  { %v8291_v55 = vmul.f32 %v8289_v1, %v8286_v51 }
0x2146   :  { %v19179_v49 = vadd.f32 %v8292_v21, %v8291_v55 }
0x2148   :  { %8298 = vrot.lane.b32.xlu1 %v19179_v49, %s17802_s5 }
0x21ba   :  { %v8299_v5 = vpop.permute.xlu1 %8298 }
0x21bb   :  { %v8300_v15 = vsel %vm2570_vm14, %v8299_v5, 0 }
0x21bc   :  { %v8371_v52 = vand.u32 4294901760, %v8300_v15 }
0x21be   :  { %v8372_v36 = vsub.f32 %v8300_v15, %v8371_v52  ;;  %16837 = vmatmul.mubr.f32.vlgmr.msra.gmra.mxu1 %v8371_v52 }
0x21bf   :  { %16851 = vmatpush3.msra.mxu1 %v18166_v42  ;;  %16858 = vmatprep.mubr.msk.f32.mxu1 %vm17801_vm10, %v19933_v37 }
0x21c0   :  { %v8373_v8 = vand.u32 4294901760, %v8372_v36  ;;  %16852 = vmatprep.subr.mxu1 %v19933_v37 }
0x21c1   :  { %16853 = vmatpush3.msra.mxu1 %v18180_v18 }
0x21c2   :  { %v8374_v2 = vsub.f32 %v8372_v36, %v8373_v8  ;;  %16854 = vmatprep.subr.mxu1 %v19933_v37 }
0x21c3   :  { %16855 = vmatpush3.msra.mxu1 %v18189_v20 }
0x21c4   :  { %v8375_v22 = vand.u32 4294901760, %v8374_v2  ;;  %16856 = vmatprep.subr.mxu1 %v19933_v37 }
0x21c5   :  { %16857 = vmatpush3.msra.mxu1 %v18202_v25 }
0x21c6   :  { %16859 = vmatmul.mubr.f32.vlgmr.msra.gmra.mxu1 %v8373_v8  ;;  %16872 = vmatprep.subr.mxu1 %v19933_v37 }
0x21c7   :  { %16826 = vmatmul.mubr.f32.vlgmr.msra.gmra.mxu0 %v8375_v22  ;;  %16873 = vmatpush3.msra.mxu1 %v18166_v42 }
0x21c8   :  { %16840 = vmatpush3.msra.mxu0 %v18185_v19  ;;  %16874 = vmatprep.subr.mxu1 %v19933_v37 }
0x21c9   :  { %16841 = vmatprep.subr.mxu0 %v19933_v37  ;;  %16875 = vmatpush3.msra.mxu1 %v18180_v18 }
0x21ca   :  { %16842 = vmatpush3.msra.mxu0 %v18197_v23  ;;  %16876 = vmatprep.subr.mxu1 %v19933_v37 }
0x21cb   :  { %16843 = vmatprep.subr.mxu0 %v19933_v37  ;;  %16877 = vmatpush3.msra.mxu1 %v18189_v20 }
0x21cc   :  { %16844 = vmatpush3.msra.mxu0 %v18205_v26  ;;  %16878 = vmatprep.subr.mxu1 %v19933_v37 }
0x21cd   :  { %16845 = vmatprep.subr.mxu0 %v19933_v37  ;;  %16847 = vmatprep.mubr.msk.f32.mxu0 %vm17801_vm10, %v19933_v37 }
0x21ce   :  { %16846 = vmatpush3.msra.mxu0 %v18218_v31  ;;  %16879 = vmatpush3.msra.mxu1 %v18202_v25 }
0x21cf   :  { %16880 = vmatprep.mubr.msk.f32.mxu1 %vm17801_vm10, %v19933_v37  ;;  %16848 = vmatmul.mubr.f32.vlgmr.msra.gmra.mxu0 %v8372_v36 }
0x21d0   :  { %16861 = vmatprep.subr.mxu0 %v19933_v37  ;;  %16881 = vmatmul.mubr.f32.vlgmr.msra.gmra.mxu1 %v8371_v52 }
0x21d1   :  { %16862 = vmatpush3.msra.mxu0 %v18200_v24  ;;  %16869 = vmatprep.mubr.msk.f32.mxu0 %vm17801_vm10, %v19933_v37 }
0x21d2   :  { %16863 = vmatprep.subr.mxu0 %v19933_v37  ;;  %16894 = vmatprep.subr.mxu1 %v19933_v37 }
0x21d3   :  { %16864 = vmatpush3.msra.mxu0 %v18211_v28  ;;  %16895 = vmatpush3.msra.mxu1 %v18228_v34 }
0x21d4   :  { %16865 = vmatprep.subr.mxu0 %v19933_v37  ;;  %16896 = vmatprep.subr.mxu1 %v19933_v37 }
0x21d5   :  { %16866 = vmatpush3.msra.mxu0 %v18222_v32  ;;  %16897 = vmatpush3.msra.mxu1 %v18241_v27 }
0x21d6   :  { %16867 = vmatprep.subr.mxu0 %v19933_v37  ;;  %16898 = vmatprep.subr.mxu1 %v19933_v37 }
0x21d7   :  { %16868 = vmatpush3.msra.mxu0 %v18231_v35  ;;  %16899 = vmatpush3.msra.mxu1 %v18248_v38 }
0x21d8   :  { %16870 = vmatmul.mubr.f32.vlgmr.msra.gmra.mxu0 %v8371_v52  ;;  %16900 = vmatprep.subr.mxu1 %v19933_v37 }
0x21d9   :  { %16901 = vmatpush3.msra.mxu1 %v18256_v39  ;;  %16883 = vmatprep.subr.mxu0 %v19933_v37 }
0x21da   :  { %16902 = vmatprep.mubr.msk.f32.mxu1 %vm17801_vm10, %v19933_v37  ;;  %16916 = vmatprep.subr.mxu1 %v19933_v37 }
0x21db   :  { %16884 = vmatpush3.msra.mxu0 %v18166_v42  ;;  %16891 = vmatprep.mubr.msk.f32.mxu0 %vm17801_vm10, %v19933_v37 }
0x21dc   :  { %16885 = vmatprep.subr.mxu0 %v19933_v37 }
0x21dd   :  { %16886 = vmatpush3.msra.mxu0 %v18180_v18 }
0x21de   :  { %16887 = vmatprep.subr.mxu0 %v19933_v37 }
0x21df   :  { %16888 = vmatpush3.msra.mxu0 %v18189_v20 }
0x21e0   :  { %16889 = vmatprep.subr.mxu0 %v19933_v37 }
0x21e1   :  { %16890 = vmatpush3.msra.mxu0 %v18202_v25 }
0x21e2   :  { %16905 = vmatprep.subr.mxu0 %v19933_v37 }
0x227e   :  { %v8468_v16 = vpop.f32.mrf.mxu1 }
0x2280   :  { %v16838_v33 = vpop.f32.mrf.mxu1 }
0x2286   :  { %v8625_v63 = vpop.f32.mrf.mxu1 }
0x2287   :  { %v8377_v46 = vpop.f32.mrf.mxu0 }
0x2288   :  { %v16860_v45 = vpop.f32.mrf.mxu1  ;;  %v8378_v53 = vadd.f32 %v19170_v47, %v8377_v46 }
0x2289   :  { %v16827_v10 = vpop.f32.mrf.mxu0 }
0x228a   :  { %v8469_v30 = vadd.f32 %v8468_v16, %v8378_v53 }
0x228f   :  { %v8548_v56 = vpop.f32.mrf.mxu0 }
0x2290   :  { %v8783_v48 = vpop.f32.mrf.mxu1  ;;  %v8549_v58 = vadd.f32 %v8548_v56, %v8469_v30 }
0x2291   :  { %v16849_v12 = vpop.f32.mrf.mxu0 }
0x2292   :  { %v16882_v3 = vpop.f32.mrf.mxu1  ;;  %v8626_v4 = vadd.f32 %v8625_v63, %v8549_v58 }
0x2298   :  { %v8708_v43 = vpop.f32.mrf.mxu0 }
0x2299   :  { %v8709_v13 = vadd.f32 %v8708_v43, %v8626_v4 }
0x229a   :  { %v16871_v59 = vpop.f32.mrf.mxu0 }
0x229b   :  { %v8784_v50 = vadd.f32 %v8783_v48, %v8709_v13 }
0x229d   :  { %8795 = vrot.lane.b32.xlu0 %v8784_v50, %s17789_s19  ;;  %v8787_v60 = vadd.f32 %v8784_v50, %v18364_v6 }
0x229f   :  { %v15204_v62 = vmul.f32 -1.442695, %v8787_v60 }
0x22a1   :  { %17519 = vpow2.f32 %v15204_v62 }
0x22ae   :  { %v17520_v9 = vpop.eup %17519 }
0x22af   :  { %v8791_v57 = vadd.f32 1.0, %v17520_v9 }
0x22b1   :  { %17521 = vrcp.f32 %v8791_v57 }
0x22be   :  { %v17522_v51 = vpop.eup %17521 }
0x22bf   :  { %v8805_v52 = vsub.f32 1.0, %v17522_v51  ;;  %v8811_v8 = vmul.f32 %v17522_v51, %v19179_v49 }
0x230f   :  { %v8796_v1 = vpop.permute.xlu0 %8795 }
0x2310   :  { %v8798_v21 = vmul.f32 %v17522_v51, %v8796_v1 }
0x2312   :  { %8800 = vrot.lane.b32.xlu1 %v8798_v21, %s17789_s19 }
0x2384   :  { %v8801_v55 = vpop.permute.xlu1 %8800 }
0x2385   :  { %v8803_v5 = vadd.f32 %v8801_v55, %v18364_v6 }
0x2387   :  { %17523 = vtanh.f32 %v8803_v5 }
0x2394   :  { %v17524_v15 = vpop.eup %17523 }
0x2395   :  { %8807 = vrot.lane.b32.xlu0 %v17524_v15, %s17802_s5 }
0x2407   :  { %v8808_v36 = vpop.permute.xlu0 %8807 }
0x2408   :  { %v8810_v2 = vmul.f32 %v8808_v36, %v8805_v52 }
0x240a   :  { %v19251_v22 = vadd.f32 %v8811_v8, %v8810_v2 }
0x240c   :  { %8819 = vrot.lane.b32.xlu1 %v19251_v22, %s17802_s5 }
0x247e   :  { %v8820_v16 = vpop.permute.xlu1 %8819 }
0x247f   :  { %v8821_v33 = vsel %vm2570_vm14, %v8820_v16, 0 }
0x2480   :  { %v8892_v63 = vand.u32 4294901760, %v8821_v33 }
0x2482   :  { %v8893_v46 = vsub.f32 %v8821_v33, %v8892_v63  ;;  %16903 = vmatmul.mubr.f32.vlgmr.msra.gmra.mxu1 %v8892_v63 }
0x2483   :  { %16917 = vmatpush3.msra.mxu1 %v18166_v42  ;;  %16924 = vmatprep.mubr.msk.f32.mxu1 %vm17801_vm10, %v19933_v37 }
0x2484   :  { %v8894_v6 = vand.u32 4294901760, %v8893_v46  ;;  %16918 = vmatprep.subr.mxu1 %v19933_v37 }
0x2485   :  { %16919 = vmatpush3.msra.mxu1 %v18180_v18 }
0x2486   :  { %v8895_v49 = vsub.f32 %v8893_v46, %v8894_v6  ;;  %16920 = vmatprep.subr.mxu1 %v19933_v37 }
0x2487   :  { %16921 = vmatpush3.msra.mxu1 %v18189_v20 }
0x2488   :  { %v8896_v45 = vand.u32 4294901760, %v8895_v49  ;;  %16922 = vmatprep.subr.mxu1 %v19933_v37  ;;  %v2557_v49 = vld [vmem:[#allocation13 + $0x8] sm:$0xff] }
0x2489   :  { %16923 = vmatpush3.msra.mxu1 %v18202_v25 }
0x248a   :  { %16925 = vmatmul.mubr.f32.vlgmr.msra.gmra.mxu1 %v8894_v6  ;;  %16938 = vmatprep.subr.mxu1 %v19933_v37 }
0x248b   :  { %16892 = vmatmul.mubr.f32.vlgmr.msra.gmra.mxu0 %v8896_v45  ;;  %16939 = vmatpush3.msra.mxu1 %v18166_v42  ;;  %v2556_v45 = vld [vmem:[#allocation13] sm:$0xff] }
0x248c   :  { %16906 = vmatpush3.msra.mxu0 %v18185_v19  ;;  %16940 = vmatprep.subr.mxu1 %v19933_v37 }
0x248d   :  { %16907 = vmatprep.subr.mxu0 %v19933_v37  ;;  %16941 = vmatpush3.msra.mxu1 %v18180_v18 }
0x248e   :  { %16908 = vmatpush3.msra.mxu0 %v18197_v23  ;;  %16942 = vmatprep.subr.mxu1 %v19933_v37 }
0x248f   :  { %16909 = vmatprep.subr.mxu0 %v19933_v37  ;;  %16943 = vmatpush3.msra.mxu1 %v18189_v20 }
0x2490   :  { %16910 = vmatpush3.msra.mxu0 %v18205_v26  ;;  %16944 = vmatprep.subr.mxu1 %v19933_v37 }
0x2491   :  { %16911 = vmatprep.subr.mxu0 %v19933_v37  ;;  %16913 = vmatprep.mubr.msk.f32.mxu0 %vm17801_vm10, %v19933_v37 }
0x2492   :  { %16912 = vmatpush3.msra.mxu0 %v18218_v31  ;;  %16945 = vmatpush3.msra.mxu1 %v18202_v25 }
0x2493   :  { %16946 = vmatprep.mubr.msk.f32.mxu1 %vm17801_vm10, %v19933_v37  ;;  %16914 = vmatmul.mubr.f32.vlgmr.msra.gmra.mxu0 %v8893_v46 }
0x2494   :  { %16927 = vmatprep.subr.mxu0 %v19933_v37  ;;  %16947 = vmatmul.mubr.f32.vlgmr.msra.gmra.mxu1 %v8892_v63 }
0x2495   :  { %16928 = vmatpush3.msra.mxu0 %v18200_v24  ;;  %16935 = vmatprep.mubr.msk.f32.mxu0 %vm17801_vm10, %v19933_v37 }
0x2496   :  { %16929 = vmatprep.subr.mxu0 %v19933_v37  ;;  %16960 = vmatprep.subr.mxu1 %v19933_v37 }
0x2497   :  { %16930 = vmatpush3.msra.mxu0 %v18211_v28  ;;  %16961 = vmatpush3.msra.mxu1 %v18228_v34 }
0x2498   :  { %16931 = vmatprep.subr.mxu0 %v19933_v37  ;;  %16962 = vmatprep.subr.mxu1 %v19933_v37 }
0x2499   :  { %16932 = vmatpush3.msra.mxu0 %v18222_v32  ;;  %16963 = vmatpush3.msra.mxu1 %v18241_v27 }
0x249a   :  { %16933 = vmatprep.subr.mxu0 %v19933_v37  ;;  %16964 = vmatprep.subr.mxu1 %v19933_v37 }
0x249b   :  { %16934 = vmatpush3.msra.mxu0 %v18231_v35  ;;  %16965 = vmatpush3.msra.mxu1 %v18248_v38 }
0x249c   :  { %16936 = vmatmul.mubr.f32.vlgmr.msra.gmra.mxu0 %v8892_v63  ;;  %16966 = vmatprep.subr.mxu1 %v19933_v37 }
0x249d   :  { %16967 = vmatpush3.msra.mxu1 %v18256_v39  ;;  %16949 = vmatprep.subr.mxu0 %v19933_v37 }
0x249e   :  { %16968 = vmatprep.mubr.msk.f32.mxu1 %vm17801_vm10, %v19933_v37  ;;  %16982 = vmatprep.subr.mxu1 %v19933_v37 }
0x249f   :  { %16950 = vmatpush3.msra.mxu0 %v18166_v42  ;;  %16957 = vmatprep.mubr.msk.f32.mxu0 %vm17801_vm10, %v19933_v37 }
0x24a0   :  { %16951 = vmatprep.subr.mxu0 %v19933_v37 }
0x24a1   :  { %16952 = vmatpush3.msra.mxu0 %v18180_v18 }
0x24a2   :  { %16953 = vmatprep.subr.mxu0 %v19933_v37 }
0x24a3   :  { %16954 = vmatpush3.msra.mxu0 %v18189_v20 }
0x24a4   :  { %16955 = vmatprep.subr.mxu0 %v19933_v37 }
0x24a5   :  { %16956 = vmatpush3.msra.mxu0 %v18202_v25 }
0x24a6   :  { %16971 = vmatprep.subr.mxu0 %v19933_v37 }
0x2542   :  { %v8989_v34 = vpop.f32.mrf.mxu1 }
0x2544   :  { %v16904_v27 = vpop.f32.mrf.mxu1 }
0x2545   :  { %v19335_v27 = vand.u32 4294901760, %v2556_v45 }
0x254a   :  { %v9146_v38 = vpop.f32.mrf.mxu1 }
0x254b   :  { %v8898_v39 = vpop.f32.mrf.mxu0 }
0x254c   :  { %v16926_v10 = vpop.f32.mrf.mxu1  ;;  %v8899_v56 = vadd.f32 %v19170_v47, %v8898_v39 }
0x254d   :  { %v16893_v53 = vpop.f32.mrf.mxu0 }
0x254e   :  { %v8990_v12 = vadd.f32 %v8989_v34, %v8899_v56  ;;  %v19345_v53 = vsub.f32 %v2556_v45, %v19335_v27  ;;  %v9854_v45 = vrot.slane %v18406_v11, 2 }
0x2553   :  { %v9069_v48 = vpop.f32.mrf.mxu0 }
0x2554   :  { %v9304_v30 = vpop.f32.mrf.mxu1  ;;  %v9070_v4 = vadd.f32 %v9069_v48, %v8990_v12  ;;  %v19357_v48 = vand.u32 4294901760, %v19345_v53 }
0x2555   :  { %v16915_v3 = vpop.f32.mrf.mxu0 }
0x2556   :  { %v16948_v58 = vpop.f32.mrf.mxu1  ;;  %v9147_v43 = vadd.f32 %v9146_v38, %v9070_v4 }
0x255c   :  { %v9229_v13 = vpop.f32.mrf.mxu0 }
0x255d   :  { %v9230_v59 = vadd.f32 %v9229_v13, %v9147_v43 }
0x255e   :  { %v16937_v50 = vpop.f32.mrf.mxu0 }
0x255f   :  { %v9305_v60 = vadd.f32 %v9304_v30, %v9230_v59 }
0x2561   :  { %9316 = vrot.lane.b32.xlu0 %v9305_v60, %s17789_s19  ;;  %v9308_v62 = vadd.f32 %v9305_v60, %v18394_v0 }
0x2563   :  { %v15205_v9 = vmul.f32 -1.442695, %v9308_v62 }
0x2565   :  { %17525 = vpow2.f32 %v15205_v9  ;;  %v19447_v9 = vld [vmem:[#allocation16] ss:$0 sm:$0xff] }
0x2572   :  { %v17526_v57 = vpop.eup %17525 }
0x2573   :  { %v9312_v51 = vadd.f32 1.0, %v17526_v57 }
0x2575   :  { %17527 = vrcp.f32 %v9312_v51 }
0x2582   :  { %v17528_v1 = vpop.eup %17527 }
0x2583   :  { %v9326_v36 = vsub.f32 1.0, %v17528_v1  ;;  %v9332_v2 = vmul.f32 %v17528_v1, %v19251_v22  ;;  %v19331_v22 = vand.u32 4294901760, %v2557_v49 }
0x2585   :  { %v19340_v39 = vsub.f32 %v2557_v49, %v19331_v22 }
0x2587   :  { %v19350_v56 = vand.u32 4294901760, %v19340_v39 }
0x25d3   :  { %v9317_v21 = vpop.permute.xlu0 %9316 }
0x25d4   :  { %v9319_v55 = vmul.f32 %v17528_v1, %v9317_v21 }
0x25d6   :  { %9321 = vrot.lane.b32.xlu1 %v9319_v55, %s17789_s19 }
0x2648   :  { %v9322_v5 = vpop.permute.xlu1 %9321 }
0x2649   :  { %v9324_v15 = vadd.f32 %v9322_v5, %v18394_v0 }
0x264b   :  { %17529 = vtanh.f32 %v9324_v15 }
0x2658   :  { %v17530_v52 = vpop.eup %17529 }
0x2659   :  { %9328 = vrot.lane.b32.xlu0 %v17530_v52, %s17802_s5 }
0x26cb   :  { %v9329_v8 = vpop.permute.xlu0 %9328 }
0x26cc   :  { %v9331_v16 = vmul.f32 %v9329_v8, %v9326_v36 }
0x26ce   :  { %v19323_v33 = vadd.f32 %v9332_v2, %v9331_v16 }
0x26d0   :  { %9338 = vrot.lane.b32.xlu1 %v19323_v33, %s17802_s5 }
0x2742   :  { %v9339_v63 = vpop.permute.xlu1 %9338 }
0x2743   :  { %v9340_v46 = vsel %vm2570_vm14, %v9339_v63, 0 }
0x2744   :  { %v9411_v6 = vand.u32 4294901760, %v9340_v46 }
0x2746   :  { %v9412_v0 = vsub.f32 %v9340_v46, %v9411_v6  ;;  %16969 = vmatmul.mubr.f32.vlgmr.msra.gmra.mxu1 %v9411_v6 }
0x2747   :  { %16983 = vmatpush3.msra.mxu1 %v18166_v42  ;;  %16990 = vmatprep.mubr.msk.f32.mxu1 %vm17801_vm10, %v19933_v37 }
0x2748   :  { %v9413_v34 = vand.u32 4294901760, %v9412_v0  ;;  %16984 = vmatprep.subr.mxu1 %v19933_v37 }
0x2749   :  { %16985 = vmatpush3.msra.mxu1 %v18180_v18 }
0x274a   :  { %v9414_v38 = vsub.f32 %v9412_v0, %v9413_v34  ;;  %16986 = vmatprep.subr.mxu1 %v19933_v37 }
0x274b   :  { %16987 = vmatpush3.msra.mxu1 %v18189_v20 }
0x274c   :  { %v9415_v10 = vand.u32 4294901760, %v9414_v38  ;;  %16988 = vmatprep.subr.mxu1 %v19933_v37  ;;  %v9859_v38 = vrot.slane %v18406_v11, 1 }
0x274d   :  { %16989 = vmatpush3.msra.mxu1 %v18202_v25 }
0x274e   :  { %16991 = vmatmul.mubr.f32.vlgmr.msra.gmra.mxu1 %v9413_v34  ;;  %17004 = vmatprep.subr.mxu1 %v19933_v37 }
0x274f   :  { %16958 = vmatmul.mubr.f32.vlgmr.msra.gmra.mxu0 %v9415_v10  ;;  %17005 = vmatpush3.msra.mxu1 %v18166_v42  ;;  %v9986_v42 = vsub.f32 %v19340_v39, %v19350_v56 }
0x2750   :  { %16972 = vmatpush3.msra.mxu0 %v18185_v19  ;;  %17006 = vmatprep.subr.mxu1 %v19933_v37 }
0x2751   :  { %16973 = vmatprep.subr.mxu0 %v19933_v37  ;;  %17007 = vmatpush3.msra.mxu1 %v18180_v18  ;;  %v9993_v18 = vsub.f32 %v19345_v53, %v19357_v48  ;;  %v19376_v19 = vand.u32 4294901760, %v9986_v42  ;;  %v9861_v42 = vrot.slane %v18408_v54, 6 }
0x2752   :  { %16974 = vmatpush3.msra.mxu0 %v18197_v23  ;;  %17008 = vmatprep.subr.mxu1 %v19933_v37 }
0x2753   :  { %16975 = vmatprep.subr.mxu0 %v19933_v37  ;;  %17009 = vmatpush3.msra.mxu1 %v18189_v20  ;;  %v19382_v20 = vand.u32 4294901760, %v9993_v18 }
0x2754   :  { %16976 = vmatpush3.msra.mxu0 %v18205_v26  ;;  %17010 = vmatprep.subr.mxu1 %v19933_v37 }
0x2755   :  { %16977 = vmatprep.subr.mxu0 %v19933_v37  ;;  %16979 = vmatprep.mubr.msk.f32.mxu0 %vm17801_vm10, %v19933_v37 }
0x2756   :  { %16978 = vmatpush3.msra.mxu0 %v18218_v31  ;;  %17011 = vmatpush3.msra.mxu1 %v18202_v25 }
0x2757   :  { %17012 = vmatprep.mubr.msk.f32.mxu1 %vm17801_vm10, %v19933_v37  ;;  %16980 = vmatmul.mubr.f32.vlgmr.msra.gmra.mxu0 %v9412_v0  ;;  %v9857_v0 = vrot.slane %v18408_v54, 7 }
0x2758   :  { %16993 = vmatprep.subr.mxu0 %v19933_v37  ;;  %17013 = vmatmul.mubr.f32.vlgmr.msra.gmra.mxu1 %v9411_v6 }
0x2759   :  { %16994 = vmatpush3.msra.mxu0 %v18200_v24  ;;  %17001 = vmatprep.mubr.msk.f32.mxu0 %vm17801_vm10, %v19933_v37  ;;  %v9863_v34 = vsel %vm2562_vm11, %v9854_v45, %v9857_v0 }
0x275a   :  { %16995 = vmatprep.subr.mxu0 %v19933_v37  ;;  %17022 = vmatprep.subr.mxu1 %v19933_v37  ;;  %v9865_v10 = vsel %vm9864_vm12, %v9863_v34, %v9859_v38 }
0x275b   :  { %16996 = vmatpush3.msra.mxu0 %v18211_v28  ;;  %17023 = vmatpush3.msra.mxu1 %v19376_v19  ;;  %v9867_v18 = vsel %vm9866_vm13, %v9865_v10, %v9861_v42 }
0x275c   :  { %16997 = vmatprep.subr.mxu0 %v19933_v37  ;;  %17024 = vmatprep.subr.mxu1 %v19933_v37 }
0x275d   :  { %16998 = vmatpush3.msra.mxu0 %v18222_v32  ;;  %17025 = vmatpush3.msra.mxu1 %v19382_v20 }
0x275e   :  { %16999 = vmatprep.subr.mxu0 %v19933_v37  ;;  %17026 = vmatprep.mubr.msk.f32.mxu1 %vm17801_vm10, %v19933_v37 }
0x275f   :  { %17000 = vmatpush3.msra.mxu0 %v18231_v35  ;;  %17027 = vmatmul.mubr.f32.vlgmr.msra.gmra.mxu1 %v19933_v37 }
0x2760   :  { %17002 = vmatmul.mubr.f32.vlgmr.msra.gmra.mxu0 %v9411_v6  ;;  %17015 = vmatprep.subr.mxu0 %v19933_v37 }
0x2761   :  { %17016 = vmatpush3.msra.mxu0 %v19331_v22  ;;  %17019 = vmatprep.mubr.msk.f32.mxu0 %vm17801_vm10, %v19933_v37 }
0x2762   :  { %17017 = vmatprep.subr.mxu0 %v19933_v37  ;;  %17036 = vmatprep.subr.mxu1 %v19933_v37 }
0x2763   :  { %17018 = vmatpush3.msra.mxu0 %v19335_v27  ;;  %17037 = vmatpush3.msra.mxu1 %v19331_v22 }
0x2764   :  { %17020 = vmatmul.mubr.f32.vlgmr.msra.gmra.mxu0 %v19933_v37  ;;  %17029 = vmatprep.subr.mxu0 %v19933_v37 }
0x2765   :  { %17030 = vmatpush3.msra.mxu0 %v19340_v39  ;;  %17038 = vmatprep.subr.mxu1 %v19933_v37 }
0x2766   :  { %17031 = vmatprep.subr.mxu0 %v19933_v37  ;;  %17033 = vmatprep.mubr.msk.f32.mxu0 %vm17801_vm10, %v19933_v37 }
0x2767   :  { %17032 = vmatpush3.msra.mxu0 %v19345_v53  ;;  %17039 = vmatpush3.msra.mxu1 %v19335_v27 }
0x2768   :  { %17040 = vmatprep.mubr.msk.f32.mxu1 %vm17801_vm10, %v19933_v37  ;;  %17034 = vmatmul.mubr.f32.vlgmr.msra.gmra.mxu0 %v19933_v37 }
0x2769   :  { %17041 = vmatmul.mubr.f32.vlgmr.msra.gmra.mxu1 %v19933_v37  ;;  %17043 = vmatprep.subr.mxu0 %v19933_v37 }
0x276a   :  { %17050 = vmatprep.subr.mxu1 %v19933_v37  ;;  %17044 = vmatpush3.msra.mxu0 %v19350_v56 }
0x276b   :  { %17051 = vmatpush3.msra.mxu1 %v19331_v22  ;;  %17045 = vmatprep.subr.mxu0 %v19933_v37 }
0x276c   :  { %17052 = vmatprep.subr.mxu1 %v19933_v37  ;;  %17046 = vmatpush3.msra.mxu0 %v19357_v48 }
0x276d   :  { %17047 = vmatprep.mubr.msk.f32.mxu0 %vm17801_vm10, %v19933_v37  ;;  %17053 = vmatpush3.msra.mxu1 %v19335_v27 }
0x276e   :  { %17054 = vmatprep.mubr.msk.f32.mxu1 %vm17801_vm10, %v19933_v37  ;;  %17048 = vmatmul.mubr.f32.vlgmr.msra.gmra.mxu0 %v19933_v37 }
0x276f   :  { %17055 = vmatmul.mubr.f32.vlgmr.msra.gmra.mxu1 %v19933_v37  ;;  %17064 = vmatprep.subr.mxu1 %v19933_v37 }
0x2770   :  { %17065 = vmatpush3.msra.mxu1 %v19376_v19  ;;  %17068 = vmatprep.mubr.msk.f32.mxu1 %vm17801_vm10, %v19933_v37 }
0x2771   :  { %17066 = vmatprep.subr.mxu1 %v19933_v37  ;;  %17057 = vmatprep.subr.mxu0 %v19933_v37 }
0x2772   :  { %17067 = vmatpush3.msra.mxu1 %v19382_v20  ;;  %17058 = vmatpush3.msra.mxu0 %v19331_v22 }
0x2773   :  { %17078 = vmatprep.subr.mxu1 %v19933_v37  ;;  %17059 = vmatprep.subr.mxu0 %v19933_v37 }
0x2774   :  { %17060 = vmatpush3.msra.mxu0 %v19335_v27  ;;  %17061 = vmatprep.mubr.msk.f32.mxu0 %vm17801_vm10, %v19933_v37 }
0x2775   :  { %17071 = vmatprep.subr.mxu0 %v19933_v37 }
0x2806   :  { %v9508_v23 = vpop.f32.mrf.mxu1 }
0x2808   :  { %v16970_v24 = vpop.f32.mrf.mxu1 }
0x280e   :  { %v9665_v25 = vpop.f32.mrf.mxu1 }
0x280f   :  { %v9417_v26 = vpop.f32.mrf.mxu0 }
0x2810   :  { %v9418_v28 = vadd.f32 %v19170_v47, %v9417_v26  ;;  %v16992_v31 = vpop.f32.mrf.mxu1 }
0x2811   :  { %v16959_v32 = vpop.f32.mrf.mxu0 }
0x2812   :  { %v9509_v35 = vadd.f32 %v9508_v23, %v9418_v28 }
0x2817   :  { %v9588_v30 = vpop.f32.mrf.mxu0 }
0x2818   :  { %v9589_v12 = vadd.f32 %v9588_v30, %v9509_v35  ;;  %v9823_v3 = vpop.f32.mrf.mxu1 }
0x2819   :  { %v16981_v58 = vpop.f32.mrf.mxu0 }
0x281a   :  { %v17014_v4 = vpop.f32.mrf.mxu1  ;;  %v9666_v43 = vadd.f32 %v9665_v25, %v9589_v12 }
0x281f   :  { %v10031_v13 = vpop.f32.mrf.mxu1 }
0x2820   :  { %v9748_v59 = vpop.f32.mrf.mxu0 }
0x2821   :  { %v9749_v50 = vadd.f32 %v9748_v59, %v9666_v43  ;;  %v17028_v60 = vpop.f32.mrf.mxu1 }
0x2822   :  { %v17003_v62 = vpop.f32.mrf.mxu0 }
0x2823   :  { %v19449_v57 = vadd.f32 %v9823_v3, %v9749_v50 }
0x2824   :  { %v9950_v51 = vpop.f32.mrf.mxu0 }
0x2825   :  { %v9951_v47 = vadd.f32 %v19447_v9, %v9950_v51 }
0x2826   :  { %v17021_v1 = vpop.f32.mrf.mxu0 }
0x2827   :  { %v10032_v21 = vadd.f32 %v10031_v13, %v9951_v47 }
0x2828   :  { %v10107_v55 = vpop.f32.mrf.mxu0 }
0x2829   :  { %v10108_v5 = vadd.f32 %v10107_v55, %v10032_v21  ;;  %v10182_v15 = vpop.f32.mrf.mxu1 }
0x282a   :  { %v17035_v52 = vpop.f32.mrf.mxu0 }
0x282b   :  { %v10183_v36 = vadd.f32 %v10182_v15, %v10108_v5  ;;  %v17042_v8 = vpop.f32.mrf.mxu1 }
0x282e   :  { %v10259_v2 = vpop.f32.mrf.mxu0 }
0x282f   :  { %v10260_v16 = vadd.f32 %v10259_v2, %v10183_v36  ;;  %v10332_v63 = vpop.f32.mrf.mxu1 }
0x2830   :  { %v17049_v46 = vpop.f32.mrf.mxu0 }
0x2831   :  { %v10333_v6 = vadd.f32 %v10332_v63, %v10260_v16  ;;  %v17056_v49 = vpop.f32.mrf.mxu1 }
0x2833   :  { %10344 = vrot.lane.b32.xlu0 %v10333_v6, %s17802_s5  ;;  %v10336_v23 = vadd.f32 %v10333_v6, %v9867_v18 }
0x2835   :  { %v15208_v24 = vmul.f32 -1.442695, %v10336_v23 }
0x2837   :  { %17531 = vpow2.f32 %v15208_v24 }
0x2844   :  { %v17532_v25 = vpop.eup %17531 }
0x2845   :  { %v10340_v26 = vadd.f32 1.0, %v17532_v25 }
0x2847   :  { %17533 = vrcp.f32 %v10340_v26 }
0x2854   :  { %v17534_v28 = vpop.eup %17533 }
0x2855   :  { %v10354_v54 = vsub.f32 1.0, %v17534_v28  ;;  %v10360_v3 = vmul.f32 0.0, %v17534_v28 }
0x28a5   :  { %v10345_v31 = vpop.permute.xlu0 %10344 }
0x28a6   :  { %v10347_v32 = vmul.f32 %v17534_v28, %v10345_v31 }
0x28a8   :  { %10349 = vrot.lane.b32.xlu1 %v10347_v32, %s17803_s6 }
0x291a   :  { %v10350_v35 = vpop.permute.xlu1 %10349 }
0x291b   :  { %v10352_v11 = vadd.f32 %v10350_v35, %v9867_v18 }
0x291d   :  { %17535 = vtanh.f32 %v10352_v11 }
0x292a   :  { %v17536_v30 = vpop.eup %17535 }
0x292b   :  { %10356 = vrot.lane.b32.xlu0 %v17536_v30, %s17804_s21 }
0x299d   :  { %v10357_v12 = vpop.permute.xlu0 %10356 }
0x299e   :  { %v10359_v58 = vmul.f32 %v10357_v12, %v10354_v54 }
0x29a0   :  { %v19462_v4 = vadd.f32 %v10360_v3, %v10359_v58 }
0x29a2   :  { %10372 = vrot.lane.b32.xlu1 %v19462_v4, %s17804_s21 }
0x2a14   :  { %v10373_v43 = vpop.permute.xlu1 %10372 }
0x2a15   :  { %v10374_v13 = vsel %vm9874_vm15, %v10373_v43, 0 }
0x2a16   :  { %v10443_v59 = vand.u32 4294901760, %v10374_v13 }
0x2a18   :  { %v10444_v50 = vsub.f32 %v10374_v13, %v10443_v59  ;;  %17069 = vmatmul.mubr.f32.vlgmr.msra.gmra.mxu1 %v10443_v59 }
0x2a19   :  { %17079 = vmatpush3.msra.mxu1 %v19331_v22  ;;  %17082 = vmatprep.mubr.msk.f32.mxu1 %vm17801_vm10, %v19933_v37 }
0x2a1a   :  { %v10445_v60 = vand.u32 4294901760, %v10444_v50  ;;  %17080 = vmatprep.subr.mxu1 %v19933_v37 }
0x2a1b   :  { %17081 = vmatpush3.msra.mxu1 %v19335_v27 }
0x2a1c   :  { %v10446_v62 = vsub.f32 %v10444_v50, %v10445_v60  ;;  %17083 = vmatmul.mubr.f32.vlgmr.msra.gmra.mxu1 %v10445_v60  ;;  %17092 = vmatprep.subr.mxu1 %v19933_v37 }
0x2a1d   :  { %17093 = vmatpush3.msra.mxu1 %v19331_v22  ;;  %17096 = vmatprep.mubr.msk.f32.mxu1 %vm17801_vm10, %v19933_v37 }
0x2a1e   :  { %v10447_v51 = vand.u32 4294901760, %v10446_v62  ;;  %17094 = vmatprep.subr.mxu1 %v19933_v37 }
0x2a1f   :  { %17095 = vmatpush3.msra.mxu1 %v19335_v27 }
0x2a20   :  { %17062 = vmatmul.mubr.f32.vlgmr.msra.gmra.mxu0 %v10447_v51  ;;  %17097 = vmatmul.mubr.f32.vlgmr.msra.gmra.mxu1 %v10443_v59 }
0x2a21   :  { %17072 = vmatpush3.msra.mxu0 %v19340_v39  ;;  %17075 = vmatprep.mubr.msk.f32.mxu0 %vm17801_vm10, %v19933_v37 }
0x2a22   :  { %17073 = vmatprep.subr.mxu0 %v19933_v37  ;;  %17106 = vmatprep.subr.mxu1 %v19933_v37 }
0x2a23   :  { %17074 = vmatpush3.msra.mxu0 %v19345_v53  ;;  %17107 = vmatpush3.msra.mxu1 %v19376_v19 }
0x2a24   :  { %17076 = vmatmul.mubr.f32.vlgmr.msra.gmra.mxu0 %v10444_v50  ;;  %17085 = vmatprep.subr.mxu0 %v19933_v37 }
0x2a25   :  { %17086 = vmatpush3.msra.mxu0 %v19350_v56  ;;  %17089 = vmatprep.mubr.msk.f32.mxu0 %vm17801_vm10, %v19933_v37 }
0x2a26   :  { %17087 = vmatprep.subr.mxu0 %v19933_v37  ;;  %17108 = vmatprep.subr.mxu1 %v19933_v37 }
0x2a27   :  { %17088 = vmatpush3.msra.mxu0 %v19357_v48  ;;  %17109 = vmatpush3.msra.mxu1 %v19382_v20 }
0x2a28   :  { %17090 = vmatmul.mubr.f32.vlgmr.msra.gmra.mxu0 %v10443_v59  ;;  %17110 = vmatprep.mubr.msk.f32.mxu1 %vm17801_vm10, %v19933_v37 }
0x2a29   :  { %17120 = vmatprep.subr.mxu1 %v19933_v37  ;;  %17099 = vmatprep.subr.mxu0 %v19933_v37 }
0x2a2a   :  { %17100 = vmatpush3.msra.mxu0 %v19331_v22  ;;  %17103 = vmatprep.mubr.msk.f32.mxu0 %vm17801_vm10, %v19933_v37 }
0x2a2b   :  { %17101 = vmatprep.subr.mxu0 %v19933_v37 }
0x2a2c   :  { %17102 = vmatpush3.msra.mxu0 %v19335_v27 }
0x2a2d   :  { %17113 = vmatprep.subr.mxu0 %v19933_v37 }
0x2ad8   :  { %v10530_v47 = vpop.f32.mrf.mxu1 }
0x2ada   :  { %v17070_v1 = vpop.f32.mrf.mxu1 }
0x2adc   :  { %v10681_v21 = vpop.f32.mrf.mxu1 }
0x2ade   :  { %v17084_v55 = vpop.f32.mrf.mxu1 }
0x2ae0   :  { %v10449_v5 = vpop.f32.mrf.mxu0  ;;  %v10831_v15 = vpop.f32.mrf.mxu1 }
0x2ae1   :  { %v10450_v52 = vadd.f32 %v19447_v9, %v10449_v5 }
0x2ae2   :  { %v17063_v36 = vpop.f32.mrf.mxu0  ;;  %v17098_v8 = vpop.f32.mrf.mxu1 }
0x2ae3   :  { %v10531_v2 = vadd.f32 %v10530_v47, %v10450_v52 }
0x2ae4   :  { %v10606_v16 = vpop.f32.mrf.mxu0 }
0x2ae5   :  { %v10607_v63 = vadd.f32 %v10606_v16, %v10531_v2 }
0x2ae6   :  { %v17077_v46 = vpop.f32.mrf.mxu0 }
0x2ae7   :  { %v10682_v6 = vadd.f32 %v10681_v21, %v10607_v63 }
0x2ae8   :  { %v10758_v49 = vpop.f32.mrf.mxu0 }
0x2ae9   :  { %v10759_v0 = vadd.f32 %v10758_v49, %v10682_v6 }
0x2aea   :  { %v17091_v45 = vpop.f32.mrf.mxu0 }
0x2aeb   :  { %v10832_v34 = vadd.f32 %v10831_v15, %v10759_v0 }
0x2aed   :  { %10843 = vrot.lane.b32.xlu0 %v10832_v34, %s17802_s5  ;;  %v10835_v38 = vadd.f32 %v10832_v34, %v18430_v29 }
0x2aef   :  { %v15209_v10 = vmul.f32 -1.442695, %v10835_v38 }
0x2af1   :  { %17537 = vpow2.f32 %v15209_v10 }
0x2afe   :  { %v17538_v42 = vpop.eup %17537 }
0x2aff   :  { %v10839_v18 = vadd.f32 1.0, %v17538_v42 }
0x2b01   :  { %17539 = vrcp.f32 %v10839_v18 }
0x2b0e   :  { %v17540_v23 = vpop.eup %17539 }
0x2b0f   :  { %v10853_v32 = vsub.f32 1.0, %v17540_v23  ;;  %v10859_v11 = vmul.f32 %v17540_v23, %v19462_v4 }
0x2b5f   :  { %v10844_v24 = vpop.permute.xlu0 %10843 }
0x2b60   :  { %v10846_v25 = vmul.f32 %v17540_v23, %v10844_v24 }
0x2b62   :  { %10848 = vrot.lane.b32.xlu1 %v10846_v25, %s17803_s6 }
0x2bd4   :  { %v10849_v26 = vpop.permute.xlu1 %10848 }
0x2bd5   :  { %v10851_v28 = vadd.f32 %v10849_v26, %v18430_v29 }
0x2bd7   :  { %17541 = vtanh.f32 %v10851_v28 }
0x2be4   :  { %v17542_v31 = vpop.eup %17541 }
0x2be5   :  { %10855 = vrot.lane.b32.xlu0 %v17542_v31, %s17804_s21 }
0x2c57   :  { %v10856_v35 = vpop.permute.xlu0 %10855 }
0x2c58   :  { %v10858_v30 = vmul.f32 %v10856_v35, %v10853_v32 }
0x2c5a   :  { %v19510_v54 = vadd.f32 %v10859_v11, %v10858_v30 }
0x2c5c   :  { %10873 = vrot.lane.b32.xlu1 %v19510_v54, %s17804_s21 }
0x2cce   :  { %v10874_v12 = vpop.permute.xlu1 %10873 }
0x2ccf   :  { %v10875_v3 = vsel %vm9874_vm15, %v10874_v12, 0 }
0x2cd0   :  { %v10944_v58 = vand.u32 4294901760, %v10875_v3 }
0x2cd2   :  { %v10945_v43 = vsub.f32 %v10875_v3, %v10944_v58  ;;  %17111 = vmatmul.mubr.f32.vlgmr.msra.gmra.mxu1 %v10944_v58 }
0x2cd3   :  { %17121 = vmatpush3.msra.mxu1 %v19331_v22  ;;  %17124 = vmatprep.mubr.msk.f32.mxu1 %vm17801_vm10, %v19933_v37 }
0x2cd4   :  { %v10946_v29 = vand.u32 4294901760, %v10945_v43  ;;  %17122 = vmatprep.subr.mxu1 %v19933_v37 }
0x2cd5   :  { %17123 = vmatpush3.msra.mxu1 %v19335_v27 }
0x2cd6   :  { %v10947_v4 = vsub.f32 %v10945_v43, %v10946_v29  ;;  %17125 = vmatmul.mubr.f32.vlgmr.msra.gmra.mxu1 %v10946_v29  ;;  %17134 = vmatprep.subr.mxu1 %v19933_v37 }
0x2cd7   :  { %17135 = vmatpush3.msra.mxu1 %v19331_v22  ;;  %17138 = vmatprep.mubr.msk.f32.mxu1 %vm17801_vm10, %v19933_v37 }
0x2cd8   :  { %v10948_v13 = vand.u32 4294901760, %v10947_v4  ;;  %17136 = vmatprep.subr.mxu1 %v19933_v37 }
0x2cd9   :  { %17137 = vmatpush3.msra.mxu1 %v19335_v27 }
0x2cda   :  { %17104 = vmatmul.mubr.f32.vlgmr.msra.gmra.mxu0 %v10948_v13  ;;  %17139 = vmatmul.mubr.f32.vlgmr.msra.gmra.mxu1 %v10944_v58 }
0x2cdb   :  { %17114 = vmatpush3.msra.mxu0 %v19340_v39  ;;  %17117 = vmatprep.mubr.msk.f32.mxu0 %vm17801_vm10, %v19933_v37 }
0x2cdc   :  { %17115 = vmatprep.subr.mxu0 %v19933_v37  ;;  %17148 = vmatprep.subr.mxu1 %v19933_v37 }
0x2cdd   :  { %17116 = vmatpush3.msra.mxu0 %v19345_v53  ;;  %17149 = vmatpush3.msra.mxu1 %v19376_v19 }
0x2cde   :  { %17118 = vmatmul.mubr.f32.vlgmr.msra.gmra.mxu0 %v10945_v43  ;;  %17127 = vmatprep.subr.mxu0 %v19933_v37 }
0x2cdf   :  { %17128 = vmatpush3.msra.mxu0 %v19350_v56  ;;  %17131 = vmatprep.mubr.msk.f32.mxu0 %vm17801_vm10, %v19933_v37 }
0x2ce0   :  { %17129 = vmatprep.subr.mxu0 %v19933_v37  ;;  %17150 = vmatprep.subr.mxu1 %v19933_v37 }
0x2ce1   :  { %17130 = vmatpush3.msra.mxu0 %v19357_v48  ;;  %17151 = vmatpush3.msra.mxu1 %v19382_v20 }
0x2ce2   :  { %17132 = vmatmul.mubr.f32.vlgmr.msra.gmra.mxu0 %v10944_v58  ;;  %17152 = vmatprep.mubr.msk.f32.mxu1 %vm17801_vm10, %v19933_v37 }
0x2ce3   :  { %17162 = vmatprep.subr.mxu1 %v19933_v37  ;;  %17141 = vmatprep.subr.mxu0 %v19933_v37 }
0x2ce4   :  { %17142 = vmatpush3.msra.mxu0 %v19331_v22  ;;  %17145 = vmatprep.mubr.msk.f32.mxu0 %vm17801_vm10, %v19933_v37 }
0x2ce5   :  { %17143 = vmatprep.subr.mxu0 %v19933_v37 }
0x2ce6   :  { %17144 = vmatpush3.msra.mxu0 %v19335_v27 }
0x2ce7   :  { %17155 = vmatprep.subr.mxu0 %v19933_v37 }
0x2d92   :  { %v11031_v59 = vpop.f32.mrf.mxu1 }
0x2d94   :  { %v17112_v50 = vpop.f32.mrf.mxu1 }
0x2d96   :  { %v11182_v60 = vpop.f32.mrf.mxu1 }
0x2d98   :  { %v17126_v62 = vpop.f32.mrf.mxu1 }
0x2d9a   :  { %v10950_v51 = vpop.f32.mrf.mxu0  ;;  %v11332_v47 = vpop.f32.mrf.mxu1 }
0x2d9b   :  { %v10951_v1 = vadd.f32 %v19447_v9, %v10950_v51 }
0x2d9c   :  { %v17105_v21 = vpop.f32.mrf.mxu0  ;;  %v17140_v55 = vpop.f32.mrf.mxu1 }
0x2d9d   :  { %v11032_v5 = vadd.f32 %v11031_v59, %v10951_v1 }
0x2d9e   :  { %v11107_v15 = vpop.f32.mrf.mxu0 }
0x2d9f   :  { %v11108_v52 = vadd.f32 %v11107_v15, %v11032_v5 }
0x2da0   :  { %v17119_v36 = vpop.f32.mrf.mxu0 }
0x2da1   :  { %v11183_v8 = vadd.f32 %v11182_v60, %v11108_v52 }
0x2da2   :  { %v11259_v2 = vpop.f32.mrf.mxu0 }
0x2da3   :  { %v11260_v16 = vadd.f32 %v11259_v2, %v11183_v8 }
0x2da4   :  { %v17133_v63 = vpop.f32.mrf.mxu0 }
0x2da5   :  { %v11333_v46 = vadd.f32 %v11332_v47, %v11260_v16 }
0x2da7   :  { %11344 = vrot.lane.b32.xlu0 %v11333_v46, %s17802_s5  ;;  %v11336_v6 = vadd.f32 %v11333_v46, %v18435_v14 }
0x2da9   :  { %v15210_v49 = vmul.f32 -1.442695, %v11336_v6 }
0x2dab   :  { %17543 = vpow2.f32 %v15210_v49 }
0x2db8   :  { %v17544_v0 = vpop.eup %17543 }
0x2db9   :  { %v11340_v45 = vadd.f32 1.0, %v17544_v0 }
0x2dbb   :  { %17545 = vrcp.f32 %v11340_v45 }
0x2dc8   :  { %v17546_v34 = vpop.eup %17545 }
0x2dc9   :  { %v11354_v24 = vsub.f32 1.0, %v17546_v34  ;;  %v11360_v26 = vmul.f32 %v17546_v34, %v19510_v54 }
0x2e19   :  { %v11345_v38 = vpop.permute.xlu0 %11344 }
0x2e1a   :  { %v11347_v10 = vmul.f32 %v17546_v34, %v11345_v38 }
0x2e1c   :  { %11349 = vrot.lane.b32.xlu1 %v11347_v10, %s17803_s6 }
0x2e8e   :  { %v11350_v42 = vpop.permute.xlu1 %11349 }
0x2e8f   :  { %v11352_v18 = vadd.f32 %v11350_v42, %v18435_v14 }
0x2e91   :  { %17547 = vtanh.f32 %v11352_v18 }
0x2e9e   :  { %v17548_v23 = vpop.eup %17547 }
0x2e9f   :  { %11356 = vrot.lane.b32.xlu0 %v17548_v23, %s17804_s21 }
0x2f11   :  { %v11357_v25 = vpop.permute.xlu0 %11356 }
0x2f12   :  { %v11359_v28 = vmul.f32 %v11357_v25, %v11354_v24 }
0x2f14   :  { %v19558_v31 = vadd.f32 %v11360_v26, %v11359_v28 }
0x2f16   :  { %11373 = vrot.lane.b32.xlu1 %v19558_v31, %s17804_s21 }
0x2f88   :  { %v11374_v32 = vpop.permute.xlu1 %11373 }
0x2f89   :  { %v11375_v35 = vsel %vm9874_vm15, %v11374_v32, 0 }
0x2f8a   :  { %v11444_v11 = vand.u32 4294901760, %v11375_v35 }
0x2f8c   :  { %v11445_v30 = vsub.f32 %v11375_v35, %v11444_v11  ;;  %17153 = vmatmul.mubr.f32.vlgmr.msra.gmra.mxu1 %v11444_v11 }
0x2f8d   :  { %17163 = vmatpush3.msra.mxu1 %v19331_v22  ;;  %17166 = vmatprep.mubr.msk.f32.mxu1 %vm17801_vm10, %v19933_v37 }
0x2f8e   :  { %v11446_v14 = vand.u32 4294901760, %v11445_v30  ;;  %17164 = vmatprep.subr.mxu1 %v19933_v37 }
0x2f8f   :  { %17165 = vmatpush3.msra.mxu1 %v19335_v27 }
0x2f90   :  { %v11447_v54 = vsub.f32 %v11445_v30, %v11446_v14  ;;  %17167 = vmatmul.mubr.f32.vlgmr.msra.gmra.mxu1 %v11446_v14  ;;  %17176 = vmatprep.subr.mxu1 %v19933_v37 }
0x2f91   :  { %17177 = vmatpush3.msra.mxu1 %v19331_v22  ;;  %17180 = vmatprep.mubr.msk.f32.mxu1 %vm17801_vm10, %v19933_v37 }
0x2f92   :  { %v11448_v12 = vand.u32 4294901760, %v11447_v54  ;;  %17178 = vmatprep.subr.mxu1 %v19933_v37 }
0x2f93   :  { %17179 = vmatpush3.msra.mxu1 %v19335_v27 }
0x2f94   :  { %17146 = vmatmul.mubr.f32.vlgmr.msra.gmra.mxu0 %v11448_v12  ;;  %17181 = vmatmul.mubr.f32.vlgmr.msra.gmra.mxu1 %v11444_v11 }
0x2f95   :  { %17156 = vmatpush3.msra.mxu0 %v19340_v39  ;;  %17159 = vmatprep.mubr.msk.f32.mxu0 %vm17801_vm10, %v19933_v37 }
0x2f96   :  { %17157 = vmatprep.subr.mxu0 %v19933_v37  ;;  %17190 = vmatprep.subr.mxu1 %v19933_v37 }
0x2f97   :  { %17158 = vmatpush3.msra.mxu0 %v19345_v53  ;;  %17191 = vmatpush3.msra.mxu1 %v19376_v19 }
0x2f98   :  { %17160 = vmatmul.mubr.f32.vlgmr.msra.gmra.mxu0 %v11445_v30  ;;  %17169 = vmatprep.subr.mxu0 %v19933_v37 }
0x2f99   :  { %17170 = vmatpush3.msra.mxu0 %v19350_v56  ;;  %17173 = vmatprep.mubr.msk.f32.mxu0 %vm17801_vm10, %v19933_v37 }
0x2f9a   :  { %17171 = vmatprep.subr.mxu0 %v19933_v37  ;;  %17192 = vmatprep.subr.mxu1 %v19933_v37 }
0x2f9b   :  { %17172 = vmatpush3.msra.mxu0 %v19357_v48  ;;  %17193 = vmatpush3.msra.mxu1 %v19382_v20 }
0x2f9c   :  { %17174 = vmatmul.mubr.f32.vlgmr.msra.gmra.mxu0 %v11444_v11  ;;  %17194 = vmatprep.mubr.msk.f32.mxu1 %vm17801_vm10, %v19933_v37 }
0x2f9d   :  { %17204 = vmatprep.subr.mxu1 %v19933_v37  ;;  %17183 = vmatprep.subr.mxu0 %v19933_v37 }
0x2f9e   :  { %17184 = vmatpush3.msra.mxu0 %v19331_v22  ;;  %17187 = vmatprep.mubr.msk.f32.mxu0 %vm17801_vm10, %v19933_v37 }
0x2f9f   :  { %17185 = vmatprep.subr.mxu0 %v19933_v37 }
0x2fa0   :  { %17186 = vmatpush3.msra.mxu0 %v19335_v27 }
0x2fa1   :  { %17197 = vmatprep.subr.mxu0 %v19933_v37 }
0x304c   :  { %v11531_v3 = vpop.f32.mrf.mxu1 }
0x304e   :  { %v17154_v58 = vpop.f32.mrf.mxu1 }
0x3050   :  { %v11682_v43 = vpop.f32.mrf.mxu1 }
0x3052   :  { %v17168_v29 = vpop.f32.mrf.mxu1 }
0x3054   :  { %v11450_v4 = vpop.f32.mrf.mxu0  ;;  %v11832_v13 = vpop.f32.mrf.mxu1 }
0x3055   :  { %v11451_v59 = vadd.f32 %v19447_v9, %v11450_v4 }
0x3056   :  { %v17147_v50 = vpop.f32.mrf.mxu0  ;;  %v17182_v60 = vpop.f32.mrf.mxu1 }
0x3057   :  { %v11532_v62 = vadd.f32 %v11531_v3, %v11451_v59 }
0x3058   :  { %v11607_v51 = vpop.f32.mrf.mxu0 }
0x3059   :  { %v11608_v47 = vadd.f32 %v11607_v51, %v11532_v62 }
0x305a   :  { %v17161_v1 = vpop.f32.mrf.mxu0 }
0x305b   :  { %v11683_v21 = vadd.f32 %v11682_v43, %v11608_v47 }
0x305c   :  { %v11759_v55 = vpop.f32.mrf.mxu0 }
0x305d   :  { %v11760_v5 = vadd.f32 %v11759_v55, %v11683_v21 }
0x305e   :  { %v17175_v15 = vpop.f32.mrf.mxu0 }
0x305f   :  { %v11833_v52 = vadd.f32 %v11832_v13, %v11760_v5 }
0x3061   :  { %11844 = vrot.lane.b32.xlu0 %v11833_v52, %s17802_s5  ;;  %v11836_v36 = vadd.f32 %v11833_v52, %v18438_v44 }
0x3063   :  { %v15211_v8 = vmul.f32 -1.442695, %v11836_v36 }
0x3065   :  { %17549 = vpow2.f32 %v15211_v8 }
0x3072   :  { %v17550_v2 = vpop.eup %17549 }
0x3073   :  { %v11840_v16 = vadd.f32 1.0, %v17550_v2 }
0x3075   :  { %17551 = vrcp.f32 %v11840_v16 }
0x3082   :  { %v17552_v63 = vpop.eup %17551 }
0x3083   :  { %v11854_v34 = vsub.f32 1.0, %v17552_v63  ;;  %v11860_v10 = vmul.f32 %v17552_v63, %v19558_v31 }
0x30d3   :  { %v11845_v46 = vpop.permute.xlu0 %11844 }
0x30d4   :  { %v11847_v6 = vmul.f32 %v17552_v63, %v11845_v46 }
0x30d6   :  { %11849 = vrot.lane.b32.xlu1 %v11847_v6, %s17803_s6 }
0x3148   :  { %v11850_v49 = vpop.permute.xlu1 %11849 }
0x3149   :  { %v11852_v0 = vadd.f32 %v11850_v49, %v18438_v44 }
0x314b   :  { %17553 = vtanh.f32 %v11852_v0 }
0x3158   :  { %v17554_v45 = vpop.eup %17553 }
0x3159   :  { %11856 = vrot.lane.b32.xlu0 %v17554_v45, %s17804_s21 }
0x31cb   :  { %v11857_v38 = vpop.permute.xlu0 %11856 }
0x31cc   :  { %v11859_v42 = vmul.f32 %v11857_v38, %v11854_v34 }
0x31ce   :  { %v19606_v18 = vadd.f32 %v11860_v10, %v11859_v42 }
0x31d0   :  { %11875 = vrot.lane.b32.xlu1 %v19606_v18, %s17804_s21 }
0x3242   :  { %v11876_v23 = vpop.permute.xlu1 %11875 }
0x3243   :  { %v11877_v24 = vsel %vm9874_vm15, %v11876_v23, 0 }
0x3244   :  { %v11946_v25 = vand.u32 4294901760, %v11877_v24 }
0x3246   :  { %v11947_v26 = vsub.f32 %v11877_v24, %v11946_v25  ;;  %17195 = vmatmul.mubr.f32.vlgmr.msra.gmra.mxu1 %v11946_v25 }
0x3247   :  { %17205 = vmatpush3.msra.mxu1 %v19331_v22  ;;  %17208 = vmatprep.mubr.msk.f32.mxu1 %vm17801_vm10, %v19933_v37 }
0x3248   :  { %v11948_v44 = vand.u32 4294901760, %v11947_v26  ;;  %17206 = vmatprep.subr.mxu1 %v19933_v37 }
0x3249   :  { %17207 = vmatpush3.msra.mxu1 %v19335_v27 }
0x324a   :  { %v11949_v28 = vsub.f32 %v11947_v26, %v11948_v44  ;;  %17209 = vmatmul.mubr.f32.vlgmr.msra.gmra.mxu1 %v11948_v44  ;;  %17218 = vmatprep.subr.mxu1 %v19933_v37 }
0x324b   :  { %17219 = vmatpush3.msra.mxu1 %v19331_v22  ;;  %17222 = vmatprep.mubr.msk.f32.mxu1 %vm17801_vm10, %v19933_v37 }
0x324c   :  { %v11950_v31 = vand.u32 4294901760, %v11949_v28  ;;  %17220 = vmatprep.subr.mxu1 %v19933_v37 }
0x324d   :  { %17221 = vmatpush3.msra.mxu1 %v19335_v27 }
0x324e   :  { %17188 = vmatmul.mubr.f32.vlgmr.msra.gmra.mxu0 %v11950_v31  ;;  %17223 = vmatmul.mubr.f32.vlgmr.msra.gmra.mxu1 %v11946_v25 }
0x324f   :  { %17198 = vmatpush3.msra.mxu0 %v19340_v39  ;;  %17201 = vmatprep.mubr.msk.f32.mxu0 %vm17801_vm10, %v19933_v37 }
0x3250   :  { %17199 = vmatprep.subr.mxu0 %v19933_v37  ;;  %17232 = vmatprep.subr.mxu1 %v19933_v37 }
0x3251   :  { %17200 = vmatpush3.msra.mxu0 %v19345_v53  ;;  %17233 = vmatpush3.msra.mxu1 %v19376_v19 }
0x3252   :  { %17202 = vmatmul.mubr.f32.vlgmr.msra.gmra.mxu0 %v11947_v26  ;;  %17211 = vmatprep.subr.mxu0 %v19933_v37 }
0x3253   :  { %17212 = vmatpush3.msra.mxu0 %v19350_v56  ;;  %17215 = vmatprep.mubr.msk.f32.mxu0 %vm17801_vm10, %v19933_v37 }
0x3254   :  { %17213 = vmatprep.subr.mxu0 %v19933_v37  ;;  %17234 = vmatprep.subr.mxu1 %v19933_v37 }
0x3255   :  { %17214 = vmatpush3.msra.mxu0 %v19357_v48  ;;  %17235 = vmatpush3.msra.mxu1 %v19382_v20 }
0x3256   :  { %17216 = vmatmul.mubr.f32.vlgmr.msra.gmra.mxu0 %v11946_v25  ;;  %17236 = vmatprep.mubr.msk.f32.mxu1 %vm17801_vm10, %v19933_v37 }
0x3257   :  { %17246 = vmatprep.subr.mxu1 %v19933_v37  ;;  %17225 = vmatprep.subr.mxu0 %v19933_v37 }
0x3258   :  { %17226 = vmatpush3.msra.mxu0 %v19331_v22  ;;  %17229 = vmatprep.mubr.msk.f32.mxu0 %vm17801_vm10, %v19933_v37 }
0x3259   :  { %17227 = vmatprep.subr.mxu0 %v19933_v37 }
0x325a   :  { %17228 = vmatpush3.msra.mxu0 %v19335_v27 }
0x325b   :  { %17239 = vmatprep.subr.mxu0 %v19933_v37 }
0x3306   :  { %v12033_v19 = vpop.f32.mrf.mxu1 }
0x3308   :  { %v17196_v20 = vpop.f32.mrf.mxu1 }
0x330a   :  { %v12184_v32 = vpop.f32.mrf.mxu1 }
0x330c   :  { %v17210_v35 = vpop.f32.mrf.mxu1 }
0x330e   :  { %v11952_v11 = vpop.f32.mrf.mxu0  ;;  %v12334_v30 = vpop.f32.mrf.mxu1 }
0x330f   :  { %v11953_v14 = vadd.f32 %v19447_v9, %v11952_v11 }
0x3310   :  { %v17189_v54 = vpop.f32.mrf.mxu0  ;;  %v17224_v12 = vpop.f32.mrf.mxu1 }
0x3311   :  { %v12034_v3 = vadd.f32 %v12033_v19, %v11953_v14 }
0x3312   :  { %v12109_v58 = vpop.f32.mrf.mxu0 }
0x3313   :  { %v12110_v43 = vadd.f32 %v12109_v58, %v12034_v3 }
0x3314   :  { %v17203_v29 = vpop.f32.mrf.mxu0 }
0x3315   :  { %v12185_v4 = vadd.f32 %v12184_v32, %v12110_v43 }
0x3316   :  { %v12261_v13 = vpop.f32.mrf.mxu0 }
0x3317   :  { %v12262_v59 = vadd.f32 %v12261_v13, %v12185_v4  ;;  %v12864_v13 = vld [vmem:[%s19916_s13] sm:$0xf] }
0x3318   :  { %v17217_v50 = vpop.f32.mrf.mxu0 }
0x3319   :  { %v12335_v60 = vadd.f32 %v12334_v30, %v12262_v59 }
0x331b   :  { %12346 = vrot.lane.b32.xlu0 %v12335_v60, %s17802_s5  ;;  %v12338_v62 = vadd.f32 %v12335_v60, %v18443_v7 }
0x331d   :  { %v15212_v51 = vmul.f32 -1.442695, %v12338_v62 }
0x331f   :  { %17555 = vpow2.f32 %v15212_v51 }
0x332c   :  { %v17556_v47 = vpop.eup %17555 }
0x332d   :  { %v12342_v1 = vadd.f32 1.0, %v17556_v47 }
0x332f   :  { %17557 = vrcp.f32 %v12342_v1 }
0x333c   :  { %v17558_v21 = vpop.eup %17557 }
0x333d   :  { %v12356_v8 = vsub.f32 1.0, %v17558_v21  ;;  %v12362_v16 = vmul.f32 %v17558_v21, %v19606_v18 }
0x338d   :  { %v12347_v55 = vpop.permute.xlu0 %12346 }
0x338e   :  { %v12349_v5 = vmul.f32 %v17558_v21, %v12347_v55 }
0x3390   :  { %12351 = vrot.lane.b32.xlu1 %v12349_v5, %s17803_s6 }
0x3402   :  { %v12352_v15 = vpop.permute.xlu1 %12351 }
0x3403   :  { %v12354_v52 = vadd.f32 %v12352_v15, %v18443_v7  ;;  %v9827_v7 = vadd.f32 %v19449_v57, %v18402_v61 }
0x3405   :  { %17559 = vtanh.f32 %v12354_v52  ;;  %v15206_v6 = vmul.f32 -1.442695, %v9827_v7  ;;  %v12863_v7 = vld [vmem:[%s19915_s12] sm:$0xf] }
0x3407   :  { %17561 = vpow2.f32 %v15206_v6 }
0x3412   :  { %v17560_v36 = vpop.eup %17559 }
0x3413   :  { %12358 = vrot.lane.b32.xlu0 %v17560_v36, %s17804_s21 }
0x3414   :  { %v17562_v49 = vpop.eup %17561 }
0x3415   :  { %v9831_v0 = vadd.f32 1.0, %v17562_v49 }
0x3417   :  { %17563 = vrcp.f32 %v9831_v0 }
0x3424   :  { %v19663_v10 = vpop.eup %17563 }
0x3425   :  { %v9845_v58 = vsub.f32 1.0, %v19663_v10  ;;  %v9851_v29 = vmul.f32 %v19663_v10, %v19323_v33 }
0x3485   :  { %v12359_v2 = vpop.permute.xlu0 %12358 }
0x3486   :  { %v12361_v63 = vmul.f32 %v12359_v2, %v12356_v8  ;;  %v17806_v2 = vmov 0  }
0x3487   :  { %17439 = vset.pattern.permute.xlu0 %v17806_v2  ;;  %17440 = vset.pattern.permute.xlu1 %v17806_v2  ;;  %v17807_v2 = vmov 1  }
0x3488   :  { %v19654_v46 = vadd.f32 %v12362_v16, %v12361_v63  ;;  %v12869_v16 = vsel %vm9874_vm15, %v12864_v13, 0 }
0x3489   :  { %v19720_v63 = vand.u32 4294901760, %v12869_v16 }
0x348a   :  { %12374 = vrot.lane.b32.xlu1 %v19654_v46, %s17804_s21 }
0x348e   :  { %9835 = vrot.lane.b32.xlu1 %v19449_v57, %s17789_s19 }
0x34fc   :  { %v12375_v45 = vpop.permute.xlu1 %12374 }
0x34fd   :  { %v12376_v34 = vsel %vm9874_vm15, %v12375_v45, 0 }
0x34fe   :  { %v12445_v38 = vand.u32 4294901760, %v12376_v34 }
0x3500   :  { %v12446_v42 = vsub.f32 %v12376_v34, %v12445_v38  ;;  %17237 = vmatmul.mubr.f32.vlgmr.msra.gmra.mxu1 %v12445_v38  ;;  %v9836_v18 = vpop.permute.xlu1 %9835 }
0x3501   :  { %v9838_v23 = vmul.f32 %v19663_v10, %v9836_v18  ;;  %17247 = vmatpush3.msra.mxu1 %v19331_v22  ;;  %17250 = vmatprep.mubr.msk.f32.mxu1 %vm17801_vm10, %v19933_v37 }
0x3502   :  { %v12447_v57 = vand.u32 4294901760, %v12446_v42  ;;  %17248 = vmatprep.subr.mxu1 %v19933_v37 }
0x3503   :  { %17249 = vmatpush3.msra.mxu1 %v19335_v27  ;;  %9840 = vrot.lane.b32.xlu1 %v9838_v23, %s17789_s19 }
0x3504   :  { %v12448_v24 = vsub.f32 %v12446_v42, %v12447_v57  ;;  %17251 = vmatmul.mubr.f32.vlgmr.msra.gmra.mxu1 %v12447_v57  ;;  %17260 = vmatprep.subr.mxu1 %v19933_v37 }
0x3505   :  { %17261 = vmatpush3.msra.mxu1 %v19331_v22  ;;  %17264 = vmatprep.mubr.msk.f32.mxu1 %vm17801_vm10, %v19933_v37 }
0x3506   :  { %v12449_v25 = vand.u32 4294901760, %v12448_v24  ;;  %17262 = vmatprep.subr.mxu1 %v19933_v37 }
0x3507   :  { %17263 = vmatpush3.msra.mxu1 %v19335_v27 }
0x3508   :  { %17230 = vmatmul.mubr.f32.vlgmr.msra.gmra.mxu0 %v12449_v25  ;;  %17265 = vmatmul.mubr.f32.vlgmr.msra.gmra.mxu1 %v12445_v38 }
0x3509   :  { %17240 = vmatpush3.msra.mxu0 %v19340_v39  ;;  %17243 = vmatprep.mubr.msk.f32.mxu0 %vm17801_vm10, %v19933_v37 }
0x350a   :  { %17241 = vmatprep.subr.mxu0 %v19933_v37  ;;  %17272 = vmatprep.subr.mxu1 %v19933_v37 }
0x350b   :  { %17242 = vmatpush3.msra.mxu0 %v19345_v53  ;;  %17274 = vmatprep.mubr.msk.f32.mxu1 %vm17801_vm10, %v19933_v37 }
0x350c   :  { %17244 = vmatmul.mubr.f32.vlgmr.msra.gmra.mxu0 %v12446_v42  ;;  %17253 = vmatprep.subr.mxu0 %v19933_v37 }
0x350d   :  { %17254 = vmatpush3.msra.mxu0 %v19350_v56  ;;  %17257 = vmatprep.mubr.msk.f32.mxu0 %vm17801_vm10, %v19933_v37 }
0x350e   :  { %17255 = vmatprep.subr.mxu0 %v19933_v37 }
0x350f   :  { %17256 = vmatpush3.msra.mxu0 %v19357_v48 }
0x3510   :  { %17258 = vmatmul.mubr.f32.vlgmr.msra.gmra.mxu0 %v12445_v38  ;;  %17267 = vmatprep.subr.mxu0 %v19933_v37 }
0x3511   :  { %17269 = vmatprep.mubr.msk.f32.mxu0 %vm17801_vm10, %v19933_v37 }
0x3575   :  { %v9841_v22 = vpop.permute.xlu1 %9840 }
0x3576   :  { %v9843_v27 = vadd.f32 %v9841_v22, %v18402_v61 }
0x3578   :  { %17565 = vtanh.f32 %v9843_v27 }
0x3585   :  { %v17566_v39 = vpop.eup %17565 }
0x3586   :  { %9847 = vrot.lane.b32.xlu1 %v17566_v39, %s17802_s5 }
0x35c0   :  { %v12532_v53 = vpop.f32.mrf.mxu1 }
0x35c2   :  { %v17238_v56 = vpop.f32.mrf.mxu1 }
0x35c4   :  { %v12683_v26 = vpop.f32.mrf.mxu1 }
0x35c6   :  { %v17252_v44 = vpop.f32.mrf.mxu1 }
0x35c8   :  { %v12451_v28 = vpop.f32.mrf.mxu0  ;;  %v12833_v31 = vpop.f32.mrf.mxu1 }
0x35c9   :  { %v12452_v48 = vadd.f32 %v19447_v9, %v12451_v28 }
0x35ca   :  { %v17231_v19 = vpop.f32.mrf.mxu0  ;;  %v17266_v20 = vpop.f32.mrf.mxu1 }
0x35cb   :  { %v12533_v32 = vadd.f32 %v12532_v53, %v12452_v48 }
0x35cc   :  { %v12608_v35 = vpop.f32.mrf.mxu0 }
0x35cd   :  { %v12609_v11 = vadd.f32 %v12608_v35, %v12533_v32 }
0x35ce   :  { %v17245_v30 = vpop.f32.mrf.mxu0 }
0x35cf   :  { %v12684_v14 = vadd.f32 %v12683_v26, %v12609_v11 }
0x35d0   :  { %v12760_v61 = vpop.f32.mrf.mxu0 }
0x35d1   :  { %v12761_v54 = vadd.f32 %v12760_v61, %v12684_v14  ;;  %v14236_v61 = vld [vmem:[%s19918_s15] sm:$0xf] }
0x35d2   :  { %v17259_v12 = vpop.f32.mrf.mxu0 }
0x35d3   :  { %v12834_v3 = vadd.f32 %v12833_v31, %v12761_v54 }
0x35d5   :  { %12845 = vrot.lane.b32.xlu0 %v12834_v3, %s17802_s5  ;;  %v12837_v59 = vadd.f32 %v12834_v3, %v18446_v17 }
0x35d7   :  { %v15213_v50 = vmul.f32 -1.442695, %v12837_v59 }
0x35d9   :  { %17567 = vpow2.f32 %v15213_v50 }
0x35e6   :  { %v17568_v60 = vpop.eup %17567 }
0x35e7   :  { %v12841_v62 = vadd.f32 1.0, %v17568_v60 }
0x35e9   :  { %17569 = vrcp.f32 %v12841_v62 }
0x35f6   :  { %v17570_v33 = vpop.eup %17569 }
0x35f7   :  { %v12861_v15 = vmul.f32 %v17570_v33, %v19654_v46  ;;  %v12940_v46 = vsub.f32 %v12869_v16, %v19720_v63 }
0x35f8   :  { %v9848_v43 = vpop.permute.xlu1 %9847 }
0x35f9   :  { %v9850_v9 = vmul.f32 %v9848_v43, %v9845_v58  ;;  %v12941_v6 = vand.u32 4294901760, %v12940_v46  ;;  %v14250_v43 = vsel %vm190_vm1, %v14236_v61, 0 }
0x35fb   :  { %v9852_v4 = vadd.f32 %v9851_v29, %v9850_v9  ;;  %v12942_v49 = vsub.f32 %v12940_v46, %v12941_v6 }
0x35fd   :  { %13320 = vrot.lane.b32.xlu1 %v9852_v4, %s17802_s5  ;;  %v12943_v42 = vand.u32 4294901760, %v12942_v49 }
0x3601   :  { %13773 = vrot.lane.b32.xlu1 %v12864_v13, %s17804_s21  ;;  %v19795_v13 = vand.u32 4294901760, %v14250_v43 }
0x3603   :  { %v14360_v62 = vsub.f32 %v14250_v43, %v19795_v13 }
0x3605   :  { %14707 = vrot.lane.b32.xlu1 %v17960_v40, %s17805_s11  ;;  %v12855_v40 = vsub.f32 1.0, %v17570_v33 }
0x3647   :  { %v12846_v51 = vpop.permute.xlu0 %12845 }
0x3648   :  { %v12848_v47 = vmul.f32 %v17570_v33, %v12846_v51 }
0x364a   :  { %12850 = vrot.lane.b32.xlu0 %v12848_v47, %s17803_s6 }
0x366f   :  { %v13321_v45 = vpop.permute.xlu1 %13320 }
0x3670   :  { %v13325_v18 = vsel %vm2570_vm14, %v13321_v45, 0 }
0x3671   :  { %v19735_v24 = vand.u32 4294901760, %v13325_v18 }
0x3673   :  { %v13774_v22 = vpop.permute.xlu1 %13773  ;;  %v13435_v56 = vsub.f32 %v13325_v18, %v19735_v24 }
0x3674   :  { %v13778_v39 = vsel %vm9874_vm15, %v13774_v22, 0 }
0x3675   :  { %v19743_v44 = vand.u32 4294901760, %v13778_v39  ;;  %v13436_v48 = vand.u32 4294901760, %v13435_v56 }
0x3677   :  { %v19753_v19 = vsub.f32 %v13778_v39, %v19743_v44  ;;  %v13437_v35 = vsub.f32 %v13435_v56, %v13436_v48  ;;  %v14708_v60 = vpop.permute.xlu1 %14707 }
0x3678   :  { %v14709_v51 = vsel %vm276_vm7, %v14708_v60, 0 }
0x3679   :  { %v13850_v30 = vand.u32 4294901760, %v19753_v19  ;;  %v13438_v54 = vand.u32 4294901760, %v13437_v35 }
0x367b   :  { %v13851_v58 = vsub.f32 %v19753_v19, %v13850_v30 }
0x367d   :  { %v13852_v4 = vand.u32 4294901760, %v13851_v58 }
0x36bc   :  { %v12851_v1 = vpop.permute.xlu0 %12850 }
0x36bd   :  { %v12853_v21 = vadd.f32 %v12851_v1, %v18446_v17  ;;  %v14229_v17 = vld [vmem:[%s19917_s14] sm:$0xf]  ;;  %v14361_v1 = vand.u32 4294901760, %v14360_v62 }
0x36bf   :  { %17571 = vtanh.f32 %v12853_v21  ;;  %v19822_v21 = vand.u32 4294901760, %v14709_v51 }
0x36cc   :  { %v17572_v55 = vpop.eup %17571 }
0x36cd   :  { %12857 = vrot.lane.b32.xlu0 %v17572_v55, %s17804_s21 }
0x373f   :  { %v12858_v5 = vpop.permute.xlu0 %12857 }
0x3740   :  { %v12860_v52 = vmul.f32 %v12858_v5, %v12855_v40  ;;  %v14362_v40 = vsub.f32 %v14360_v62, %v14361_v1  ;;  %v14778_v5 = vsub.f32 %v14709_v51, %v19822_v21 }
0x3742   :  { %v12862_v36 = vadd.f32 %v12861_v15, %v12860_v52  ;;  %v14363_v52 = vand.u32 4294901760, %v14362_v40 }
0x3744   :  { %12866 = vrot.lane.b32.xlu0 %v12862_v36, %s17804_s21  ;;  %v13775_v8 = vrot.slane %v12862_v36, 2  ;;  %v14779_v36 = vand.u32 4294901760, %v14778_v5 }
0x3748   :  { %13776 = vrot.lane.b32.xlu0 %v13775_v8, %s17804_s21  ;;  %v14780_v8 = vsub.f32 %v14778_v5, %v14779_v36 }
0x374c   :  { %14245 = vrot.lane.b32.xlu0 %v17962_v41, %s17805_s11  ;;  %v13323_v41 = vsel %vm2570_vm14, %v12863_v7, 0 }
0x374d   :  { %v19727_v0 = vand.u32 4294901760, %v13323_v41 }
0x374f   :  { %v19732_v23 = vsub.f32 %v13323_v41, %v19727_v0 }
0x3750   :  { %14232 = vperm.xlu0 %17439, %v14229_v17   ;;  %v14781_v17 = vand.u32 4294901760, %v14780_v8 }
0x3751   :  { %v13395_v27 = vand.u32 4294901760, %v19732_v23 }
0x3753   :  { %v13396_v28 = vsub.f32 %v19732_v23, %v13395_v27 }
0x3754   :  { %17442 = vset.pattern.permute.xlu0 %v17807_v2 }
0x3755   :  { %v13397_v32 = vand.u32 4294901760, %v13396_v28 }
0x37b6   :  { %v12867_v34 = vpop.permute.xlu0 %12866 }
0x37b7   :  { %v12871_v38 = vsel %vm9874_vm15, %v12867_v34, 0 }
0x37b8   :  { %v12904_v10 = vand.u32 4294901760, %v12871_v38 }
0x37ba   :  { %v12981_v57 = vsub.f32 %v12871_v38, %v12904_v10  ;;  %17268 = vmatpush3.xpose.msra.mxu0 %v12904_v10  ;;  %v13777_v31 = vpop.permute.xlu0 %13776 }
0x37bb   :  { %17277 = vmatprep.subr.mxu0 %v19933_v37  ;;  %v13780_v20 = vsel %vm9874_vm15, %v13777_v31, 0 }
0x37bc   :  { %v12982_v25 = vand.u32 4294901760, %v12981_v57  ;;  %v19763_v11 = vand.u32 4294901760, %v13780_v20 }
0x37bd   :  { %17270 = vmatmul.mubr.f32.vlgmr.msra.gmra.mxu0 %v12943_v42 }
0x37be   :  { %v12983_v53 = vsub.f32 %v12981_v57, %v12982_v25  ;;  %17278 = vmatpush3.xpose.msra.mxu0 %v12981_v57  ;;  %17279 = vmatprep.mubr.msk.f32.mxu0 %vm17801_vm10, %v19933_v37  ;;  %v14246_v14 = vpop.permute.xlu0 %14245  ;;  %v13890_v12 = vsub.f32 %v13780_v20, %v19763_v11 }
0x37bf   :  { %17287 = vmatprep.subr.mxu0 %v19933_v37  ;;  %v14247_v3 = vsel %vm276_vm7, %v14246_v14, 0 }
0x37c0   :  { %v12984_v26 = vand.u32 4294901760, %v12983_v53  ;;  %v19785_v29 = vand.u32 4294901760, %v14247_v3  ;;  %v13891_v9 = vand.u32 4294901760, %v13890_v12 }
0x37c1   :  { %17280 = vmatmul.mubr.f32.vlgmr.msra.gmra.mxu0 %v12940_v46 }
0x37c2   :  { %17273 = vmatpush3.xpose.msra.mxu1 %v12984_v26  ;;  %17288 = vmatpush3.xpose.msra.mxu0 %v12982_v25  ;;  %v19800_v59 = vsub.f32 %v14247_v3, %v19785_v29  ;;  %v13892_v50 = vsub.f32 %v13890_v12, %v13891_v9 }
0x37c3   :  { %17289 = vmatprep.mubr.msk.f32.mxu0 %vm17801_vm10, %v19933_v37  ;;  %17282 = vmatprep.subr.mxu1 %v19933_v37 }
0x37c4   :  { %17297 = vmatprep.subr.mxu0 %v19933_v37  ;;  %v14320_v33 = vand.u32 4294901760, %v19800_v59  ;;  %v13893_v47 = vand.u32 4294901760, %v13892_v50 }
0x37c5   :  { %17275 = vmatmul.mubr.f32.vlgmr.msra.gmra.mxu1 %v19720_v63  ;;  %17290 = vmatmul.mubr.f32.vlgmr.msra.gmra.mxu0 %v19720_v63 }
0x37c6   :  { %17283 = vmatpush3.xpose.msra.mxu1 %v12904_v10  ;;  %17298 = vmatpush3.xpose.msra.mxu0 %v19735_v24  ;;  %v14321_v55 = vsub.f32 %v19800_v59, %v14320_v33 }
0x37c7   :  { %17284 = vmatprep.mubr.msk.f32.mxu1 %vm17801_vm10, %v19933_v37  ;;  %17299 = vmatprep.mubr.msk.f32.mxu0 %vm17801_vm10, %v19933_v37 }
0x37c8   :  { %17292 = vmatprep.subr.mxu1 %v19933_v37  ;;  %17307 = vmatprep.subr.mxu0 %v19933_v37  ;;  %v14322_v15 = vand.u32 4294901760, %v14321_v55 }
0x37c9   :  { %17285 = vmatmul.mubr.f32.vlgmr.msra.gmra.mxu1 %v12941_v6  ;;  %17300 = vmatmul.mubr.f32.vlgmr.msra.gmra.mxu0 %v13397_v32 }
0x37ca   :  { %17293 = vmatpush3.xpose.msra.mxu1 %v12904_v10  ;;  %17308 = vmatpush3.xpose.msra.mxu0 %v13435_v56 }
0x37cb   :  { %17294 = vmatprep.mubr.msk.f32.mxu1 %vm17801_vm10, %v19933_v37  ;;  %17309 = vmatprep.mubr.msk.f32.mxu0 %vm17801_vm10, %v19933_v37  ;;  %v14233_v55 = vpop.permute.xlu0 %14232 }
0x37cc   :  { %17302 = vmatprep.subr.mxu1 %v19933_v37  ;;  %17317 = vmatprep.subr.mxu0 %v19933_v37 }
0x37cd   :  { %17295 = vmatmul.mubr.f32.vlgmr.msra.gmra.mxu1 %v19720_v63  ;;  %17310 = vmatmul.mubr.f32.vlgmr.msra.gmra.mxu0 %v19732_v23 }
0x37ce   :  { %17303 = vmatpush3.xpose.msra.mxu1 %v13438_v54  ;;  %17318 = vmatpush3.xpose.msra.mxu0 %v13436_v48 }
0x37cf   :  { %17304 = vmatprep.mubr.msk.f32.mxu1 %vm17801_vm10, %v19933_v37  ;;  %17319 = vmatprep.mubr.msk.f32.mxu0 %vm17801_vm10, %v19933_v37 }
0x37d0   :  { %17312 = vmatprep.subr.mxu1 %v19933_v37  ;;  %17327 = vmatprep.subr.mxu0 %v19933_v37 }
0x37d1   :  { %17305 = vmatmul.mubr.f32.vlgmr.msra.gmra.mxu1 %v19727_v0  ;;  %17320 = vmatmul.mubr.f32.vlgmr.msra.gmra.mxu0 %v19727_v0 }
0x37d2   :  { %17313 = vmatpush3.xpose.msra.mxu1 %v19735_v24  ;;  %17328 = vmatpush3.xpose.msra.mxu0 %v19763_v11 }
0x37d3   :  { %17314 = vmatprep.mubr.msk.f32.mxu1 %vm17801_vm10, %v19933_v37  ;;  %17329 = vmatprep.mubr.msk.f32.mxu0 %vm17801_vm10, %v19933_v37 }
0x37d4   :  { %17322 = vmatprep.subr.mxu1 %v19933_v37  ;;  %17337 = vmatprep.subr.mxu0 %v19933_v37 }
0x37d5   :  { %17315 = vmatmul.mubr.f32.vlgmr.msra.gmra.mxu1 %v13395_v27  ;;  %17330 = vmatmul.mubr.f32.vlgmr.msra.gmra.mxu0 %v13852_v4 }
0x37d6   :  { %17323 = vmatpush3.xpose.msra.mxu1 %v19735_v24  ;;  %17338 = vmatpush3.xpose.msra.mxu0 %v13890_v12 }
0x37d7   :  { %17324 = vmatprep.mubr.msk.f32.mxu1 %vm17801_vm10, %v19933_v37  ;;  %17339 = vmatprep.mubr.msk.f32.mxu0 %vm17801_vm10, %v19933_v37 }
0x37d8   :  { %17332 = vmatprep.subr.mxu1 %v19933_v37  ;;  %17347 = vmatprep.subr.mxu0 %v19933_v37 }
0x37d9   :  { %17325 = vmatmul.mubr.f32.vlgmr.msra.gmra.mxu1 %v19727_v0  ;;  %17340 = vmatmul.mubr.f32.vlgmr.msra.gmra.mxu0 %v19753_v19 }
0x37da   :  { %17333 = vmatpush3.xpose.msra.mxu1 %v13893_v47  ;;  %17348 = vmatpush3.xpose.msra.mxu0 %v13891_v9 }
0x37db   :  { %17334 = vmatprep.mubr.msk.f32.mxu1 %vm17801_vm10, %v19933_v37  ;;  %17349 = vmatprep.mubr.msk.f32.mxu0 %vm17801_vm10, %v19933_v37 }
0x37dc   :  { %17342 = vmatprep.subr.mxu1 %v19933_v37  ;;  %17357 = vmatprep.subr.mxu0 %v19933_v37 }
0x37dd   :  { %17335 = vmatmul.mubr.f32.vlgmr.msra.gmra.mxu1 %v19743_v44  ;;  %17350 = vmatmul.mubr.f32.vlgmr.msra.gmra.mxu0 %v19743_v44 }
0x37de   :  { %17343 = vmatpush3.xpose.msra.mxu1 %v19763_v11  ;;  %17344 = vmatprep.mubr.msk.f32.mxu1 %vm17801_vm10, %v19933_v37 }
0x37df   :  { %17358 = vmatpush3.msra.mxu0 %v19795_v13  ;;  %17359 = vmatprep.mubr.msk.f32.mxu0 %vm17801_vm10, %v19933_v37 }
0x37e0   :  { %17352 = vmatprep.subr.mxu1 %v19933_v37  ;;  %17367 = vmatprep.subr.mxu0 %v19933_v37 }
0x37e1   :  { %17345 = vmatmul.mubr.f32.vlgmr.msra.gmra.mxu1 %v13850_v30  ;;  %17360 = vmatmul.mubr.f32.vlgmr.msra.gmra.mxu0 %v14322_v15 }
0x37e2   :  { %17353 = vmatpush3.xpose.msra.mxu1 %v19763_v11  ;;  %17354 = vmatprep.mubr.msk.f32.mxu1 %vm17801_vm10, %v19933_v37 }
0x37e3   :  { %17368 = vmatpush3.msra.mxu0 %v14360_v62  ;;  %17369 = vmatprep.mubr.msk.f32.mxu0 %vm17801_vm10, %v19933_v37 }
0x37e4   :  { %17362 = vmatprep.subr.mxu1 %v19933_v37  ;;  %17377 = vmatprep.subr.mxu0 %v19933_v37 }
0x37e5   :  { %17355 = vmatmul.mubr.f32.vlgmr.msra.gmra.mxu1 %v19743_v44  ;;  %17370 = vmatmul.mubr.f32.vlgmr.msra.gmra.mxu0 %v19800_v59 }
0x37e6   :  { %17363 = vmatpush3.msra.mxu1 %v14363_v52  ;;  %17364 = vmatprep.mubr.msk.f32.mxu1 %vm17801_vm10, %v19933_v37 }
0x37e7   :  { %17378 = vmatpush3.msra.mxu0 %v14361_v1  ;;  %17379 = vmatprep.mubr.msk.f32.mxu0 %vm17801_vm10, %v19933_v37 }
0x37e8   :  { %17372 = vmatprep.subr.mxu1 %v19933_v37  ;;  %17387 = vmatprep.subr.mxu0 %v19933_v37 }
0x37e9   :  { %17365 = vmatmul.mubr.f32.vlgmr.msra.gmra.mxu1 %v19785_v29  ;;  %17380 = vmatmul.mubr.f32.vlgmr.msra.gmra.mxu0 %v19785_v29 }
0x37ea   :  { %17373 = vmatpush3.msra.mxu1 %v19795_v13  ;;  %17374 = vmatprep.mubr.msk.f32.mxu1 %vm17801_vm10, %v19933_v37 }
0x37eb   :  { %17388 = vmatpush3.msra.mxu0 %v19795_v13  ;;  %17389 = vmatprep.mubr.msk.f32.mxu0 %vm17801_vm10, %v19933_v37 }
0x37ec   :  { %17382 = vmatprep.subr.mxu1 %v19933_v37  ;;  %17397 = vmatprep.subr.mxu0 %v19933_v37 }
0x37ed   :  { %17375 = vmatmul.mubr.f32.vlgmr.msra.gmra.mxu1 %v14320_v33  ;;  %17390 = vmatmul.mubr.f32.vlgmr.msra.gmra.mxu0 %v14781_v17  ;;  %v15214_v33 = vld [vmem:[%s19919_s16] ss:$0 sm:$0xff]  ;;  %s17808_s16 = smov [#allocation17]  }
0x37ee   :  { %17383 = vmatpush3.msra.mxu1 %v19795_v13  ;;  %17384 = vmatprep.mubr.msk.f32.mxu1 %vm17801_vm10, %v19933_v37  ;;  %s15169_s24 = sshll.u32 %s17808_s16, 4  ;;  %s15170_s24 = int_to_ptr.vmem [resolvable:$true] %s15169_s24 }
0x37ef   :  { %17398 = vmatpush3.msra.mxu0 %v14360_v62  ;;  %17399 = vmatprep.mubr.msk.f32.mxu0 %vm17801_vm10, %v19933_v37  ;;  %s17755_s25 = scalar_lea.vmem %s15170_s24, 128  ;;  %p17760_p4 = scmp.lt.s32.totalorder %s15170_s24, %s15170_s24 }
0x37f0   :  { %17392 = vmatprep.subr.mxu1 %v19933_v37  ;;  %17407 = vmatprep.subr.mxu0 %v19933_v37  ;;  %p17756_p3 = scmp.ne.s32.totalorder %s15170_s24, %s17755_s25  ;;  %p17761_p5 = scmp.lt.s32.totalorder %s17755_s25, %s17755_s25 }
0x37f1   :  { %17385 = vmatmul.mubr.f32.vlgmr.msra.gmra.mxu1 %v19785_v29  ;;  %17400 = vmatmul.mubr.f32.vlgmr.msra.gmra.mxu0 %v14778_v5 }
0x37f2   :  { %17393 = vmatpush3.msra.mxu1 %v14363_v52  ;;  %17394 = vmatprep.mubr.msk.f32.mxu1 %vm17801_vm10, %v19933_v37  ;;  %p17762_p6 = por %p17761_p5, %p17760_p4 }
0x37f3   :  { %17408 = vmatpush3.msra.mxu0 %v14361_v1  ;;  %17409 = vmatprep.mubr.msk.f32.mxu0 %vm17801_vm10, %v19933_v37 }
0x37f4   :  { %17402 = vmatprep.subr.mxu1 %v19933_v37  ;;  %p17763_p7 = pnand %p17762_p6, %p17756_p3 }
0x37f5   :  { %17395 = vmatmul.mubr.f32.vlgmr.msra.gmra.mxu1 %v19822_v21  ;;  %17410 = vmatmul.mubr.f32.vlgmr.msra.gmra.mxu0 %v19822_v21 }
0x37f6   :  { %17403 = vmatpush3.msra.mxu1 %v19795_v13  ;;  %17404 = vmatprep.mubr.msk.f32.mxu1 %vm17801_vm10, %v19933_v37 }
0x37f7   :  { %17412 = vmatprep.subr.mxu1 %v19933_v37 }
0x37f9   :  { %17405 = vmatmul.mubr.f32.vlgmr.msra.gmra.mxu1 %v14779_v36 }
0x37fa   :  { %17413 = vmatpush3.msra.mxu1 %v19795_v13  ;;  %17414 = vmatprep.mubr.msk.f32.mxu1 %vm17801_vm10, %v19933_v37 }
0x37fd   :  { %17415 = vmatmul.mubr.f32.vlgmr.msra.gmra.mxu1 %v19822_v21 }
0x387d   :  { %v12945_v16 = vpop.f32.mrf.mxu0 }
0x387f   :  { %v17271_v63 = vpop.f32.mrf.mxu0 }
0x3881   :  { %v13095_v46 = vpop.f32.mrf.mxu0 }
0x3883   :  { %v17281_v7 = vpop.f32.mrf.mxu0 }
0x3885   :  { %v13021_v6 = vpop.f32.mrf.mxu1  ;;  %v13243_v41 = vpop.f32.mrf.mxu0 }
0x3886   :  { %v13022_v49 = vadd.f32 %v13021_v6, %v12945_v16 }
0x3887   :  { %v17276_v0 = vpop.f32.mrf.mxu1  ;;  %v17291_v45 = vpop.f32.mrf.mxu0 }
0x3888   :  { %v13096_v34 = vadd.f32 %v13095_v46, %v13022_v49 }
0x3889   :  { %v13169_v38 = vpop.f32.mrf.mxu1  ;;  %v13399_v10 = vpop.f32.mrf.mxu0 }
0x388a   :  { %v13170_v42 = vadd.f32 %v13169_v38, %v13096_v34 }
0x388b   :  { %v17286_v18 = vpop.f32.mrf.mxu1  ;;  %v17301_v37 = vpop.f32.mrf.mxu0 }
0x388c   :  { %v13244_v23 = vadd.f32 %v13243_v41, %v13170_v42 }
0x388d   :  { %v13315_v57 = vpop.f32.mrf.mxu1  ;;  %v13549_v24 = vpop.f32.mrf.mxu0 }
0x388e   :  { %v13316_v25 = vadd.f32 %v13315_v57, %v13244_v23 }
0x388f   :  { %v17296_v22 = vpop.f32.mrf.mxu1  ;;  %v17311_v27 = vpop.f32.mrf.mxu0 }
0x3890   :  { %v13400_v56 = vadd.f32 %v13399_v10, %v13316_v25 }
0x3891   :  { %v13475_v39 = vpop.f32.mrf.mxu1  ;;  %v13697_v53 = vpop.f32.mrf.mxu0 }
0x3892   :  { %v13476_v48 = vadd.f32 %v13475_v39, %v13400_v56 }
0x3893   :  { %v17306_v26 = vpop.f32.mrf.mxu1  ;;  %v17321_v44 = vpop.f32.mrf.mxu0 }
0x3894   :  { %v13550_v11 = vadd.f32 %v13549_v24, %v13476_v48 }
0x3895   :  { %v13623_v28 = vpop.f32.mrf.mxu1  ;;  %v13854_v31 = vpop.f32.mrf.mxu0 }
0x3896   :  { %v13624_v12 = vadd.f32 %v13623_v28, %v13550_v11 }
0x3897   :  { %v17316_v19 = vpop.f32.mrf.mxu1  ;;  %v17331_v20 = vpop.f32.mrf.mxu0 }
0x3898   :  { %v13698_v13 = vadd.f32 %v13697_v53, %v13624_v12 }
0x3899   :  { %v13769_v32 = vpop.f32.mrf.mxu1  ;;  %v14004_v35 = vpop.f32.mrf.mxu0 }
0x389a   :  { %v13770_v1 = vadd.f32 %v13769_v32, %v13698_v13 }
0x389b   :  { %v17326_v30 = vpop.f32.mrf.mxu1  ;;  %v17341_v14 = vpop.f32.mrf.mxu0 }
0x389d   :  { %v13930_v61 = vpop.f32.mrf.mxu1  ;;  %v14152_v54 = vpop.f32.mrf.mxu0 }
0x389e   :  { %v13931_v3 = vadd.f32 %v13930_v61, %v13854_v31 }
0x389f   :  { %v17336_v58 = vpop.f32.mrf.mxu1  ;;  %v17351_v43 = vpop.f32.mrf.mxu0 }
0x38a0   :  { %v14005_v29 = vadd.f32 %v14004_v35, %v13931_v3 }
0x38a1   :  { %v14078_v9 = vpop.f32.mrf.mxu1  ;;  %v14324_v4 = vpop.f32.mrf.mxu0 }
0x38a2   :  { %v14079_v59 = vadd.f32 %v14078_v9, %v14005_v29  ;;  %v14325_v15 = vadd.f32 %v15214_v33, %v14324_v4 }
0x38a3   :  { %v17346_v50 = vpop.f32.mrf.mxu1  ;;  %v17361_v60 = vpop.f32.mrf.mxu0 }
0x38a4   :  { %v14153_v62 = vadd.f32 %v14152_v54, %v14079_v59 }
0x38a5   :  { %v14224_v51 = vpop.f32.mrf.mxu1  ;;  %v14474_v47 = vpop.f32.mrf.mxu0 }
0x38a6   :  { %v14225_v21 = vadd.f32 %v14224_v51, %v14153_v62 }
0x38a7   :  { %v17356_v40 = vpop.f32.mrf.mxu1  ;;  %v17371_v5 = vpop.f32.mrf.mxu0 }
0x38a8   :  { %v14228_v52 = vadd.f32 %v14225_v21, %v13770_v1 }
0x38a9   :  { %v14400_v36 = vpop.f32.mrf.mxu1  ;;  %v14622_v8 = vpop.f32.mrf.mxu0 }
0x38aa   :  { %v14401_v17 = vadd.f32 %v14400_v36, %v14325_v15  ;;  %v14235_v16 = vadd.f32 %v14233_v55, %v14228_v52 }
0x38ab   :  { %v17366_v63 = vpop.f32.mrf.mxu1  ;;  %v17381_v46 = vpop.f32.mrf.mxu0 }
0x38ac   :  { %14700 = vperm.xlu1 %17440, %v14235_v16   ;;  %v14475_v7 = vadd.f32 %v14474_v47, %v14401_v17 }
0x38ad   :  { %v14548_v6 = vpop.f32.mrf.mxu1  ;;  %v14783_v41 = vpop.f32.mrf.mxu0 }
0x38ae   :  { %v14549_v49 = vadd.f32 %v14548_v6, %v14475_v7  ;;  %v14784_v23 = vadd.f32 %v15214_v33, %v14783_v41 }
0x38af   :  { %v17376_v0 = vpop.f32.mrf.mxu1  ;;  %v17391_v45 = vpop.f32.mrf.mxu0 }
0x38b0   :  { %17441 = vset.pattern.permute.xlu1 %v17807_v2  ;;  %v14623_v34 = vadd.f32 %v14622_v8, %v14549_v49 }
0x38b1   :  { %v14694_v38 = vpop.f32.mrf.mxu1  ;;  %15158 = vperm.xlu1 %17441, %v14235_v16   ;;  %v14933_v10 = vpop.f32.mrf.mxu0 }
0x38b2   :  { %v14695_v42 = vadd.f32 %v14694_v38, %v14623_v34 }
0x38b3   :  { %v17386_v18 = vpop.f32.mrf.mxu1  ;;  %v17401_v37 = vpop.f32.mrf.mxu0 }
0x38b5   :  { %v14859_v57 = vpop.f32.mrf.mxu1  ;;  %v15081_v24 = vpop.f32.mrf.mxu0 }
0x38b6   :  { %v14860_v25 = vadd.f32 %v14859_v57, %v14784_v23 }
0x38b7   :  { %v17396_v22 = vpop.f32.mrf.mxu1  ;;  %v17411_v27 = vpop.f32.mrf.mxu0 }
0x38b8   :  { %v14934_v39 = vadd.f32 %v14933_v10, %v14860_v25 }
0x38b9   :  { %v15007_v53 = vpop.f32.mrf.mxu1 }
0x38ba   :  { %v15008_v56 = vadd.f32 %v15007_v53, %v14934_v39 }
0x38bb   :  { %v17406_v26 = vpop.f32.mrf.mxu1 }
0x38bc   :  { %v15082_v44 = vadd.f32 %v15081_v24, %v15008_v56 }
0x38bd   :  { %v15153_v28 = vpop.f32.mrf.mxu1 }
0x38be   :  { %v15154_v2 = vadd.f32 %v15153_v28, %v15082_v44 }
0x38bf   :  { %v17416_v31 = vpop.f32.mrf.mxu1 }
0x3927   :  { %v14701_v48 = vpop.permute.xlu1 %14700 }
0x3928   :  { %v14703_v19 = vadd.f32 %v14701_v48, %v14695_v42 }
0x392a   :  { %14705 = vst.msk [vmem:[#allocation17] sm:$0xf] %vm14704_vm0, %v14703_v19 }
0x392c   :  { %v15159_v20 = vpop.permute.xlu1 %15158 }
0x392d   :  { %v15161_v32 = vadd.f32 %v15159_v20, %v15154_v2 }
0x392f   :  { %15163 = vst.msk [vmem:[#allocation17 + $0x4] sm:$0xf] %vm14704_vm0, %v15161_v32 }
0x3930   :  { %17766 = shalt.err (!%p17763_p7)
}
0x3931   :  { %15175 = dma.vmem_to_hbm [thread:$0]  %s15170_s24, 128, %s19920_s17, [#allocation4], %s17789_s19, %s17789_s19, %s17790_s1  }
0x3932   :  { %17785 = dma.done.wait [#allocation4], 128  }
0x3933   :  { %17786 = vsyncadd [#allocation4], 4294967168 }
0x3934   :  { %15183 = vsyncpa [#allocation3], 1 }
0x3935   :  { %15184 = vsyncpa [#allocation6], 1 }
0x3936   :  { %15185 = vsyncpa [#allocation9], 1 }
0x3937   :  { %15186 = vsyncpa [#allocation12], 1 }
0x3938   :  { %15187 = vsyncpa [#allocation15], 1 }
0x3939   :  { %15188 = vsyncpa [#allocation4], 1 }

</bundles_post_ra>
